<compile_context>
chip_gen: v7x
topology: tpu7x:2x2x1
jax: 0.10.0
libtpu: 0.0.40
codegen_flags: <defaults>
</compile_context>

<pallas_src>
import math

import jax
import jax.numpy as jnp
from jax.experimental import pallas as pl
from jax.experimental.pallas import tpu as pltpu

_BN_EPS = 1e-5
_SLOPE = 0.2          # nn.LeakyReLU(negative_slope=0.2)
_PAD_LEFT = 8         # sublane-aligned left halo offset inside the scratch buffers


# --------------------------------------------------------------------------
# Eval-mode BN folding into conv weights (done once, in plain JAX)
# --------------------------------------------------------------------------
def _bn_fold(bn):
    gamma, beta, mean, var = bn
    scale = gamma / jnp.sqrt(var + _BN_EPS)
    shift = beta - mean * scale
    return scale, shift


def _fold_1x1(w_oihw, bn):
    """1x1 conv + BN -> (Cin, Cout) bf16 weight and (1, Cout) f32 bias."""
    scale, shift = _bn_fold(bn)
    w = w_oihw[:, :, 0, 0].T * scale[None, :]
    return w.astype(jnp.bfloat16), shift.reshape(1, -1).astype(jnp.float32)


def _fold_3x3(w_oihw, bn):
    """3x3 conv + BN -> (9, Cin, Cout) bf16 taps (t = ky*3+kx) and (1, Cout) f32 bias."""
    cout, cin = w_oihw.shape[0], w_oihw.shape[1]
    scale, shift = _bn_fold(bn)
    w = jnp.transpose(w_oihw, (2, 3, 1, 0)).reshape(9, cin, cout) * scale[None, None, :]
    return w.astype(jnp.bfloat16), shift.reshape(1, -1).astype(jnp.float32)


# --------------------------------------------------------------------------
# Fused per-image block kernel
# --------------------------------------------------------------------------
def _make_block_kernel(H, W, Cin, Cout):
    HW = H * W
    Hp, Wp = H // 2, W // 2
    L = _PAD_LEFT

    def leaky(v):
        return jnp.where(v > 0, v, jnp.float32(_SLOPE) * v)

    def kernel(x_ref, wcat_ref, bcat_ref, w2_ref, b2_ref, w3_ref, b3_ref,
               o_ref, cpad_ref, ppad_ref):
        sw = cpad_ref.shape[1]

        # ---- fused 1x1 convs: [conv1+bn1 | conv+bn] in one (Cin, 2*Cout) dot ----
        x = x_ref[0].reshape(HW, Cin)                                   # bf16
        fused = jnp.dot(x, wcat_ref[...],
                        preferred_element_type=jnp.float32) + bcat_ref[...]
        main = leaky(fused[:, :Cout])        # conv1 + bn1 + LeakyReLU   (f32)
        shortcut = fused[:, Cout:]           # shortcut conv + bn        (f32)

        # ---- conv2 3x3 + bn2 + LeakyReLU: zero-halo scratch ----------------------
        # Only the halo frame is initialised; the interior is written once below.
        zrow = jnp.zeros((1, sw, Cout), jnp.float32)
        cpad_ref[0:1, :, :] = zrow
        cpad_ref[H + 1:H + 2, :, :] = zrow
        cpad_ref[1:H + 1, 0:L, :] = jnp.zeros((H, L, Cout), jnp.float32)
        cpad_ref[1:H + 1, L + W:sw, :] = jnp.zeros((H, sw - L - W, Cout), jnp.float32)
        cpad_ref[1:H + 1, L:L + W, :] = main.reshape(H, W, Cout)

        acc = jnp.zeros((HW, Cout), jnp.float32)
        for dx in range(3):
            # One column-shift variant per dx (single cast); taps are row slices.
            vdx = cpad_ref[:, L - 1 + dx:L - 1 + dx + W, :].astype(jnp.bfloat16)
            for dy in range(3):
                tap = vdx[dy:dy + H].reshape(HW, Cout)
                acc = acc + jnp.dot(tap, w2_ref[3 * dy + dx],
                                    preferred_element_type=jnp.float32)
        y2 = leaky(acc + b2_ref[...]).astype(jnp.bfloat16)

        # ---- conv3 1x1 + bn3 + residual add + LeakyReLU --------------------------
        y3 = leaky(jnp.dot(y2, w3_ref[...],
                           preferred_element_type=jnp.float32)
                   + b3_ref[...] + shortcut)                            # f32 (HW, Cout)

        # ---- MaxPool2d(3, 2, 1): separable max with stride-2 picked in-kernel ----
        ninf = jnp.float32(-jnp.inf)
        nrow = jnp.full((1, sw, Cout), ninf, jnp.float32)
        ppad_ref[0:1, :, :] = nrow
        ppad_ref[H + 1:H + 2, :, :] = nrow
        ppad_ref[1:H + 1, 0:L, :] = jnp.full((H, L, Cout), ninf, jnp.float32)
        ppad_ref[1:H + 1, L + W:sw, :] = jnp.full((H, sw - L - W, Cout), ninf,
                                                  jnp.float32)
        ppad_ref[1:H + 1, L:L + W, :] = y3.reshape(H, W, Cout)

        # Column max at the Wp stride-2 output columns (one strided read per dx).
        cm = ppad_ref[:, pl.ds(L - 1, Wp, 2), :]
        cm = jnp.maximum(cm, ppad_ref[:, pl.ds(L, Wp, 2), :])
        cm = jnp.maximum(cm, ppad_ref[:, pl.ds(L + 1, Wp, 2), :])       # (H+2, Wp, Cout)

        # Row max at the Hp stride-2 output rows.
        for i in range(Hp):
            row = jnp.maximum(jnp.maximum(cm[2 * i], cm[2 * i + 1]), cm[2 * i + 2])
            o_ref[0, i, :, :] = row

    return kernel


# --------------------------------------------------------------------------
# ResNet12Block forward (wrapper)
# --------------------------------------------------------------------------
def resnet12_block_forward(params, x_nchw):
    N, Cin, H, W = x_nchw.shape
    Cout = params["conv_w"].shape[0]
    assert H % 2 == 0 and W % 2 == 0, "kernel assumes even spatial dims"
    Hp, Wp = H // 2, W // 2
    # MaxPool2d(3, 2, 1), ceil_mode=False  ->  out = floor((dim - 1) / 2) + 1
    assert Hp == (H - 1) // 2 + 1 and Wp == (W - 1) // 2 + 1

    # TODO(synk): this transpose+cast is still a separate XLA pass in front of
    # the fused kernel.
    x = jnp.transpose(x_nchw, (0, 2, 3, 1)).astype(jnp.bfloat16)

    wsc, bsc = _fold_1x1(params["conv_w"], params["bn"])
    w1, b1 = _fold_1x1(params["conv1_w"], params["bn1"])
    w2, b2 = _fold_3x3(params["conv2_w"], params["bn2"])
    w3, b3 = _fold_1x1(params["conv3_w"], params["bn3"])
    # Fuse shortcut + conv1 into one lane-dense (Cin, 2*Cout) matmul.
    wcat = jnp.concatenate([w1, wsc], axis=1)        # (Cin, 2*Cout) bf16
    bcat = jnp.concatenate([b1, bsc], axis=1)        # (1, 2*Cout)  f32

    # Halo-scratch width: data at [L, L+W), 1-wide halo each side, sublane aligned.
    sw = _PAD_LEFT + 8 * (-(-(W + 1) // 8))
    kernel = _make_block_kernel(H, W, Cin, Cout)

    flops = 2 * N * H * W * Cout * (2 * Cin + 10 * Cout)
    bytes_accessed = (x.size * 2 + N * Hp * Wp * Cout * 4 +
                      (wcat.size + w2.size + w3.size) * 2 +
                      (bcat.size + b2.size + b3.size) * 4)

    out = pl.pallas_call(
        kernel,
        out_shape=jax.ShapeDtypeStruct((N, Hp, Wp, Cout), jnp.float32),
        grid=(N,),
        in_specs=[
            pl.BlockSpec((1, H, W, Cin), lambda n: (n, 0, 0, 0)),
            pl.BlockSpec((Cin, 2 * Cout), lambda n: (0, 0)),
            pl.BlockSpec((1, 2 * Cout), lambda n: (0, 0)),
            pl.BlockSpec((9, Cout, Cout), lambda n: (0, 0, 0)),
            pl.BlockSpec((1, Cout), lambda n: (0, 0)),
            pl.BlockSpec((Cout, Cout), lambda n: (0, 0)),
            pl.BlockSpec((1, Cout), lambda n: (0, 0)),
        ],
        out_specs=pl.BlockSpec((1, Hp, Wp, Cout), lambda n: (n, 0, 0, 0)),
        scratch_shapes=[
            pltpu.VMEM((H + 2, sw, Cout), jnp.float32),   # zero-halo   (conv2 taps)
            pltpu.VMEM((H + 2, sw, Cout), jnp.float32),   # -inf halo   (max pool)
        ],
        compiler_params=pltpu.CompilerParams(
            dimension_semantics=("parallel",)),
        cost_estimate=pl.CostEstimate(flops=flops, transcendentals=0,
                                      bytes_accessed=bytes_accessed),
    )(x, wcat, bcat, w2, b2, w3, b3)

    return jnp.transpose(out, (0, 3, 1, 2))


# --------------------------------------------------------------------------
# Deterministic parameter init (shapes from the PyTorch __init__)
# --------------------------------------------------------------------------
def init_params(key, inplanes, planes):
    keys = jax.random.split(key, 4)

    def conv_w(k, cout, cin, ks):
        fan_out = cout * ks * ks
        std = math.sqrt(2.0 / fan_out)        # kaiming_normal_(mode='fan_out')
        return std * jax.random.normal(k, (cout, cin, ks, ks), jnp.float32)

    def bn(c):
        # gamma=1, beta=0, running_mean=0, running_var=1 (fresh BatchNorm2d, eval)
        return (jnp.ones((c,), jnp.float32), jnp.zeros((c,), jnp.float32),
                jnp.zeros((c,), jnp.float32), jnp.ones((c,), jnp.float32))

    return {
        "conv_w": conv_w(keys[0], planes, inplanes, 1), "bn": bn(planes),
        "conv1_w": conv_w(keys[1], planes, inplanes, 1), "bn1": bn(planes),
        "conv2_w": conv_w(keys[2], planes, planes, 3), "bn2": bn(planes),
        "conv3_w": conv_w(keys[3], planes, planes, 1), "bn3": bn(planes),
    }


# --------------------------------------------------------------------------
# Pure-JAX f32 reference (eval-mode BN) for a tolerance check
# --------------------------------------------------------------------------
def reference_forward(params, x):
    def conv(v, w, pad=0):
        return jax.lax.conv_general_dilated(
            v, w, window_strides=(1, 1), padding=[(pad, pad), (pad, pad)],
            dimension_numbers=("NCHW", "OIHW", "NCHW"))

    def bn(v, p):
        gamma, beta, mean, var = p
        s = gamma / jnp.sqrt(var + _BN_EPS)
        b = beta - mean * s
        return v * s[None, :, None, None] + b[None, :, None, None]

    lrelu = lambda v: jnp.where(v > 0, v, _SLOPE * v)
    residual = bn(conv(x, params["conv_w"]), params["bn"])
    out = lrelu(bn(conv(x, params["conv1_w"]), params["bn1"]))
    out = lrelu(bn(conv(out, params["conv2_w"], pad=1), params["bn2"]))
    out = lrelu(bn(conv(out, params["conv3_w"]), params["bn3"]) + residual)
    return jax.lax.reduce_window(out, -jnp.inf, jax.lax.max,
                                 (1, 1, 3, 3), (1, 1, 2, 2),
                                 [(0, 0), (0, 0), (1, 1), (1, 1)])


if __name__ == "__main__":
    key = jax.random.PRNGKey(0)
    pkey, xkey = jax.random.split(key)
    inplanes, planes = 64, 64
    params = init_params(pkey, inplanes, planes)
    x = jax.random.normal(xkey, (2, inplanes, 16, 16), jnp.float32)

    fwd = jax.jit(resnet12_block_forward)
    out = fwd(params, x)
    jax.block_until_ready(out)
    assert out.shape == (2, planes, 8, 8) and out.dtype == jnp.float32

    ref = reference_forward(params, x)
    err = float(jnp.max(jnp.abs(out - ref)))
    assert err < 0.35, f"max abs error vs f32 reference too large: {err}"
    print("KERNEL_OK")
</pallas_src>

<mosaic_0001>
module attributes {stable_mosaic.version = 11 : i64} {
  func.func @kernel(%arg0: i32, %arg1: memref<1x16x16x64xbf16, #tpu.memory_space<vmem>>, %arg2: memref<64x128xbf16, #tpu.memory_space<vmem>>, %arg3: memref<1x128xf32, #tpu.memory_space<vmem>>, %arg4: memref<9x64x64xbf16, #tpu.memory_space<vmem>>, %arg5: memref<1x64xf32, #tpu.memory_space<vmem>>, %arg6: memref<64x64xbf16, #tpu.memory_space<vmem>>, %arg7: memref<1x64xf32, #tpu.memory_space<vmem>>, %arg8: memref<1x8x8x64xf32, #tpu.memory_space<vmem>>, %arg9: memref<18x32x64xf32, #tpu.memory_space<vmem>>, %arg10: memref<18x32x64xf32, #tpu.memory_space<vmem>>) attributes {dimension_semantics = [#tpu.dimension_semantics<parallel>], iteration_bounds = array<i64: 2>, scalar_prefetch = 0 : i64, scratch_operands = 2 : i64, tpu.core_type = #tpu.core_type<tc>, window_params = [{transform_indices = @transform_0, window_bounds = array<i64: 1, 16, 16, 64>}, {pipeline_mode = #tpu.pipeline_mode<synchronous>, transform_indices = @transform_1, window_bounds = array<i64: 64, 128>}, {pipeline_mode = #tpu.pipeline_mode<synchronous>, transform_indices = @transform_2, window_bounds = array<i64: 1, 128>}, {pipeline_mode = #tpu.pipeline_mode<synchronous>, transform_indices = @transform_3, window_bounds = array<i64: 9, 64, 64>}, {pipeline_mode = #tpu.pipeline_mode<synchronous>, transform_indices = @transform_4, window_bounds = array<i64: 1, 64>}, {pipeline_mode = #tpu.pipeline_mode<synchronous>, transform_indices = @transform_5, window_bounds = array<i64: 64, 64>}, {pipeline_mode = #tpu.pipeline_mode<synchronous>, transform_indices = @transform_6, window_bounds = array<i64: 1, 64>}, {transform_indices = @transform_7, window_bounds = array<i64: 1, 8, 8, 64>}]} {
    %c0 = arith.constant 0 : index
    %c0_0 = arith.constant 0 : index
    %c0_1 = arith.constant 0 : index
    %c0_2 = arith.constant 0 : index
    %0 = vector.load %arg1[%c0, %c0_0, %c0_1, %c0_2] : memref<1x16x16x64xbf16, #tpu.memory_space<vmem>>, vector<1x16x16x64xbf16>
    %1 = vector.shape_cast %0 : vector<1x16x16x64xbf16> to vector<16x16x64xbf16>
    %2 = vector.shape_cast %1 : vector<16x16x64xbf16> to vector<256x64xbf16>
    %c0_3 = arith.constant 0 : index
    %c0_4 = arith.constant 0 : index
    %3 = vector.load %arg2[%c0_3, %c0_4] : memref<64x128xbf16, #tpu.memory_space<vmem>>, vector<64x128xbf16>
    %cst = arith.constant dense<0.000000e+00> : vector<256x128xf32>
    %4 = tpu.matmul %2, %3, %cst {dimension_numbers = #tpu.dot_dimension_numbers<[1], [0], [0], [1], [0, 0, 1, 1], [], []>} : vector<256x64xbf16>, vector<64x128xbf16>, vector<256x128xf32> -> vector<256x128xf32>
    %c0_5 = arith.constant 0 : index
    %c0_6 = arith.constant 0 : index
    %5 = vector.load %arg3[%c0_5, %c0_6] : memref<1x128xf32, #tpu.memory_space<vmem>>, vector<1x128xf32>
    %6 = vector.broadcast %5 : vector<1x128xf32> to vector<256x128xf32>
    %7 = arith.addf %4, %6 : vector<256x128xf32>
    %8 = vector.extract_strided_slice %7 {offsets = [0, 0], sizes = [256, 64], strides = [1, 1]} : vector<256x128xf32> to vector<256x64xf32>
    %cst_7 = arith.constant 0.000000e+00 : f32
    %9 = vector.broadcast %cst_7 : f32 to vector<256x64xf32>
    %10 = arith.cmpf ogt, %8, %9 : vector<256x64xf32>
    %cst_8 = arith.constant 2.000000e-01 : f32
    %11 = vector.broadcast %cst_8 : f32 to vector<256x64xf32>
    %12 = arith.mulf %11, %8 : vector<256x64xf32>
    %13 = arith.select %10, %8, %12 : vector<256x64xi1>, vector<256x64xf32>
    %14 = vector.extract_strided_slice %7 {offsets = [0, 64], sizes = [256, 64], strides = [1, 1]} : vector<256x128xf32> to vector<256x64xf32>
    %cst_9 = arith.constant 0.000000e+00 : f32
    %15 = vector.broadcast %cst_9 : f32 to vector<1x32x64xf32>
    %c0_10 = arith.constant 0 : index
    %c0_11 = arith.constant 0 : index
    %c0_12 = arith.constant 0 : index
    %16 = vector.load %arg9[%c0_10, %c0_11, %c0_12] : memref<18x32x64xf32, #tpu.memory_space<vmem>>, vector<1x32x64xf32>
    tpu.vector_store %arg9[%c0_10, %c0_11, %c0_12], %15 {strides = array<i32>} : memref<18x32x64xf32, #tpu.memory_space<vmem>>, vector<1x32x64xf32>,
    %c17 = arith.constant 17 : index
    %c0_13 = arith.constant 0 : index
    %c0_14 = arith.constant 0 : index
    %17 = vector.load %arg9[%c17, %c0_13, %c0_14] : memref<18x32x64xf32, #tpu.memory_space<vmem>>, vector<1x32x64xf32>
    tpu.vector_store %arg9[%c17, %c0_13, %c0_14], %15 {strides = array<i32>} : memref<18x32x64xf32, #tpu.memory_space<vmem>>, vector<1x32x64xf32>,
    %cst_15 = arith.constant 0.000000e+00 : f32
    %18 = vector.broadcast %cst_15 : f32 to vector<16x8x64xf32>
    %c1 = arith.constant 1 : index
    %c0_16 = arith.constant 0 : index
    %c0_17 = arith.constant 0 : index
    %19 = vector.load %arg9[%c1, %c0_16, %c0_17] : memref<18x32x64xf32, #tpu.memory_space<vmem>>, vector<16x8x64xf32>
    tpu.vector_store %arg9[%c1, %c0_16, %c0_17], %18 {strides = array<i32>} : memref<18x32x64xf32, #tpu.memory_space<vmem>>, vector<16x8x64xf32>,
    %cst_18 = arith.constant 0.000000e+00 : f32
    %20 = vector.broadcast %cst_18 : f32 to vector<16x8x64xf32>
    %c1_19 = arith.constant 1 : index
    %c24 = arith.constant 24 : index
    %c0_20 = arith.constant 0 : index
    %21 = vector.load %arg9[%c1_19, %c24, %c0_20] : memref<18x32x64xf32, #tpu.memory_space<vmem>>, vector<16x8x64xf32>
    tpu.vector_store %arg9[%c1_19, %c24, %c0_20], %20 {strides = array<i32>} : memref<18x32x64xf32, #tpu.memory_space<vmem>>, vector<16x8x64xf32>,
    %22 = vector.shape_cast %13 : vector<256x64xf32> to vector<16x16x64xf32>
    %c1_21 = arith.constant 1 : index
    %c8 = arith.constant 8 : index
    %c0_22 = arith.constant 0 : index
    %23 = vector.load %arg9[%c1_21, %c8, %c0_22] : memref<18x32x64xf32, #tpu.memory_space<vmem>>, vector<16x16x64xf32>
    tpu.vector_store %arg9[%c1_21, %c8, %c0_22], %22 {strides = array<i32>} : memref<18x32x64xf32, #tpu.memory_space<vmem>>, vector<16x16x64xf32>,
    %cst_23 = arith.constant 0.000000e+00 : f32
    %24 = vector.broadcast %cst_23 : f32 to vector<256x64xf32>
    %c0_24 = arith.constant 0 : index
    %c7 = arith.constant 7 : index
    %c0_25 = arith.constant 0 : index
    %25 = vector.load %arg9[%c0_24, %c7, %c0_25] : memref<18x32x64xf32, #tpu.memory_space<vmem>>, vector<18x16x64xf32>
    %26 = arith.truncf %25 : vector<18x16x64xf32> to vector<18x16x64xbf16>
    %27 = vector.extract_strided_slice %26 {offsets = [0, 0, 0], sizes = [16, 16, 64], strides = [1, 1, 1]} : vector<18x16x64xbf16> to vector<16x16x64xbf16>
    %28 = vector.shape_cast %27 : vector<16x16x64xbf16> to vector<256x64xbf16>
    %c0_26 = arith.constant 0 : index
    %c0_27 = arith.constant 0 : index
    %c0_28 = arith.constant 0 : index
    %29 = vector.load %arg4[%c0_26, %c0_27, %c0_28] : memref<9x64x64xbf16, #tpu.memory_space<vmem>>, vector<1x64x64xbf16>
    %30 = vector.shape_cast %29 : vector<1x64x64xbf16> to vector<64x64xbf16>
    %cst_29 = arith.constant dense<0.000000e+00> : vector<256x64xf32>
    %31 = tpu.matmul %28, %30, %cst_29 {dimension_numbers = #tpu.dot_dimension_numbers<[1], [0], [0], [1], [0, 0, 1, 1], [], []>} : vector<256x64xbf16>, vector<64x64xbf16>, vector<256x64xf32> -> vector<256x64xf32>
    %32 = arith.addf %24, %31 : vector<256x64xf32>
    %33 = vector.extract_strided_slice %26 {offsets = [1, 0, 0], sizes = [16, 16, 64], strides = [1, 1, 1]} : vector<18x16x64xbf16> to vector<16x16x64xbf16>
    %34 = vector.shape_cast %33 : vector<16x16x64xbf16> to vector<256x64xbf16>
    %c3 = arith.constant 3 : index
    %c0_30 = arith.constant 0 : index
    %c0_31 = arith.constant 0 : index
    %35 = vector.load %arg4[%c3, %c0_30, %c0_31] : memref<9x64x64xbf16, #tpu.memory_space<vmem>>, vector<1x64x64xbf16>
    %36 = vector.shape_cast %35 : vector<1x64x64xbf16> to vector<64x64xbf16>
    %cst_32 = arith.constant dense<0.000000e+00> : vector<256x64xf32>
    %37 = tpu.matmul %34, %36, %cst_32 {dimension_numbers = #tpu.dot_dimension_numbers<[1], [0], [0], [1], [0, 0, 1, 1], [], []>} : vector<256x64xbf16>, vector<64x64xbf16>, vector<256x64xf32> -> vector<256x64xf32>
    %38 = arith.addf %32, %37 : vector<256x64xf32>
    %39 = vector.extract_strided_slice %26 {offsets = [2, 0, 0], sizes = [16, 16, 64], strides = [1, 1, 1]} : vector<18x16x64xbf16> to vector<16x16x64xbf16>
    %40 = vector.shape_cast %39 : vector<16x16x64xbf16> to vector<256x64xbf16>
    %c6 = arith.constant 6 : index
    %c0_33 = arith.constant 0 : index
    %c0_34 = arith.constant 0 : index
    %41 = vector.load %arg4[%c6, %c0_33, %c0_34] : memref<9x64x64xbf16, #tpu.memory_space<vmem>>, vector<1x64x64xbf16>
    %42 = vector.shape_cast %41 : vector<1x64x64xbf16> to vector<64x64xbf16>
    %cst_35 = arith.constant dense<0.000000e+00> : vector<256x64xf32>
    %43 = tpu.matmul %40, %42, %cst_35 {dimension_numbers = #tpu.dot_dimension_numbers<[1], [0], [0], [1], [0, 0, 1, 1], [], []>} : vector<256x64xbf16>, vector<64x64xbf16>, vector<256x64xf32> -> vector<256x64xf32>
    %44 = arith.addf %38, %43 : vector<256x64xf32>
    %c0_36 = arith.constant 0 : index
    %c8_37 = arith.constant 8 : index
    %c0_38 = arith.constant 0 : index
    %45 = vector.load %arg9[%c0_36, %c8_37, %c0_38] : memref<18x32x64xf32, #tpu.memory_space<vmem>>, vector<18x16x64xf32>
    %46 = arith.truncf %45 : vector<18x16x64xf32> to vector<18x16x64xbf16>
    %47 = vector.extract_strided_slice %46 {offsets = [0, 0, 0], sizes = [16, 16, 64], strides = [1, 1, 1]} : vector<18x16x64xbf16> to vector<16x16x64xbf16>
    %48 = vector.shape_cast %47 : vector<16x16x64xbf16> to vector<256x64xbf16>
    %c1_39 = arith.constant 1 : index
    %c0_40 = arith.constant 0 : index
    %c0_41 = arith.constant 0 : index
    %49 = vector.load %arg4[%c1_39, %c0_40, %c0_41] : memref<9x64x64xbf16, #tpu.memory_space<vmem>>, vector<1x64x64xbf16>
    %50 = vector.shape_cast %49 : vector<1x64x64xbf16> to vector<64x64xbf16>
    %cst_42 = arith.constant dense<0.000000e+00> : vector<256x64xf32>
    %51 = tpu.matmul %48, %50, %cst_42 {dimension_numbers = #tpu.dot_dimension_numbers<[1], [0], [0], [1], [0, 0, 1, 1], [], []>} : vector<256x64xbf16>, vector<64x64xbf16>, vector<256x64xf32> -> vector<256x64xf32>
    %52 = arith.addf %44, %51 : vector<256x64xf32>
    %53 = vector.extract_strided_slice %46 {offsets = [1, 0, 0], sizes = [16, 16, 64], strides = [1, 1, 1]} : vector<18x16x64xbf16> to vector<16x16x64xbf16>
    %54 = vector.shape_cast %53 : vector<16x16x64xbf16> to vector<256x64xbf16>
    %c4 = arith.constant 4 : index
    %c0_43 = arith.constant 0 : index
    %c0_44 = arith.constant 0 : index
    %55 = vector.load %arg4[%c4, %c0_43, %c0_44] : memref<9x64x64xbf16, #tpu.memory_space<vmem>>, vector<1x64x64xbf16>
    %56 = vector.shape_cast %55 : vector<1x64x64xbf16> to vector<64x64xbf16>
    %cst_45 = arith.constant dense<0.000000e+00> : vector<256x64xf32>
    %57 = tpu.matmul %54, %56, %cst_45 {dimension_numbers = #tpu.dot_dimension_numbers<[1], [0], [0], [1], [0, 0, 1, 1], [], []>} : vector<256x64xbf16>, vector<64x64xbf16>, vector<256x64xf32> -> vector<256x64xf32>
    %58 = arith.addf %52, %57 : vector<256x64xf32>
    %59 = vector.extract_strided_slice %46 {offsets = [2, 0, 0], sizes = [16, 16, 64], strides = [1, 1, 1]} : vector<18x16x64xbf16> to vector<16x16x64xbf16>
    %60 = vector.shape_cast %59 : vector<16x16x64xbf16> to vector<256x64xbf16>
    %c7_46 = arith.constant 7 : index
    %c0_47 = arith.constant 0 : index
    %c0_48 = arith.constant 0 : index
    %61 = vector.load %arg4[%c7_46, %c0_47, %c0_48] : memref<9x64x64xbf16, #tpu.memory_space<vmem>>, vector<1x64x64xbf16>
    %62 = vector.shape_cast %61 : vector<1x64x64xbf16> to vector<64x64xbf16>
    %cst_49 = arith.constant dense<0.000000e+00> : vector<256x64xf32>
    %63 = tpu.matmul %60, %62, %cst_49 {dimension_numbers = #tpu.dot_dimension_numbers<[1], [0], [0], [1], [0, 0, 1, 1], [], []>} : vector<256x64xbf16>, vector<64x64xbf16>, vector<256x64xf32> -> vector<256x64xf32>
    %64 = arith.addf %58, %63 : vector<256x64xf32>
    %c0_50 = arith.constant 0 : index
    %c9 = arith.constant 9 : index
    %c0_51 = arith.constant 0 : index
    %65 = vector.load %arg9[%c0_50, %c9, %c0_51] : memref<18x32x64xf32, #tpu.memory_space<vmem>>, vector<18x16x64xf32>
    %66 = arith.truncf %65 : vector<18x16x64xf32> to vector<18x16x64xbf16>
    %67 = vector.extract_strided_slice %66 {offsets = [0, 0, 0], sizes = [16, 16, 64], strides = [1, 1, 1]} : vector<18x16x64xbf16> to vector<16x16x64xbf16>
    %68 = vector.shape_cast %67 : vector<16x16x64xbf16> to vector<256x64xbf16>
    %c2 = arith.constant 2 : index
    %c0_52 = arith.constant 0 : index
    %c0_53 = arith.constant 0 : index
    %69 = vector.load %arg4[%c2, %c0_52, %c0_53] : memref<9x64x64xbf16, #tpu.memory_space<vmem>>, vector<1x64x64xbf16>
    %70 = vector.shape_cast %69 : vector<1x64x64xbf16> to vector<64x64xbf16>
    %cst_54 = arith.constant dense<0.000000e+00> : vector<256x64xf32>
    %71 = tpu.matmul %68, %70, %cst_54 {dimension_numbers = #tpu.dot_dimension_numbers<[1], [0], [0], [1], [0, 0, 1, 1], [], []>} : vector<256x64xbf16>, vector<64x64xbf16>, vector<256x64xf32> -> vector<256x64xf32>
    %72 = arith.addf %64, %71 : vector<256x64xf32>
    %73 = vector.extract_strided_slice %66 {offsets = [1, 0, 0], sizes = [16, 16, 64], strides = [1, 1, 1]} : vector<18x16x64xbf16> to vector<16x16x64xbf16>
    %74 = vector.shape_cast %73 : vector<16x16x64xbf16> to vector<256x64xbf16>
    %c5 = arith.constant 5 : index
    %c0_55 = arith.constant 0 : index
    %c0_56 = arith.constant 0 : index
    %75 = vector.load %arg4[%c5, %c0_55, %c0_56] : memref<9x64x64xbf16, #tpu.memory_space<vmem>>, vector<1x64x64xbf16>
    %76 = vector.shape_cast %75 : vector<1x64x64xbf16> to vector<64x64xbf16>
    %cst_57 = arith.constant dense<0.000000e+00> : vector<256x64xf32>
    %77 = tpu.matmul %74, %76, %cst_57 {dimension_numbers = #tpu.dot_dimension_numbers<[1], [0], [0], [1], [0, 0, 1, 1], [], []>} : vector<256x64xbf16>, vector<64x64xbf16>, vector<256x64xf32> -> vector<256x64xf32>
    %78 = arith.addf %72, %77 : vector<256x64xf32>
    %79 = vector.extract_strided_slice %66 {offsets = [2, 0, 0], sizes = [16, 16, 64], strides = [1, 1, 1]} : vector<18x16x64xbf16> to vector<16x16x64xbf16>
    %80 = vector.shape_cast %79 : vector<16x16x64xbf16> to vector<256x64xbf16>
    %c8_58 = arith.constant 8 : index
    %c0_59 = arith.constant 0 : index
    %c0_60 = arith.constant 0 : index
    %81 = vector.load %arg4[%c8_58, %c0_59, %c0_60] : memref<9x64x64xbf16, #tpu.memory_space<vmem>>, vector<1x64x64xbf16>
    %82 = vector.shape_cast %81 : vector<1x64x64xbf16> to vector<64x64xbf16>
    %cst_61 = arith.constant dense<0.000000e+00> : vector<256x64xf32>
    %83 = tpu.matmul %80, %82, %cst_61 {dimension_numbers = #tpu.dot_dimension_numbers<[1], [0], [0], [1], [0, 0, 1, 1], [], []>} : vector<256x64xbf16>, vector<64x64xbf16>, vector<256x64xf32> -> vector<256x64xf32>
    %84 = arith.addf %78, %83 : vector<256x64xf32>
    %c0_62 = arith.constant 0 : index
    %c0_63 = arith.constant 0 : index
    %85 = vector.load %arg5[%c0_62, %c0_63] : memref<1x64xf32, #tpu.memory_space<vmem>>, vector<1x64xf32>
    %86 = vector.broadcast %85 : vector<1x64xf32> to vector<256x64xf32>
    %87 = arith.addf %84, %86 : vector<256x64xf32>
    %cst_64 = arith.constant 0.000000e+00 : f32
    %88 = vector.broadcast %cst_64 : f32 to vector<256x64xf32>
    %89 = arith.cmpf ogt, %87, %88 : vector<256x64xf32>
    %cst_65 = arith.constant 2.000000e-01 : f32
    %90 = vector.broadcast %cst_65 : f32 to vector<256x64xf32>
    %91 = arith.mulf %90, %87 : vector<256x64xf32>
    %92 = arith.select %89, %87, %91 : vector<256x64xi1>, vector<256x64xf32>
    %93 = arith.truncf %92 : vector<256x64xf32> to vector<256x64xbf16>
    %c0_66 = arith.constant 0 : index
    %c0_67 = arith.constant 0 : index
    %94 = vector.load %arg6[%c0_66, %c0_67] : memref<64x64xbf16, #tpu.memory_space<vmem>>, vector<64x64xbf16>
    %cst_68 = arith.constant dense<0.000000e+00> : vector<256x64xf32>
    %95 = tpu.matmul %93, %94, %cst_68 {dimension_numbers = #tpu.dot_dimension_numbers<[1], [0], [0], [1], [0, 0, 1, 1], [], []>} : vector<256x64xbf16>, vector<64x64xbf16>, vector<256x64xf32> -> vector<256x64xf32>
    %c0_69 = arith.constant 0 : index
    %c0_70 = arith.constant 0 : index
    %96 = vector.load %arg7[%c0_69, %c0_70] : memref<1x64xf32, #tpu.memory_space<vmem>>, vector<1x64xf32>
    %97 = vector.broadcast %96 : vector<1x64xf32> to vector<256x64xf32>
    %98 = arith.addf %95, %97 : vector<256x64xf32>
    %99 = arith.addf %98, %14 : vector<256x64xf32>
    %cst_71 = arith.constant 0.000000e+00 : f32
    %100 = vector.broadcast %cst_71 : f32 to vector<256x64xf32>
    %101 = arith.cmpf ogt, %99, %100 : vector<256x64xf32>
    %cst_72 = arith.constant 2.000000e-01 : f32
    %102 = vector.broadcast %cst_72 : f32 to vector<256x64xf32>
    %103 = arith.mulf %102, %99 : vector<256x64xf32>
    %104 = arith.select %101, %99, %103 : vector<256x64xi1>, vector<256x64xf32>
    %cst_73 = arith.constant 0xFF800000 : f32
    %105 = vector.broadcast %cst_73 : f32 to vector<1x32x64xf32>
    %c0_74 = arith.constant 0 : index
    %c0_75 = arith.constant 0 : index
    %c0_76 = arith.constant 0 : index
    %106 = vector.load %arg10[%c0_74, %c0_75, %c0_76] : memref<18x32x64xf32, #tpu.memory_space<vmem>>, vector<1x32x64xf32>
    tpu.vector_store %arg10[%c0_74, %c0_75, %c0_76], %105 {strides = array<i32>} : memref<18x32x64xf32, #tpu.memory_space<vmem>>, vector<1x32x64xf32>,
    %c17_77 = arith.constant 17 : index
    %c0_78 = arith.constant 0 : index
    %c0_79 = arith.constant 0 : index
    %107 = vector.load %arg10[%c17_77, %c0_78, %c0_79] : memref<18x32x64xf32, #tpu.memory_space<vmem>>, vector<1x32x64xf32>
    tpu.vector_store %arg10[%c17_77, %c0_78, %c0_79], %105 {strides = array<i32>} : memref<18x32x64xf32, #tpu.memory_space<vmem>>, vector<1x32x64xf32>,
    %cst_80 = arith.constant 0xFF800000 : f32
    %108 = vector.broadcast %cst_80 : f32 to vector<16x8x64xf32>
    %c1_81 = arith.constant 1 : index
    %c0_82 = arith.constant 0 : index
    %c0_83 = arith.constant 0 : index
    %109 = vector.load %arg10[%c1_81, %c0_82, %c0_83] : memref<18x32x64xf32, #tpu.memory_space<vmem>>, vector<16x8x64xf32>
    tpu.vector_store %arg10[%c1_81, %c0_82, %c0_83], %108 {strides = array<i32>} : memref<18x32x64xf32, #tpu.memory_space<vmem>>, vector<16x8x64xf32>,
    %cst_84 = arith.constant 0xFF800000 : f32
    %110 = vector.broadcast %cst_84 : f32 to vector<16x8x64xf32>
    %c1_85 = arith.constant 1 : index
    %c24_86 = arith.constant 24 : index
    %c0_87 = arith.constant 0 : index
    %111 = vector.load %arg10[%c1_85, %c24_86, %c0_87] : memref<18x32x64xf32, #tpu.memory_space<vmem>>, vector<16x8x64xf32>
    tpu.vector_store %arg10[%c1_85, %c24_86, %c0_87], %110 {strides = array<i32>} : memref<18x32x64xf32, #tpu.memory_space<vmem>>, vector<16x8x64xf32>,
    %112 = vector.shape_cast %104 : vector<256x64xf32> to vector<16x16x64xf32>
    %c1_88 = arith.constant 1 : index
    %c8_89 = arith.constant 8 : index
    %c0_90 = arith.constant 0 : index
    %113 = vector.load %arg10[%c1_88, %c8_89, %c0_90] : memref<18x32x64xf32, #tpu.memory_space<vmem>>, vector<16x16x64xf32>
    tpu.vector_store %arg10[%c1_88, %c8_89, %c0_90], %112 {strides = array<i32>} : memref<18x32x64xf32, #tpu.memory_space<vmem>>, vector<16x16x64xf32>,
    %c0_91 = arith.constant 0 : index
    %c7_92 = arith.constant 7 : index
    %c0_93 = arith.constant 0 : index
    %114 = tpu.strided_load %arg10[%c0_91, %c7_92, %c0_93] {strides = array<i32: 1, 2, 1>} : memref<18x32x64xf32, #tpu.memory_space<vmem>>, vector<18x8x64xf32>
    %c0_94 = arith.constant 0 : index
    %c8_95 = arith.constant 8 : index
    %c0_96 = arith.constant 0 : index
    %115 = tpu.strided_load %arg10[%c0_94, %c8_95, %c0_96] {strides = array<i32: 1, 2, 1>} : memref<18x32x64xf32, #tpu.memory_space<vmem>>, vector<18x8x64xf32>
    %116 = arith.maximumf %114, %115 : vector<18x8x64xf32>
    %c0_97 = arith.constant 0 : index
    %c9_98 = arith.constant 9 : index
    %c0_99 = arith.constant 0 : index
    %117 = tpu.strided_load %arg10[%c0_97, %c9_98, %c0_99] {strides = array<i32: 1, 2, 1>} : memref<18x32x64xf32, #tpu.memory_space<vmem>>, vector<18x8x64xf32>
    %118 = arith.maximumf %116, %117 : vector<18x8x64xf32>
    %119 = vector.extract_strided_slice %118 {offsets = [0, 0, 0], sizes = [1, 8, 64], strides = [1, 1, 1]} : vector<18x8x64xf32> to vector<1x8x64xf32>
    %120 = vector.shape_cast %119 : vector<1x8x64xf32> to vector<8x64xf32>
    %121 = vector.extract_strided_slice %118 {offsets = [1, 0, 0], sizes = [1, 8, 64], strides = [1, 1, 1]} : vector<18x8x64xf32> to vector<1x8x64xf32>
    %122 = vector.shape_cast %121 : vector<1x8x64xf32> to vector<8x64xf32>
    %123 = arith.maximumf %120, %122 : vector<8x64xf32>
    %124 = vector.extract_strided_slice %118 {offsets = [2, 0, 0], sizes = [1, 8, 64], strides = [1, 1, 1]} : vector<18x8x64xf32> to vector<1x8x64xf32>
    %125 = vector.shape_cast %124 : vector<1x8x64xf32> to vector<8x64xf32>
    %126 = arith.maximumf %123, %125 : vector<8x64xf32>
    %c0_100 = arith.constant 0 : index
    %c0_101 = arith.constant 0 : index
    %c0_102 = arith.constant 0 : index
    %c0_103 = arith.constant 0 : index
    %127 = vector.load %arg8[%c0_100, %c0_101, %c0_102, %c0_103] : memref<1x8x8x64xf32, #tpu.memory_space<vmem>>, vector<1x1x8x64xf32>
    %128 = vector.shape_cast %127 : vector<1x1x8x64xf32> to vector<8x64xf32>
    %129 = vector.shape_cast %126 : vector<8x64xf32> to vector<1x1x8x64xf32>
    tpu.vector_store %arg8[%c0_100, %c0_101, %c0_102, %c0_103], %129 {strides = array<i32>} : memref<1x8x8x64xf32, #tpu.memory_space<vmem>>, vector<1x1x8x64xf32>,
    %130 = vector.extract_strided_slice %118 {offsets = [2, 0, 0], sizes = [1, 8, 64], strides = [1, 1, 1]} : vector<18x8x64xf32> to vector<1x8x64xf32>
    %131 = vector.shape_cast %130 : vector<1x8x64xf32> to vector<8x64xf32>
    %132 = vector.extract_strided_slice %118 {offsets = [3, 0, 0], sizes = [1, 8, 64], strides = [1, 1, 1]} : vector<18x8x64xf32> to vector<1x8x64xf32>
    %133 = vector.shape_cast %132 : vector<1x8x64xf32> to vector<8x64xf32>
    %134 = arith.maximumf %131, %133 : vector<8x64xf32>
    %135 = vector.extract_strided_slice %118 {offsets = [4, 0, 0], sizes = [1, 8, 64], strides = [1, 1, 1]} : vector<18x8x64xf32> to vector<1x8x64xf32>
    %136 = vector.shape_cast %135 : vector<1x8x64xf32> to vector<8x64xf32>
    %137 = arith.maximumf %134, %136 : vector<8x64xf32>
    %c0_104 = arith.constant 0 : index
    %c1_105 = arith.constant 1 : index
    %c0_106 = arith.constant 0 : index
    %c0_107 = arith.constant 0 : index
    %138 = vector.load %arg8[%c0_104, %c1_105, %c0_106, %c0_107] : memref<1x8x8x64xf32, #tpu.memory_space<vmem>>, vector<1x1x8x64xf32>
    %139 = vector.shape_cast %138 : vector<1x1x8x64xf32> to vector<8x64xf32>
    %140 = vector.shape_cast %137 : vector<8x64xf32> to vector<1x1x8x64xf32>
    tpu.vector_store %arg8[%c0_104, %c1_105, %c0_106, %c0_107], %140 {strides = array<i32>} : memref<1x8x8x64xf32, #tpu.memory_space<vmem>>, vector<1x1x8x64xf32>,
    %141 = vector.extract_strided_slice %118 {offsets = [4, 0, 0], sizes = [1, 8, 64], strides = [1, 1, 1]} : vector<18x8x64xf32> to vector<1x8x64xf32>
    %142 = vector.shape_cast %141 : vector<1x8x64xf32> to vector<8x64xf32>
    %143 = vector.extract_strided_slice %118 {offsets = [5, 0, 0], sizes = [1, 8, 64], strides = [1, 1, 1]} : vector<18x8x64xf32> to vector<1x8x64xf32>
    %144 = vector.shape_cast %143 : vector<1x8x64xf32> to vector<8x64xf32>
    %145 = arith.maximumf %142, %144 : vector<8x64xf32>
    %146 = vector.extract_strided_slice %118 {offsets = [6, 0, 0], sizes = [1, 8, 64], strides = [1, 1, 1]} : vector<18x8x64xf32> to vector<1x8x64xf32>
    %147 = vector.shape_cast %146 : vector<1x8x64xf32> to vector<8x64xf32>
    %148 = arith.maximumf %145, %147 : vector<8x64xf32>
    %c0_108 = arith.constant 0 : index
    %c2_109 = arith.constant 2 : index
    %c0_110 = arith.constant 0 : index
    %c0_111 = arith.constant 0 : index
    %149 = vector.load %arg8[%c0_108, %c2_109, %c0_110, %c0_111] : memref<1x8x8x64xf32, #tpu.memory_space<vmem>>, vector<1x1x8x64xf32>
    %150 = vector.shape_cast %149 : vector<1x1x8x64xf32> to vector<8x64xf32>
    %151 = vector.shape_cast %148 : vector<8x64xf32> to vector<1x1x8x64xf32>
    tpu.vector_store %arg8[%c0_108, %c2_109, %c0_110, %c0_111], %151 {strides = array<i32>} : memref<1x8x8x64xf32, #tpu.memory_space<vmem>>, vector<1x1x8x64xf32>,
    %152 = vector.extract_strided_slice %118 {offsets = [6, 0, 0], sizes = [1, 8, 64], strides = [1, 1, 1]} : vector<18x8x64xf32> to vector<1x8x64xf32>
    %153 = vector.shape_cast %152 : vector<1x8x64xf32> to vector<8x64xf32>
    %154 = vector.extract_strided_slice %118 {offsets = [7, 0, 0], sizes = [1, 8, 64], strides = [1, 1, 1]} : vector<18x8x64xf32> to vector<1x8x64xf32>
    %155 = vector.shape_cast %154 : vector<1x8x64xf32> to vector<8x64xf32>
    %156 = arith.maximumf %153, %155 : vector<8x64xf32>
    %157 = vector.extract_strided_slice %118 {offsets = [8, 0, 0], sizes = [1, 8, 64], strides = [1, 1, 1]} : vector<18x8x64xf32> to vector<1x8x64xf32>
    %158 = vector.shape_cast %157 : vector<1x8x64xf32> to vector<8x64xf32>
    %159 = arith.maximumf %156, %158 : vector<8x64xf32>
    %c0_112 = arith.constant 0 : index
    %c3_113 = arith.constant 3 : index
    %c0_114 = arith.constant 0 : index
    %c0_115 = arith.constant 0 : index
    %160 = vector.load %arg8[%c0_112, %c3_113, %c0_114, %c0_115] : memref<1x8x8x64xf32, #tpu.memory_space<vmem>>, vector<1x1x8x64xf32>
    %161 = vector.shape_cast %160 : vector<1x1x8x64xf32> to vector<8x64xf32>
    %162 = vector.shape_cast %159 : vector<8x64xf32> to vector<1x1x8x64xf32>
    tpu.vector_store %arg8[%c0_112, %c3_113, %c0_114, %c0_115], %162 {strides = array<i32>} : memref<1x8x8x64xf32, #tpu.memory_space<vmem>>, vector<1x1x8x64xf32>,
    %163 = vector.extract_strided_slice %118 {offsets = [8, 0, 0], sizes = [1, 8, 64], strides = [1, 1, 1]} : vector<18x8x64xf32> to vector<1x8x64xf32>
    %164 = vector.shape_cast %163 : vector<1x8x64xf32> to vector<8x64xf32>
    %165 = vector.extract_strided_slice %118 {offsets = [9, 0, 0], sizes = [1, 8, 64], strides = [1, 1, 1]} : vector<18x8x64xf32> to vector<1x8x64xf32>
    %166 = vector.shape_cast %165 : vector<1x8x64xf32> to vector<8x64xf32>
    %167 = arith.maximumf %164, %166 : vector<8x64xf32>
    %168 = vector.extract_strided_slice %118 {offsets = [10, 0, 0], sizes = [1, 8, 64], strides = [1, 1, 1]} : vector<18x8x64xf32> to vector<1x8x64xf32>
    %169 = vector.shape_cast %168 : vector<1x8x64xf32> to vector<8x64xf32>
    %170 = arith.maximumf %167, %169 : vector<8x64xf32>
    %c0_116 = arith.constant 0 : index
    %c4_117 = arith.constant 4 : index
    %c0_118 = arith.constant 0 : index
    %c0_119 = arith.constant 0 : index
    %171 = vector.load %arg8[%c0_116, %c4_117, %c0_118, %c0_119] : memref<1x8x8x64xf32, #tpu.memory_space<vmem>>, vector<1x1x8x64xf32>
    %172 = vector.shape_cast %171 : vector<1x1x8x64xf32> to vector<8x64xf32>
    %173 = vector.shape_cast %170 : vector<8x64xf32> to vector<1x1x8x64xf32>
    tpu.vector_store %arg8[%c0_116, %c4_117, %c0_118, %c0_119], %173 {strides = array<i32>} : memref<1x8x8x64xf32, #tpu.memory_space<vmem>>, vector<1x1x8x64xf32>,
    %174 = vector.extract_strided_slice %118 {offsets = [10, 0, 0], sizes = [1, 8, 64], strides = [1, 1, 1]} : vector<18x8x64xf32> to vector<1x8x64xf32>
    %175 = vector.shape_cast %174 : vector<1x8x64xf32> to vector<8x64xf32>
    %176 = vector.extract_strided_slice %118 {offsets = [11, 0, 0], sizes = [1, 8, 64], strides = [1, 1, 1]} : vector<18x8x64xf32> to vector<1x8x64xf32>
    %177 = vector.shape_cast %176 : vector<1x8x64xf32> to vector<8x64xf32>
    %178 = arith.maximumf %175, %177 : vector<8x64xf32>
    %179 = vector.extract_strided_slice %118 {offsets = [12, 0, 0], sizes = [1, 8, 64], strides = [1, 1, 1]} : vector<18x8x64xf32> to vector<1x8x64xf32>
    %180 = vector.shape_cast %179 : vector<1x8x64xf32> to vector<8x64xf32>
    %181 = arith.maximumf %178, %180 : vector<8x64xf32>
    %c0_120 = arith.constant 0 : index
    %c5_121 = arith.constant 5 : index
    %c0_122 = arith.constant 0 : index
    %c0_123 = arith.constant 0 : index
    %182 = vector.load %arg8[%c0_120, %c5_121, %c0_122, %c0_123] : memref<1x8x8x64xf32, #tpu.memory_space<vmem>>, vector<1x1x8x64xf32>
    %183 = vector.shape_cast %182 : vector<1x1x8x64xf32> to vector<8x64xf32>
    %184 = vector.shape_cast %181 : vector<8x64xf32> to vector<1x1x8x64xf32>
    tpu.vector_store %arg8[%c0_120, %c5_121, %c0_122, %c0_123], %184 {strides = array<i32>} : memref<1x8x8x64xf32, #tpu.memory_space<vmem>>, vector<1x1x8x64xf32>,
    %185 = vector.extract_strided_slice %118 {offsets = [12, 0, 0], sizes = [1, 8, 64], strides = [1, 1, 1]} : vector<18x8x64xf32> to vector<1x8x64xf32>
    %186 = vector.shape_cast %185 : vector<1x8x64xf32> to vector<8x64xf32>
    %187 = vector.extract_strided_slice %118 {offsets = [13, 0, 0], sizes = [1, 8, 64], strides = [1, 1, 1]} : vector<18x8x64xf32> to vector<1x8x64xf32>
    %188 = vector.shape_cast %187 : vector<1x8x64xf32> to vector<8x64xf32>
    %189 = arith.maximumf %186, %188 : vector<8x64xf32>
    %190 = vector.extract_strided_slice %118 {offsets = [14, 0, 0], sizes = [1, 8, 64], strides = [1, 1, 1]} : vector<18x8x64xf32> to vector<1x8x64xf32>
    %191 = vector.shape_cast %190 : vector<1x8x64xf32> to vector<8x64xf32>
    %192 = arith.maximumf %189, %191 : vector<8x64xf32>
    %c0_124 = arith.constant 0 : index
    %c6_125 = arith.constant 6 : index
    %c0_126 = arith.constant 0 : index
    %c0_127 = arith.constant 0 : index
    %193 = vector.load %arg8[%c0_124, %c6_125, %c0_126, %c0_127] : memref<1x8x8x64xf32, #tpu.memory_space<vmem>>, vector<1x1x8x64xf32>
    %194 = vector.shape_cast %193 : vector<1x1x8x64xf32> to vector<8x64xf32>
    %195 = vector.shape_cast %192 : vector<8x64xf32> to vector<1x1x8x64xf32>
    tpu.vector_store %arg8[%c0_124, %c6_125, %c0_126, %c0_127], %195 {strides = array<i32>} : memref<1x8x8x64xf32, #tpu.memory_space<vmem>>, vector<1x1x8x64xf32>,
    %196 = vector.extract_strided_slice %118 {offsets = [14, 0, 0], sizes = [1, 8, 64], strides = [1, 1, 1]} : vector<18x8x64xf32> to vector<1x8x64xf32>
    %197 = vector.shape_cast %196 : vector<1x8x64xf32> to vector<8x64xf32>
    %198 = vector.extract_strided_slice %118 {offsets = [15, 0, 0], sizes = [1, 8, 64], strides = [1, 1, 1]} : vector<18x8x64xf32> to vector<1x8x64xf32>
    %199 = vector.shape_cast %198 : vector<1x8x64xf32> to vector<8x64xf32>
    %200 = arith.maximumf %197, %199 : vector<8x64xf32>
    %201 = vector.extract_strided_slice %118 {offsets = [16, 0, 0], sizes = [1, 8, 64], strides = [1, 1, 1]} : vector<18x8x64xf32> to vector<1x8x64xf32>
    %202 = vector.shape_cast %201 : vector<1x8x64xf32> to vector<8x64xf32>
    %203 = arith.maximumf %200, %202 : vector<8x64xf32>
    %c0_128 = arith.constant 0 : index
    %c7_129 = arith.constant 7 : index
    %c0_130 = arith.constant 0 : index
    %c0_131 = arith.constant 0 : index
    %204 = vector.load %arg8[%c0_128, %c7_129, %c0_130, %c0_131] : memref<1x8x8x64xf32, #tpu.memory_space<vmem>>, vector<1x1x8x64xf32>
    %205 = vector.shape_cast %204 : vector<1x1x8x64xf32> to vector<8x64xf32>
    %206 = vector.shape_cast %203 : vector<8x64xf32> to vector<1x1x8x64xf32>
    tpu.vector_store %arg8[%c0_128, %c7_129, %c0_130, %c0_131], %206 {strides = array<i32>} : memref<1x8x8x64xf32, #tpu.memory_space<vmem>>, vector<1x1x8x64xf32>,
    return
  }
  func.func @transform_0(%arg0: i32) -> (i32, i32, i32, i32) {
    %c0_i32 = arith.constant 0 : i32
    %c0_i32_0 = arith.constant 0 : i32
    %c0_i32_1 = arith.constant 0 : i32
    %c0_i32_2 = arith.constant 0 : i32
    return %arg0, %c0_i32, %c0_i32_0, %c0_i32_1 : i32, i32, i32, i32
  }
  func.func @transform_1(%arg0: i32) -> (i32, i32) {
    %c0_i32 = arith.constant 0 : i32
    %c0_i32_0 = arith.constant 0 : i32
    %c0_i32_1 = arith.constant 0 : i32
    return %c0_i32, %c0_i32_0 : i32, i32
  }
  func.func @transform_2(%arg0: i32) -> (i32, i32) {
    %c0_i32 = arith.constant 0 : i32
    %c0_i32_0 = arith.constant 0 : i32
    %c0_i32_1 = arith.constant 0 : i32
    return %c0_i32, %c0_i32_0 : i32, i32
  }
  func.func @transform_3(%arg0: i32) -> (i32, i32, i32) {
    %c0_i32 = arith.constant 0 : i32
    %c0_i32_0 = arith.constant 0 : i32
    %c0_i32_1 = arith.constant 0 : i32
    %c0_i32_2 = arith.constant 0 : i32
    return %c0_i32, %c0_i32_0, %c0_i32_1 : i32, i32, i32
  }
  func.func @transform_4(%arg0: i32) -> (i32, i32) {
    %c0_i32 = arith.constant 0 : i32
    %c0_i32_0 = arith.constant 0 : i32
    %c0_i32_1 = arith.constant 0 : i32
    return %c0_i32, %c0_i32_0 : i32, i32
  }
  func.func @transform_5(%arg0: i32) -> (i32, i32) {
    %c0_i32 = arith.constant 0 : i32
    %c0_i32_0 = arith.constant 0 : i32
    %c0_i32_1 = arith.constant 0 : i32
    return %c0_i32, %c0_i32_0 : i32, i32
  }
  func.func @transform_6(%arg0: i32) -> (i32, i32) {
    %c0_i32 = arith.constant 0 : i32
    %c0_i32_0 = arith.constant 0 : i32
    %c0_i32_1 = arith.constant 0 : i32
    return %c0_i32, %c0_i32_0 : i32, i32
  }
  func.func @transform_7(%arg0: i32) -> (i32, i32, i32, i32) {
    %c0_i32 = arith.constant 0 : i32
    %c0_i32_0 = arith.constant 0 : i32
    %c0_i32_1 = arith.constant 0 : i32
    %c0_i32_2 = arith.constant 0 : i32
    return %arg0, %c0_i32, %c0_i32_0, %c0_i32_1 : i32, i32, i32, i32
  }
}

</mosaic_0001>

<bundles_post_ra>
// kernel: resnet12_block_forward.1
= control target key start
LH: loop header
LB: loop body
LE: loop exit
PB: predicated region body
PF: predicated region fallthrough
CT: control target
= control target key end

     0   :  { %12 = vsyncpa [#allocation5], 0  ;;  %s6627_s0 = inlined_call_operand.vmem [shape: bf16[2,16,16,64], index: 0, kind: input, shape index: {}]   ;;  %s6628_s1 = inlined_call_operand.vmem [shape: bf16[64,128], index: 1, kind: input, shape index: {}]   ;;  %s6629_s2 = inlined_call_operand.vmem [shape: f32[1,128], index: 2, kind: input, shape index: {}]   ;;  %s6630_s3 = inlined_call_operand.vmem [shape: bf16[9,64,64], index: 3, kind: input, shape index: {}]   ;;  %s6631_s4 = inlined_call_operand.vmem [shape: f32[1,64], index: 4, kind: input, shape index: {}]   ;;  %s6632_s5 = inlined_call_operand.vmem [shape: bf16[64,64], index: 5, kind: input, shape index: {}]   ;;  %s6633_s6 = inlined_call_operand.vmem [shape: f32[1,64], index: 6, kind: input, shape index: {}]   ;;  %s6634_s7 = inlined_call_operand.hbm [shape: f32[2,8,8,64], index: 7, kind: output, shape index: {}]  }
   0x1   :  { %14 = vsyncpa [#allocation5 + $0x1], 0  ;;  %s5536_s24 = smov 0   ;;  %s5538_s25 = smov 0  }
   0x2   :  { %s5540_s26 = smov 0   ;;  %s5542_s27 = smov 0  }
   0x3 LB: > { %s5557_s28 = sadd.s32 4294967295, %s5488_s27   ;;  %s4074_s29 = sadd.s32 4294967294, %s5488_s27   ;;  %s5488_s27 = sphi %s5542_s27, %s6640_s27   ;;  %s5484_s26 = sphi %s5540_s26, %s6639_s26   ;;  %s5480_s25 = sphi %s5538_s25, %s6638_s25   ;;  %s5476_s24 = sphi %s5536_s24, %s6637_s24  }
   0x4   : > { %s5561_s30 = sadd.s32 1, %s5488_s27   ;;  %s179_s8 = sadd.s32 1, %s5484_s26 }
   0x5   : > { %s176_s9 = ssub.s32 %s5488_s27, %s5561_s30  ;;  %p189_p0 = scmp.ne.s32.totalorder %s5484_s26, %s5480_s25 }
   0x6   : > { %p177_p1 = scmp.eq.s32.totalorder %s176_s9, 0  ;;  %p190_p2 = scmp.eq.s32.totalorder %s5557_s28, 1 }
   0x7   : > { %p195_p3 = scmp.ne.s32.totalorder %s5480_s25, %s5476_s24  ;;  %p196_p4 = scmp.eq.s32.totalorder %s4074_s29, 1 }
   0x8   : > { %s5572_s10 = scalar_select %p177_p1, %s5484_s26, %s179_s8  }
   0x9   : > { %p5574_p5 = por %p190_p2, %p189_p0  ;;  %p5578_p6 = por %p196_p4, %p195_p3 }
   0xa   : > { %p4077_p7 = scmp.ge.s32.totalorder %s5488_s27, 1  ;;  %p240_p8 = scmp.lt.s32.totalorder %s5488_s27, 3 }
   0xc   : > { %p241_p9 = pnand %p4077_p7, %p240_p8 }
   0xd   : > { %v5366_v0 = vld [vmem:[%s6628_s1] sm:$0xff] (!%p241_p9)   ;;  %p272_p10 = scmp.lt.s32.totalorder (!%p241_p9), %s5557_s28, 1  ;;  %v5367_v1 = vld [vmem:[%s6628_s1 + $0x8] sm:$0xff] (!%p241_p9)   ;;  %vm429_vm0 = vcmask (!%p241_p9), 523264   ;;  %v5368_v2 = vld [vmem:[%s6628_s1 + $0x10] sm:$0xff] (!%p241_p9)   ;;  %v5490_v22 = vmov (!%p241_p9), 0.0  }
   0xe   : > { %244 = sbr.rel (%p241_p9) target bundleno = 1115 (0x45b), region = 48  ;;  %4618 = vmatprep.subr.bf16.mxu0 (!%p241_p9), %v5366_v0  ;;  %v5369_v4 = vld [vmem:[%s6628_s1 + $0x18] sm:$0xff] (!%p241_p9)   ;;  %v5386_v20 = vld [vmem:[%s6630_s3 + $0x60] sm:$0xff] (!%p241_p9)   ;;  %v5387_v21 = vld [vmem:[%s6630_s3 + $0x68] sm:$0xff] (!%p241_p9)   ;;  %745 = vst.msk [vmem:[#allocation2 + $0x20] sm:$0xff] (!%p241_p9), %vm429_vm0, %v5490_v22  ;;  %s269_s15 = sand.u32 (!%p241_p9), 1, %s5480_s25  }
   0xf   : > { %4619 = vmatpush3.bf16.msra.mxu0 (!%p241_p9), %v5366_v0  ;;  %735 = vst.msk [vmem:[#allocation2] sm:$0xff] (!%p241_p9), %vm429_vm0, %v5490_v22  ;;  %736 = vst.msk [vmem:[#allocation2 + $0x8] sm:$0xff] (!%p241_p9), %vm429_vm0, %v5490_v22  ;;  %v5388_v23 = vld [vmem:[%s6630_s3 + $0x70] sm:$0xff] (!%p241_p9)   ;;  %v5389_v24 = vld [vmem:[%s6630_s3 + $0x78] sm:$0xff] (!%p241_p9)   ;;  %s4078_s16 = sshll.u32 (!%p241_p9), %s269_s15, 6  ;;  %s4397_s18 = sshll.u32 (!%p241_p9), %s5557_s28, 10 }
  0x10   : > { %4620 = vmatprep.subr.bf16.mxu0 (!%p241_p9), %v5367_v1  ;;  %737 = vst.msk [vmem:[#allocation2 + $0x10] sm:$0xff] (!%p241_p9), %vm429_vm0, %v5490_v22  ;;  %738 = vst.msk [vmem:[#allocation2 + $0x18] sm:$0xff] (!%p241_p9), %vm429_vm0, %v5490_v22  ;;  %v5690_v25 = vld [vmem:[%s6630_s3 + $0x20] sm:$0xff] (!%p241_p9)   ;;  %v5697_v26 = vld [vmem:[%s6630_s3 + $0x28] sm:$0xff] (!%p241_p9)   ;;  %s5493_s29 = smov (!%p241_p9), [#allocation4]  }
  0x11   : > { %740 = vst.msk [vmem:[#allocation2 + $0x220] sm:$0xff] (!%p241_p9), %vm429_vm0, %v5490_v22  ;;  %741 = vst.msk [vmem:[#allocation2 + $0x228] sm:$0xff] (!%p241_p9), %vm429_vm0, %v5490_v22  ;;  %5058 = vmatprep.subr.bf16.mxu1 (!%p241_p9), %v5690_v25  ;;  %v5704_v27 = vld [vmem:[%s6630_s3 + $0x30] sm:$0xff] (!%p241_p9)   ;;  %v5711_v28 = vld [vmem:[%s6630_s3 + $0x38] sm:$0xff] (!%p241_p9)   ;;  %s5430_s8 = sshll.u32 (!%p241_p9), %s5493_s29, 4  ;;  %s5431_s8 = int_to_ptr.vmem [resolvable:$false] %s5430_s8 }
  0x12   : > { %742 = vst.msk [vmem:[#allocation2 + $0x230] sm:$0xff] (!%p241_p9), %vm429_vm0, %v5490_v22  ;;  %743 = vst.msk [vmem:[#allocation2 + $0x238] sm:$0xff] (!%p241_p9), %vm429_vm0, %v5490_v22  ;;  %5062 = vmatpush3.bf16.msra.mxu1 (!%p241_p9), %v5690_v25  ;;  %v5718_v29 = vld [vmem:[%s6630_s3 + $0x80] sm:$0xff] (!%p241_p9)   ;;  %s5432_s9 = scalar_lea.vmem (!%p241_p9), %s5431_s8, 2048 }
  0x13   : > { %4621 = vmatpush3.bf16.msra.mxu0 (!%p241_p9), %v5367_v1  ;;  %746 = vst.msk [vmem:[#allocation2 + $0x40] sm:$0xff] (!%p241_p9), %vm429_vm0, %v5490_v22  ;;  %747 = vst.msk [vmem:[#allocation2 + $0x60] sm:$0xff] (!%p241_p9), %vm429_vm0, %v5490_v22  ;;  %5059 = vmatprep.subr.bf16.mxu1 (!%p241_p9), %v5697_v26  ;;  %v5724_v30 = vld [vmem:[%s6630_s3] sm:$0xff] (!%p241_p9)  }
  0x14   : > { %4622 = vmatprep.subr.bf16.mxu0 (!%p241_p9), %v5368_v2  ;;  %748 = vst.msk [vmem:[#allocation2 + $0x80] sm:$0xff] (!%p241_p9), %vm429_vm0, %v5490_v22  ;;  %749 = vst.msk [vmem:[#allocation2 + $0xa0] sm:$0xff] (!%p241_p9), %vm429_vm0, %v5490_v22  ;;  %v5730_v31 = vld [vmem:[%s6629_s2] ss:$0 sm:$0xff] (!%p241_p9) }
  0x15   : > { %s273_s17 = scalar_select %p272_p10, %s5557_s28, 1  ;;  %750 = vst.msk [vmem:[#allocation2 + $0xc0] sm:$0xff] %vm429_vm0, %v5490_v22  ;;  %751 = vst.msk [vmem:[#allocation2 + $0xe0] sm:$0xff] %vm429_vm0, %v5490_v22 }
  0x16   : > { %752 = vst.msk [vmem:[#allocation2 + $0x100] sm:$0xff] %vm429_vm0, %v5490_v22  ;;  %753 = vst.msk [vmem:[#allocation2 + $0x120] sm:$0xff] %vm429_vm0, %v5490_v22  ;;  %5063 = vmatpush3.bf16.msra.mxu1 %v5697_v26 }
  0x17   : > { %s4396_s20 = sshll.u32 %s273_s17, 7  ;;  %4623 = vmatpush3.bf16.msra.mxu0 %v5368_v2  ;;  %754 = vst.msk [vmem:[#allocation2 + $0x140] sm:$0xff] %vm429_vm0, %v5490_v22  ;;  %755 = vst.msk [vmem:[#allocation2 + $0x160] sm:$0xff] %vm429_vm0, %v5490_v22  ;;  %5060 = vmatprep.subr.bf16.mxu1 %v5704_v27  ;;  %s6487_s17 = scalar_lea.vmem [#allocation4], %s4078_s16 }
  0x18   : > { %s5598_s23 = scalar_lea.vmem %s6627_s0, %s4396_s20  ;;  %4624 = vmatprep.subr.bf16.mxu0 %v5369_v4  ;;  %756 = vst.msk [vmem:[#allocation2 + $0x180] sm:$0xff] %vm429_vm0, %v5490_v22  ;;  %757 = vst.msk [vmem:[#allocation2 + $0x1a0] sm:$0xff] %vm429_vm0, %v5490_v22  ;;  %s5491_s20 = smov 64  }
  0x19   : > { %v5370_v3 = vld [vmem:[%s5598_s23] sm:$0xff]   ;;  %v5371_v5 = vld [vmem:[%s5598_s23 + $0x8] sm:$0xff]   ;;  %v5372_v6 = vld [vmem:[%s5598_s23 + $0x10] sm:$0xff]   ;;  %758 = vst.msk [vmem:[#allocation2 + $0x1c0] sm:$0xff] %vm429_vm0, %v5490_v22  ;;  %s4012_s19 = sshll.u32 %s6487_s17, 4  ;;  %s6580_s19 = int_to_ptr.vmem [resolvable:$true] %s4012_s19 }
  0x1a   : > { %4626 = vmatprep.mubr.msk.bf16.mxu0 %vm429_vm0, %v5370_v3  ;;  %v5373_v7 = vld [vmem:[%s5598_s23 + $0x18] sm:$0xff]   ;;  %v5374_v8 = vld [vmem:[%s5598_s23 + $0x20] sm:$0xff]   ;;  %v5375_v9 = vld [vmem:[%s5598_s23 + $0x28] sm:$0xff]   ;;  %759 = vst.msk [vmem:[#allocation2 + $0x1e0] sm:$0xff] %vm429_vm0, %v5490_v22  ;;  %5064 = vmatpush3.bf16.msra.mxu1 %v5704_v27  ;;  %s5426_s28 = scalar_lea.vmem %s6580_s19, 1024  ;;  %p5433_p0 = scmp.lt.s32.totalorder %s6580_s19, %s5431_s8 }
  0x1b   : > { %4625 = vmatpush3.bf16.msra.mxu0 %v5369_v4  ;;  %v5376_v10 = vld [vmem:[%s5598_s23 + $0x30] sm:$0xff]   ;;  %v5377_v11 = vld [vmem:[%s5598_s23 + $0x38] sm:$0xff]   ;;  %v5378_v12 = vld [vmem:[%s5598_s23 + $0x40] sm:$0xff]   ;;  %760 = vst.msk [vmem:[#allocation2 + $0x200] sm:$0xff] %vm429_vm0, %v5490_v22  ;;  %5061 = vmatprep.subr.bf16.mxu1 %v5711_v28  ;;  %p5427_p11 = scmp.ne.s32.totalorder %s6580_s19, %s5426_s28  ;;  %p5434_p1 = scmp.lt.s32.totalorder %s5432_s9, %s5426_s28 }
  0x1c   : > { %v5379_v13 = vld [vmem:[%s5598_s23 + $0x48] sm:$0xff]   ;;  %v5380_v14 = vld [vmem:[%s5598_s23 + $0x50] sm:$0xff]   ;;  %v5381_v15 = vld [vmem:[%s5598_s23 + $0x58] sm:$0xff]   ;;  %4658 = vmatprep.subr.bf16.mxu0 %v5386_v20  ;;  %761 = vst.msk [vmem:[#allocation2 + $0x38] sm:$0xff] %vm429_vm0, %v5490_v22 }
  0x1d   : > { %v5382_v16 = vld [vmem:[%s5598_s23 + $0x60] sm:$0xff]   ;;  %v5383_v17 = vld [vmem:[%s5598_s23 + $0x68] sm:$0xff]   ;;  %v5384_v18 = vld [vmem:[%s5598_s23 + $0x70] sm:$0xff]   ;;  %762 = vst.msk [vmem:[#allocation2 + $0x58] sm:$0xff] %vm429_vm0, %v5490_v22  ;;  %p5428_p12 = pnand %p5427_p11, %p5574_p5  ;;  %p5435_p2 = por %p5434_p1, %p5433_p0 }
  0x1e   : > { %4627 = vmatmul.mubr.msk.bf16.vlgmr.msra.gmra.mrb[0].mxu0 %vm429_vm0, %v5371_v5  ;;  %v5385_v19 = vld [vmem:[%s5598_s23 + $0x78] sm:$0xff]   ;;  %763 = vst.msk [vmem:[#allocation2 + $0x78] sm:$0xff] %vm429_vm0, %v5490_v22  ;;  %764 = vst.msk [vmem:[#allocation2 + $0x98] sm:$0xff] %vm429_vm0, %v5490_v22  ;;  %5065 = vmatpush3.bf16.msra.mxu1 %v5711_v28  ;;  %s6578_s23 = scalar_lea.hbm %s6634_s7, %s4397_s18 }
  0x1f   : > { %4630 = vmatprep.mubr.msk.bf16.mxu0 %vm429_vm0, %v5372_v6  ;;  %4659 = vmatpush3.bf16.msra.mxu0 %v5386_v20  ;;  %765 = vst.msk [vmem:[#allocation2 + $0xb8] sm:$0xff] %vm429_vm0, %v5490_v22  ;;  %766 = vst.msk [vmem:[#allocation2 + $0xd8] sm:$0xff] %vm429_vm0, %v5490_v22  ;;  %p5429_p13 = pneg %p5428_p12 }
  0x20   : > { %767 = vst.msk [vmem:[#allocation2 + $0xf8] sm:$0xff] %vm429_vm0, %v5490_v22  ;;  %768 = vst.msk [vmem:[#allocation2 + $0x118] sm:$0xff] %vm429_vm0, %v5490_v22  ;;  %4660 = vmatprep.subr.bf16.mxu0 %v5387_v21  ;;  %4818 = vmatprep.subr.bf16.mxu1 %v5718_v29 }
  0x21   : > { %769 = vst.msk [vmem:[#allocation2 + $0x138] sm:$0xff] %vm429_vm0, %v5490_v22  ;;  %770 = vst.msk [vmem:[#allocation2 + $0x158] sm:$0xff] %vm429_vm0, %v5490_v22  ;;  %p5436_p3 = pnand %p5435_p2, %p5429_p13 }
  0x22   : > { %771 = vst.msk [vmem:[#allocation2 + $0x178] sm:$0xff] %vm429_vm0, %v5490_v22  ;;  %772 = vst.msk [vmem:[#allocation2 + $0x198] sm:$0xff] %vm429_vm0, %v5490_v22 }
  0x23   : > { %773 = vst.msk [vmem:[#allocation2 + $0x1b8] sm:$0xff] %vm429_vm0, %v5490_v22  ;;  %774 = vst.msk [vmem:[#allocation2 + $0x1d8] sm:$0xff] %vm429_vm0, %v5490_v22  ;;  %4661 = vmatpush3.bf16.msra.mxu0 %v5387_v21  ;;  %v5400_v21 = vld [vmem:[%s6630_s3 + $0x10] sm:$0xff]  }
  0x24   : > { %775 = vst.msk [vmem:[#allocation2 + $0x1f8] sm:$0xff] %vm429_vm0, %v5490_v22  ;;  %776 = vst.msk [vmem:[#allocation2 + $0x218] sm:$0xff] %vm429_vm0, %v5490_v22  ;;  %4662 = vmatprep.subr.bf16.mxu0 %v5388_v23 }
  0x26   : > { %4631 = vmatmul.mubr.msk.bf16.gmra.mrb[4].mxu0 %vm429_vm0, %v5373_v7 }
  0x27   : > { %4634 = vmatprep.mubr.msk.bf16.mxu0 %vm429_vm0, %v5374_v8  ;;  %4663 = vmatpush3.bf16.msra.mxu0 %v5388_v23 }
  0x28   : > { %4664 = vmatprep.subr.bf16.mxu0 %v5389_v24 }
  0x2b   : > { %4665 = vmatpush3.bf16.msra.mxu0 %v5389_v24 }
  0x2c   : > { %4698 = vmatprep.subr.bf16.mxu0 %v5724_v30 }
  0x2e   : > { %4635 = vmatmul.mubr.msk.bf16.gmra.mrb[8].mxu0 %vm429_vm0, %v5375_v9 }
  0x2f   : > { %4638 = vmatprep.mubr.msk.bf16.mxu0 %vm429_vm0, %v5376_v10 }
  0x36   : > { %4639 = vmatmul.mubr.msk.bf16.gmra.mrb[12].mxu0 %vm429_vm0, %v5377_v11  ;;  %v5398_v11 = vld [vmem:[%s6630_s3 + $0x8] sm:$0xff]  }
  0x37   : > { %4642 = vmatprep.mubr.msk.bf16.mxu0 %vm429_vm0, %v5378_v12 }
  0x3e   : > { %4643 = vmatmul.mubr.msk.bf16.gmra.mrb[16].mxu0 %vm429_vm0, %v5379_v13 }
  0x3f   : > { %4646 = vmatprep.mubr.msk.bf16.mxu0 %vm429_vm0, %v5380_v14 }
  0x46   : > { %4647 = vmatmul.mubr.msk.bf16.gmra.mrb[20].mxu0 %vm429_vm0, %v5381_v15 }
  0x47   : > { %4650 = vmatprep.mubr.msk.bf16.mxu0 %vm429_vm0, %v5382_v16 }
  0x4e   : > { %4651 = vmatmul.mubr.msk.bf16.gmra.mrb[24].mxu0 %vm429_vm0, %v5383_v17 }
  0x4f   : > { %4654 = vmatprep.mubr.msk.bf16.mxu0 %vm429_vm0, %v5384_v18 }
  0x56   : > { %4655 = vmatmul.mubr.msk.bf16.gmra.mrb[28].mxu0 %vm429_vm0, %v5385_v19 }
  0xf1   : > { %v4628_v32 = vpop.f32.mrb[0].mxu0 }
  0xf2   : > { %v521_v33 = vadd.f32 %v4628_v32, %v5730_v31  ;;  %v512_v34 = vpop.f32.mrb[1].mxu0 }
  0xf3   : > { %v513_v35 = vadd.f32 %v5730_v31, %v512_v34  ;;  %v4629_v36 = vpop.f32.mrb[2].mxu0 }
  0xf4   : > { %vm641_vm1 = vcmp.gt.f32.partialorder %v521_v33, 0.0  ;;  %v673_v37 = vmul.f32 0.2, %v521_v33  ;;  %v524_v38 = vadd.f32 %v4629_v36, %v5730_v31  ;;  %3537 = vrot.lane.b32.xlu1 %v521_v33, %s5491_s20  ;;  %v515_v39 = vpop.f32.mrb[3].mxu0 }
  0xf5   : > { %vm639_vm2 = vcmp.gt.f32.partialorder %v513_v35, 0.0  ;;  %v671_v40 = vmul.f32 0.2, %v513_v35  ;;  %v516_v41 = vadd.f32 %v5730_v31, %v515_v39  ;;  %3533 = vrot.lane.b32.xlu0 %v513_v35, %s5491_s20 }
  0xf6   : > { %v705_v42 = vsel %vm641_vm1, %v521_v33, %v673_v37  ;;  %vm642_vm3 = vcmp.gt.f32.partialorder %v524_v38, 0.0  ;;  %v674_v43 = vmul.f32 0.2, %v524_v38 }
  0xf7   : > { %779 = vst.msk [vmem:[#allocation2 + $0x48] sm:$0xff] %vm429_vm0, %v705_v42  ;;  %v703_v44 = vsel %vm639_vm2, %v513_v35, %v671_v40  ;;  %vm640_vm4 = vcmp.gt.f32.partialorder %v516_v41, 0.0  ;;  %v672_v45 = vmul.f32 0.2, %v516_v41 }
  0xf8   : > { %777 = vst.msk [vmem:[#allocation2 + $0x28] sm:$0xff] %vm429_vm0, %v703_v44  ;;  %v706_v46 = vsel %vm642_vm3, %v524_v38, %v674_v43  ;;  %3539 = vrot.lane.b32.xlu1 %v524_v38, %s5491_s20 }
  0xf9   : > { %780 = vst.msk [vmem:[#allocation2 + $0x50] sm:$0xff] %vm429_vm0, %v706_v46  ;;  %v704_v47 = vsel %vm640_vm4, %v516_v41, %v672_v45  ;;  %v4632_v48 = vpop.f32.mrb[4].mxu0  ;;  %3535 = vrot.lane.b32.xlu0 %v516_v41, %s5491_s20  ;;  %v5401_v41 = vld [vmem:[%s6630_s3 + $0x18] sm:$0xff]  }
  0xfa   : > { %778 = vst.msk [vmem:[#allocation2 + $0x30] sm:$0xff] %vm429_vm0, %v704_v47  ;;  %v537_v49 = vadd.f32 %v4632_v48, %v5730_v31  ;;  %v528_v50 = vpop.f32.mrb[5].mxu0 }
  0xfb   : > { %v529_v51 = vadd.f32 %v5730_v31, %v528_v50  ;;  %v4633_v52 = vpop.f32.mrb[6].mxu0 }
  0xfc   : > { %vm645_vm5 = vcmp.gt.f32.partialorder %v537_v49, 0.0  ;;  %v677_v53 = vmul.f32 0.2, %v537_v49  ;;  %v540_v54 = vadd.f32 %v4633_v52, %v5730_v31  ;;  %v531_v55 = vpop.f32.mrb[7].mxu0 }
  0xfd   : > { %vm643_vm6 = vcmp.gt.f32.partialorder %v529_v51, 0.0  ;;  %v675_v56 = vmul.f32 0.2, %v529_v51  ;;  %v532_v57 = vadd.f32 %v5730_v31, %v531_v55  ;;  %3545 = vrot.lane.b32.xlu0 %v537_v49, %s5491_s20 }
  0xfe   : > { %v709_v58 = vsel %vm645_vm5, %v537_v49, %v677_v53  ;;  %vm646_vm7 = vcmp.gt.f32.partialorder %v540_v54, 0.0  ;;  %v678_v59 = vmul.f32 0.2, %v540_v54  ;;  %3547 = vrot.lane.b32.xlu1 %v540_v54, %s5491_s20  ;;  %v813_v7 = vld [vmem:[#allocation2 + $0x47] sm:$0xff] }
  0xff   : > { %783 = vst.msk [vmem:[#allocation2 + $0x88] sm:$0xff] %vm429_vm0, %v709_v58  ;;  %v707_v60 = vsel %vm643_vm6, %v529_v51, %v675_v56  ;;  %vm644_vm8 = vcmp.gt.f32.partialorder %v532_v57, 0.0  ;;  %v676_v61 = vmul.f32 0.2, %v532_v57  ;;  %v811_v2 = vld [vmem:[#allocation2 + $0x27] sm:$0xff] }
 0x100   : > { %781 = vst.msk [vmem:[#allocation2 + $0x68] sm:$0xff] %vm429_vm0, %v707_v60  ;;  %v710_v62 = vsel %vm646_vm7, %v540_v54, %v678_v59  ;;  %v814_v63 = vld [vmem:[#allocation2 + $0x4f] sm:$0xff] }
 0x101   : > { %784 = vst.msk [vmem:[#allocation2 + $0x90] sm:$0xff] %vm429_vm0, %v710_v62  ;;  %v708_v0 = vsel %vm644_vm8, %v532_v57, %v676_v61  ;;  %v4636_v1 = vpop.f32.mrb[8].mxu0  ;;  %3541 = vrot.lane.b32.xlu0 %v529_v51, %s5491_s20  ;;  %v812_v3 = vld [vmem:[#allocation2 + $0x2f] sm:$0xff]  ;;  %v5760_v10 = vpack.c.bf16 %v814_v63, %v813_v7  ;;  %v5804_v51 = vld [vmem:[%s6630_s3 + $0xc0] sm:$0xff]  }
 0x102   : > { %782 = vst.msk [vmem:[#allocation2 + $0x70] sm:$0xff] %vm429_vm0, %v708_v0  ;;  %v553_v4 = vadd.f32 %v4636_v1, %v5730_v31  ;;  %v544_v5 = vpop.f32.mrb[9].mxu0  ;;  %3543 = vrot.lane.b32.xlu1 %v532_v57, %s5491_s20  ;;  %v5757_v6 = vpack.c.bf16 %v812_v3, %v811_v2 }
 0x103   : > { %v545_v8 = vadd.f32 %v5730_v31, %v544_v5  ;;  %v4637_v9 = vpop.f32.mrb[10].mxu0 }
 0x104   : > { %vm649_vm9 = vcmp.gt.f32.partialorder %v553_v4, 0.0  ;;  %v681_v12 = vmul.f32 0.2, %v553_v4  ;;  %v556_v13 = vadd.f32 %v4637_v9, %v5730_v31  ;;  %v547_v14 = vpop.f32.mrb[11].mxu0  ;;  %4666 = vmatprep.mubr.msk.bf16.mxu0 %vm429_vm0, %v5757_v6 }
 0x105   : > { %vm647_vm10 = vcmp.gt.f32.partialorder %v545_v8, 0.0  ;;  %v679_v15 = vmul.f32 0.2, %v545_v8  ;;  %v548_v16 = vadd.f32 %v5730_v31, %v547_v14  ;;  %3553 = vrot.lane.b32.xlu0 %v553_v4, %s5491_s20  ;;  %4667 = vmatmul.mubr.msk.bf16.vlgmr.msra.gmra.mrb[32].mxu0 %vm429_vm0, %v5760_v10 }
 0x106   : > { %v713_v17 = vsel %vm649_vm9, %v553_v4, %v681_v12  ;;  %vm650_vm11 = vcmp.gt.f32.partialorder %v556_v13, 0.0  ;;  %v682_v18 = vmul.f32 0.2, %v556_v13  ;;  %3555 = vrot.lane.b32.xlu1 %v556_v13, %s5491_s20  ;;  %4699 = vmatpush3.bf16.msra.mxu0 %v5724_v30  ;;  %v817_v37 = vld [vmem:[#allocation2 + $0x87] sm:$0xff] }
 0x107   : > { %787 = vst.msk [vmem:[#allocation2 + $0xc8] sm:$0xff] %vm429_vm0, %v713_v17  ;;  %v711_v19 = vsel %vm647_vm10, %v545_v8, %v679_v15  ;;  %vm648_vm12 = vcmp.gt.f32.partialorder %v548_v16, 0.0  ;;  %v680_v20 = vmul.f32 0.2, %v548_v16  ;;  %4700 = vmatprep.subr.bf16.mxu0 %v5398_v11  ;;  %v815_v30 = vld [vmem:[#allocation2 + $0x67] sm:$0xff] }
 0x108   : > { %785 = vst.msk [vmem:[#allocation2 + $0xa8] sm:$0xff] %vm429_vm0, %v711_v19  ;;  %v714_v22 = vsel %vm650_vm11, %v556_v13, %v682_v18  ;;  %v818_v23 = vld [vmem:[#allocation2 + $0x8f] sm:$0xff] }
 0x109   : > { %788 = vst.msk [vmem:[#allocation2 + $0xd0] sm:$0xff] %vm429_vm0, %v714_v22  ;;  %v712_v24 = vsel %vm648_vm12, %v548_v16, %v680_v20  ;;  %v4640_v32 = vpop.f32.mrb[12].mxu0  ;;  %3549 = vrot.lane.b32.xlu0 %v545_v8, %s5491_s20  ;;  %v816_v33 = vld [vmem:[#allocation2 + $0x6f] sm:$0xff]  ;;  %v5787_v40 = vpack.c.bf16 %v818_v23, %v817_v37 }
 0x10a   : > { %786 = vst.msk [vmem:[#allocation2 + $0xb0] sm:$0xff] %vm429_vm0, %v712_v24  ;;  %v569_v34 = vadd.f32 %v4640_v32, %v5730_v31  ;;  %v560_v35 = vpop.f32.mrb[13].mxu0  ;;  %3551 = vrot.lane.b32.xlu1 %v548_v16, %s5491_s20  ;;  %v5784_v36 = vpack.c.bf16 %v816_v33, %v815_v30  ;;  %4701 = vmatpush3.bf16.msra.mxu0 %v5398_v11 }
 0x10b   : > { %v561_v38 = vadd.f32 %v5730_v31, %v560_v35  ;;  %v4641_v39 = vpop.f32.mrb[14].mxu0  ;;  %4702 = vmatprep.subr.bf16.mxu0 %v5400_v21 }
 0x10c   : > { %vm653_vm13 = vcmp.gt.f32.partialorder %v569_v34, 0.0  ;;  %v685_v42 = vmul.f32 0.2, %v569_v34  ;;  %v572_v43 = vadd.f32 %v4641_v39, %v5730_v31  ;;  %v563_v44 = vpop.f32.mrb[15].mxu0  ;;  %4670 = vmatprep.mubr.msk.bf16.mxu0 %vm429_vm0, %v5784_v36 }
 0x10d   : > { %vm651_vm14 = vcmp.gt.f32.partialorder %v561_v38, 0.0  ;;  %v683_v45 = vmul.f32 0.2, %v561_v38  ;;  %v564_v46 = vadd.f32 %v5730_v31, %v563_v44  ;;  %3561 = vrot.lane.b32.xlu0 %v569_v34, %s5491_s20  ;;  %4671 = vmatmul.mubr.msk.bf16.gmra.mrb[36].mxu0 %vm429_vm0, %v5787_v40 }
 0x10e   : > { %v717_v47 = vsel %vm653_vm13, %v569_v34, %v685_v42  ;;  %vm654_vm15 = vcmp.gt.f32.partialorder %v572_v43, 0.0  ;;  %v686_v48 = vmul.f32 0.2, %v572_v43  ;;  %3563 = vrot.lane.b32.xlu1 %v572_v43, %s5491_s20  ;;  %4703 = vmatpush3.bf16.msra.mxu0 %v5400_v21  ;;  %v821_v61 = vld [vmem:[#allocation2 + $0xc7] sm:$0xff] }
 0x10f   : > { %791 = vst.msk [vmem:[#allocation2 + $0x108] sm:$0xff] %vm429_vm0, %v717_v47  ;;  %v715_v49 = vsel %vm651_vm14, %v561_v38, %v683_v45  ;;  %vm652_vm1 = vcmp.gt.f32.partialorder %v564_v46, 0.0  ;;  %v684_v50 = vmul.f32 0.2, %v564_v46  ;;  %4704 = vmatprep.subr.bf16.mxu0 %v5401_v41  ;;  %v819_v56 = vld [vmem:[#allocation2 + $0xa7] sm:$0xff] }
 0x110   : > { %789 = vst.msk [vmem:[#allocation2 + $0xe8] sm:$0xff] %vm429_vm0, %v715_v49  ;;  %v718_v52 = vsel %vm654_vm15, %v572_v43, %v686_v48  ;;  %v822_v53 = vld [vmem:[#allocation2 + $0xcf] sm:$0xff] }
 0x111   : > { %792 = vst.msk [vmem:[#allocation2 + $0x110] sm:$0xff] %vm429_vm0, %v718_v52  ;;  %v716_v54 = vsel %vm652_vm1, %v564_v46, %v684_v50  ;;  %v4644_v55 = vpop.f32.mrb[16].mxu0  ;;  %3557 = vrot.lane.b32.xlu0 %v561_v38, %s5491_s20  ;;  %v820_v57 = vld [vmem:[#allocation2 + $0xaf] sm:$0xff]  ;;  %v5815_v0 = vpack.c.bf16 %v822_v53, %v821_v61 }
 0x112   : > { %790 = vst.msk [vmem:[#allocation2 + $0xf0] sm:$0xff] %vm429_vm0, %v716_v54  ;;  %v585_v58 = vadd.f32 %v4644_v55, %v5730_v31  ;;  %v576_v59 = vpop.f32.mrb[17].mxu0  ;;  %3559 = vrot.lane.b32.xlu1 %v564_v46, %s5491_s20  ;;  %v5812_v60 = vpack.c.bf16 %v820_v57, %v819_v56  ;;  %4705 = vmatpush3.bf16.msra.mxu0 %v5401_v41 }
 0x113   : > { %v577_v62 = vadd.f32 %v5730_v31, %v576_v59  ;;  %v4645_v63 = vpop.f32.mrb[18].mxu0  ;;  %4738 = vmatprep.subr.bf16.mxu0 %v5804_v51 }
 0x114   : > { %vm657_vm2 = vcmp.gt.f32.partialorder %v585_v58, 0.0  ;;  %v689_v1 = vmul.f32 0.2, %v585_v58  ;;  %v588_v2 = vadd.f32 %v4645_v63, %v5730_v31  ;;  %v579_v3 = vpop.f32.mrb[19].mxu0  ;;  %4674 = vmatprep.mubr.msk.bf16.mxu0 %vm429_vm0, %v5812_v60 }
 0x115   : > { %vm655_vm3 = vcmp.gt.f32.partialorder %v577_v62, 0.0  ;;  %v687_v4 = vmul.f32 0.2, %v577_v62  ;;  %v580_v5 = vadd.f32 %v5730_v31, %v579_v3  ;;  %3569 = vrot.lane.b32.xlu0 %v585_v58, %s5491_s20  ;;  %4675 = vmatmul.mubr.msk.bf16.gmra.mrb[40].mxu0 %vm429_vm0, %v5815_v0 }
 0x116   : > { %v721_v7 = vsel %vm657_vm2, %v585_v58, %v689_v1  ;;  %vm658_vm4 = vcmp.gt.f32.partialorder %v588_v2, 0.0  ;;  %v690_v8 = vmul.f32 0.2, %v588_v2  ;;  %3571 = vrot.lane.b32.xlu1 %v588_v2, %s5491_s20  ;;  %v1546_v13 = vld [vmem:[#allocation2 + $0x108] sm:$0xff] }
 0x117   : > { %795 = vst.msk [vmem:[#allocation2 + $0x148] sm:$0xff] %vm429_vm0, %v721_v7  ;;  %v719_v9 = vsel %vm655_vm3, %v577_v62, %v687_v4  ;;  %vm656_vm5 = vcmp.gt.f32.partialorder %v580_v5, 0.0  ;;  %v688_v11 = vmul.f32 0.2, %v580_v5  ;;  %v823_v19 = vld [vmem:[#allocation2 + $0xe7] sm:$0xff] }
 0x118   : > { %793 = vst.msk [vmem:[#allocation2 + $0x128] sm:$0xff] %vm429_vm0, %v719_v9  ;;  %v722_v12 = vsel %vm658_vm4, %v588_v2, %v690_v8  ;;  %v1547_v14 = vld [vmem:[#allocation2 + $0x110] sm:$0xff]  ;;  %v825_v24 = vld [vmem:[#allocation2 + $0x107] sm:$0xff] }
 0x119   : > { %v826_v15 = vld [vmem:[#allocation2 + $0x10f] sm:$0xff]  ;;  %796 = vst.msk [vmem:[#allocation2 + $0x150] sm:$0xff] %vm429_vm0, %v722_v12  ;;  %v720_v16 = vsel %vm656_vm5, %v580_v5, %v688_v11  ;;  %v4648_v17 = vpop.f32.mrb[20].mxu0  ;;  %3565 = vrot.lane.b32.xlu0 %v577_v62, %s5491_s20  ;;  %v5830_v18 = vpack.c.bf16 %v1547_v14, %v1546_v13 }
 0x11a   : > { %v824_v20 = vld [vmem:[#allocation2 + $0xef] sm:$0xff]  ;;  %794 = vst.msk [vmem:[#allocation2 + $0x130] sm:$0xff] %vm429_vm0, %v720_v16  ;;  %v601_v21 = vadd.f32 %v4648_v17, %v5730_v31  ;;  %v592_v22 = vpop.f32.mrb[21].mxu0  ;;  %3567 = vrot.lane.b32.xlu1 %v580_v5, %s5491_s20  ;;  %v5840_v33 = vpack.c.bf16 %v826_v15, %v825_v24 }
 0x11b   : > { %v5835_v23 = vpack.c.bf16 %v824_v20, %v823_v19  ;;  %v593_v32 = vadd.f32 %v5730_v31, %v592_v22  ;;  %v4649_v30 = vpop.f32.mrb[22].mxu0  ;;  %4802 = vmatprep.mubr.msk.bf16.mxu1 %vm429_vm0, %v5830_v18  ;;  %v5395_v2 = vld [vmem:[%s6630_s3 + $0x88] sm:$0xff]   ;;  %v5396_v13 = vld [vmem:[%s6630_s3 + $0x90] sm:$0xff]  }
 0x11c   : > { %vm661_vm6 = vcmp.gt.f32.partialorder %v601_v21, 0.0  ;;  %v693_v34 = vmul.f32 0.2, %v601_v21  ;;  %v604_v35 = vadd.f32 %v4649_v30, %v5730_v31  ;;  %v595_v37 = vpop.f32.mrb[23].mxu0 }
 0x11d   : > { %4678 = vmatprep.mubr.msk.bf16.mxu0 %vm429_vm0, %v5835_v23  ;;  %vm659_vm7 = vcmp.gt.f32.partialorder %v593_v32, 0.0  ;;  %v691_v38 = vmul.f32 0.2, %v593_v32  ;;  %v596_v39 = vadd.f32 %v5730_v31, %v595_v37  ;;  %3577 = vrot.lane.b32.xlu0 %v601_v21, %s5491_s20 }
 0x11e   : > { %4679 = vmatmul.mubr.msk.bf16.gmra.mrb[44].mxu0 %vm429_vm0, %v5840_v33  ;;  %v725_v41 = vsel %vm661_vm6, %v601_v21, %v693_v34  ;;  %vm662_vm8 = vcmp.gt.f32.partialorder %v604_v35, 0.0  ;;  %v694_v42 = vmul.f32 0.2, %v604_v35  ;;  %3579 = vrot.lane.b32.xlu1 %v604_v35, %s5491_s20  ;;  %v1550_v59 = vld [vmem:[#allocation2 + $0x148] sm:$0xff] }
 0x11f   : > { %799 = vst.msk [vmem:[#allocation2 + $0x188] sm:$0xff] %vm429_vm0, %v725_v41  ;;  %v723_v43 = vsel %vm659_vm7, %v593_v32, %v691_v38  ;;  %vm660_vm9 = vcmp.gt.f32.partialorder %v596_v39, 0.0  ;;  %v692_v44 = vmul.f32 0.2, %v596_v39  ;;  %v827_v46 = vld [vmem:[#allocation2 + $0x127] sm:$0xff] }
 0x120   : > { %797 = vst.msk [vmem:[#allocation2 + $0x168] sm:$0xff] %vm429_vm0, %v723_v43  ;;  %v726_v45 = vsel %vm662_vm8, %v604_v35, %v694_v42  ;;  %v1548_v47 = vld [vmem:[#allocation2 + $0x128] sm:$0xff]  ;;  %v1551_v48 = vld [vmem:[#allocation2 + $0x150] sm:$0xff] }
 0x121   : > { %800 = vst.msk [vmem:[#allocation2 + $0x190] sm:$0xff] %vm429_vm0, %v726_v45  ;;  %v724_v49 = vsel %vm660_vm9, %v596_v39, %v692_v44  ;;  %v4652_v50 = vpop.f32.mrb[24].mxu0  ;;  %3573 = vrot.lane.b32.xlu0 %v593_v32, %s5491_s20  ;;  %v828_v52 = vld [vmem:[#allocation2 + $0x12f] sm:$0xff]  ;;  %v5862_v63 = vpack.c.bf16 %v1551_v48, %v1550_v59  ;;  %v829_v1 = vld [vmem:[#allocation2 + $0x147] sm:$0xff]  ;;  %v5399_v44 = vld [vmem:[%s6630_s3 + $0x98] sm:$0xff]  }
 0x122   : > { %v1549_v53 = vld [vmem:[#allocation2 + $0x130] sm:$0xff]  ;;  %798 = vst.msk [vmem:[#allocation2 + $0x170] sm:$0xff] %vm429_vm0, %v724_v49  ;;  %v617_v55 = vadd.f32 %v4652_v50, %v5730_v31  ;;  %v608_v56 = vpop.f32.mrb[25].mxu0  ;;  %3575 = vrot.lane.b32.xlu1 %v596_v39, %s5491_s20  ;;  %v5857_v57 = vpack.c.bf16 %v828_v52, %v827_v46 }
 0x123   : > { %v830_v54 = vld [vmem:[#allocation2 + $0x14f] sm:$0xff]  ;;  %v5859_v58 = vpack.c.bf16 %v1549_v53, %v1548_v47  ;;  %v609_v61 = vadd.f32 %v5730_v31, %v608_v56  ;;  %v4653_v62 = vpop.f32.mrb[26].mxu0 }
 0x124   : > { %vm665_vm10 = vcmp.gt.f32.partialorder %v617_v55, 0.0  ;;  %v697_v3 = vmul.f32 0.2, %v617_v55  ;;  %v620_v4 = vadd.f32 %v4653_v62, %v5730_v31  ;;  %v611_v5 = vpop.f32.mrb[27].mxu0  ;;  %4682 = vmatprep.mubr.msk.bf16.mxu0 %vm429_vm0, %v5857_v57  ;;  %v5872_v7 = vpack.c.bf16 %v830_v54, %v829_v1  ;;  %v5402_v54 = vld [vmem:[%s6630_s3 + $0xe0] sm:$0xff]  }
 0x125   : > { %4803 = vmatmul.mubr.msk.bf16.vlgmr.msra.gmra.mrb[0].mxu1 %vm429_vm0, %v5859_v58  ;;  %vm663_vm11 = vcmp.gt.f32.partialorder %v609_v61, 0.0  ;;  %v695_v8 = vmul.f32 0.2, %v609_v61  ;;  %v612_v9 = vadd.f32 %v5730_v31, %v611_v5  ;;  %3585 = vrot.lane.b32.xlu0 %v617_v55, %s5491_s20 }
 0x126   : > { %4819 = vmatpush3.bf16.msra.mxu1 %v5718_v29  ;;  %4806 = vmatprep.mubr.msk.bf16.mxu1 %vm429_vm0, %v5862_v63  ;;  %v729_v11 = vsel %vm665_vm10, %v617_v55, %v697_v3  ;;  %vm666_vm12 = vcmp.gt.f32.partialorder %v620_v4, 0.0  ;;  %v698_v12 = vmul.f32 0.2, %v620_v4  ;;  %v1554_v38 = vld [vmem:[#allocation2 + $0x188] sm:$0xff] }
 0x127   : > { %4683 = vmatmul.mubr.msk.bf16.gmra.mrb[48].mxu0 %vm429_vm0, %v5872_v7  ;;  %803 = vst.msk [vmem:[#allocation2 + $0x1c8] sm:$0xff] %vm429_vm0, %v729_v11  ;;  %v727_v14 = vsel %vm663_vm11, %v609_v61, %v695_v8  ;;  %vm664_vm13 = vcmp.gt.f32.partialorder %v612_v9, 0.0  ;;  %v696_v29 = vmul.f32 0.2, %v612_v9  ;;  %3587 = vrot.lane.b32.xlu1 %v620_v4, %s5491_s20  ;;  %v831_v16 = vld [vmem:[#allocation2 + $0x167] sm:$0xff] }
 0x128   : > { %4820 = vmatprep.subr.bf16.mxu1 %v5395_v2  ;;  %801 = vst.msk [vmem:[#allocation2 + $0x1a8] sm:$0xff] %vm429_vm0, %v727_v14  ;;  %v730_v15 = vsel %vm666_vm12, %v620_v4, %v698_v12  ;;  %v1552_v17 = vld [vmem:[#allocation2 + $0x168] sm:$0xff]  ;;  %v1555_v19 = vld [vmem:[#allocation2 + $0x190] sm:$0xff] }
 0x129   : > { %804 = vst.msk [vmem:[#allocation2 + $0x1d0] sm:$0xff] %vm429_vm0, %v730_v15  ;;  %v728_v20 = vsel %vm664_vm13, %v612_v9, %v696_v29  ;;  %v4656_v21 = vpop.f32.mrb[28].mxu0  ;;  %v832_v22 = vld [vmem:[#allocation2 + $0x16f] sm:$0xff]  ;;  %3581 = vrot.lane.b32.xlu0 %v609_v61, %s5491_s20  ;;  %v5897_v42 = vpack.c.bf16 %v1555_v19, %v1554_v38  ;;  %v833_v43 = vld [vmem:[#allocation2 + $0x187] sm:$0xff] }
 0x12a   : > { %v1553_v24 = vld [vmem:[#allocation2 + $0x170] sm:$0xff]  ;;  %4821 = vmatpush3.bf16.msra.mxu1 %v5395_v2  ;;  %802 = vst.msk [vmem:[#allocation2 + $0x1b0] sm:$0xff] %vm429_vm0, %v728_v20  ;;  %v633_v30 = vadd.f32 %v4656_v21, %v5730_v31  ;;  %v624_v34 = vpop.f32.mrb[29].mxu0  ;;  %v5891_v35 = vpack.c.bf16 %v832_v22, %v831_v16  ;;  %v809_v14 = vld [vmem:[#allocation2 + $0x7] sm:$0xff] }
 0x12b   : > { %v834_v32 = vld [vmem:[#allocation2 + $0x18f] sm:$0xff]  ;;  %v5893_v37 = vpack.c.bf16 %v1553_v24, %v1552_v17  ;;  %4822 = vmatprep.subr.bf16.mxu1 %v5396_v13  ;;  %v625_v39 = vadd.f32 %v5730_v31, %v624_v34  ;;  %3583 = vrot.lane.b32.xlu1 %v612_v9, %s5491_s20  ;;  %v4657_v41 = vpop.f32.mrb[30].mxu0 }
 0x12c   : > { %vm669_vm14 = vcmp.gt.f32.partialorder %v633_v30, 0.0  ;;  %v701_v45 = vmul.f32 0.2, %v633_v30  ;;  %v636_v46 = vadd.f32 %v4657_v41, %v5730_v31  ;;  %v627_v47 = vpop.f32.mrb[31].mxu0  ;;  %4686 = vmatprep.mubr.msk.bf16.mxu0 %vm429_vm0, %v5891_v35  ;;  %v5907_v48 = vpack.c.bf16 %v834_v32, %v833_v43  ;;  %v810_v29 = vld [vmem:[#allocation2 + $0xf] sm:$0xff] }
 0x12d   : > { %4807 = vmatmul.mubr.msk.bf16.gmra.mrb[4].mxu1 %vm429_vm0, %v5893_v37  ;;  %vm667_vm15 = vcmp.gt.f32.partialorder %v625_v39, 0.0  ;;  %v699_v49 = vmul.f32 0.2, %v625_v39  ;;  %v628_v50 = vadd.f32 %v5730_v31, %v627_v47  ;;  %3589 = vrot.lane.b32.xlu0 %v625_v39, %s5491_s20  ;;  %v1533_v17 = vld [vmem:[#allocation2 + $0x30] sm:$0xff]  ;;  %v1532_v32 = vld [vmem:[#allocation2 + $0x28] sm:$0xff]  ;;  %v845_v38 = vpack.c.bf16 %v810_v29, %v809_v14 }
 0x12e   : > { %4810 = vmatprep.mubr.msk.bf16.mxu1 %vm429_vm0, %v5897_v42  ;;  %4823 = vmatpush3.bf16.msra.mxu1 %v5396_v13  ;;  %v733_v52 = vsel %vm669_vm14, %v633_v30, %v701_v45  ;;  %vm670_vm1 = vcmp.gt.f32.partialorder %v636_v46, 0.0  ;;  %v702_v53 = vmul.f32 0.2, %v636_v46  ;;  %v1558_v9 = vld [vmem:[#allocation2 + $0x1c8] sm:$0xff]  ;;  %v5945_v34 = vpack.c.bf16 %v1533_v17, %v1532_v32  ;;  %v1535_v41 = vld [vmem:[#allocation2 + $0x50] sm:$0xff]  ;;  %v5418_v32 = vld [vmem:[%s6630_s3 + $0x100] sm:$0xff]  }
 0x12f   : > { %4687 = vmatmul.mubr.msk.bf16.gmra.mrb[52].mxu0 %vm429_vm0, %v5907_v48  ;;  %807 = vst.msk [vmem:[#allocation2 + $0x208] sm:$0xff] %vm429_vm0, %v733_v52  ;;  %v731_v55 = vsel %vm667_vm15, %v625_v39, %v699_v49  ;;  %vm668_vm2 = vcmp.gt.f32.partialorder %v628_v50, 0.0  ;;  %v700_v31 = vmul.f32 0.2, %v628_v50  ;;  %3591 = vrot.lane.b32.xlu1 %v628_v50, %s5491_s20  ;;  %v835_v59 = vld [vmem:[#allocation2 + $0x1a7] sm:$0xff]  ;;  %v1537_v43 = vld [vmem:[#allocation2 + $0x70] sm:$0xff] }
 0x130   : > { %4824 = vmatprep.subr.bf16.mxu1 %v5399_v44  ;;  %805 = vst.msk [vmem:[#allocation2 + $0x1e8] sm:$0xff] %vm429_vm0, %v731_v55  ;;  %v734_v56 = vsel %vm670_vm1, %v636_v46, %v702_v53  ;;  %v1556_v61 = vld [vmem:[#allocation2 + $0x1a8] sm:$0xff]  ;;  %v1559_v62 = vld [vmem:[#allocation2 + $0x1d0] sm:$0xff] }
 0x131   : > { %808 = vst.msk [vmem:[#allocation2 + $0x210] sm:$0xff] %vm429_vm0, %v734_v56  ;;  %v732_v1 = vsel %vm668_vm2, %v628_v50, %v700_v31  ;;  %v836_v2 = vld [vmem:[#allocation2 + $0x1af] sm:$0xff]  ;;  %3593 = vrot.lane.b32.xlu0 %v633_v30, %s5491_s20  ;;  %v837_v11 = vld [vmem:[#allocation2 + $0x1c7] sm:$0xff]  ;;  %v5929_v12 = vpack.c.bf16 %v1559_v62, %v1558_v9 }
 0x132   : > { %v1557_v3 = vld [vmem:[#allocation2 + $0x1b0] sm:$0xff]  ;;  %4825 = vmatpush3.bf16.msra.mxu1 %v5399_v44  ;;  %806 = vst.msk [vmem:[#allocation2 + $0x1f0] sm:$0xff] %vm429_vm0, %v732_v1  ;;  %v5924_v5 = vpack.c.bf16 %v836_v2, %v835_v59  ;;  %v1534_v44 = vld [vmem:[#allocation2 + $0x48] sm:$0xff]  ;;  %v5405_v59 = vld [vmem:[%s6630_s3 + $0xf8] sm:$0xff]  }
 0x133   : > { %v838_v4 = vld [vmem:[#allocation2 + $0x1cf] sm:$0xff]  ;;  %v5926_v8 = vpack.c.bf16 %v1557_v3, %v1556_v61  ;;  %4858 = vmatprep.subr.bf16.mxu1 %v5402_v54  ;;  %3595 = vrot.lane.b32.xlu1 %v636_v46, %s5491_s20  ;;  %v5958_v45 = vpack.c.bf16 %v1535_v41, %v1534_v44  ;;  %v5410_v62 = vld [vmem:[%s6630_s3 + $0x40] sm:$0xff]   ;;  %s6586_s20 = scalar_lea.sflag [#allocation5], %s269_s15 }
 0x134   : > { %4690 = vmatprep.mubr.msk.bf16.mxu0 %vm429_vm0, %v5924_v5  ;;  %v5935_v13 = vpack.c.bf16 %v838_v4, %v837_v11  ;;  %v1536_v46 = vld [vmem:[#allocation2 + $0x68] sm:$0xff]  ;;  %v5404_v52 = vld [vmem:[%s6630_s3 + $0xf0] sm:$0xff]  }
 0x135   : > { %4811 = vmatmul.mubr.msk.bf16.gmra.mrb[8].mxu1 %vm429_vm0, %v5926_v8  ;;  %v5403_v47 = vld [vmem:[%s6630_s3 + $0xe8] sm:$0xff]   ;;  %v5963_v49 = vpack.c.bf16 %v1537_v43, %v1536_v46  ;;  %v1539_v53 = vld [vmem:[#allocation2 + $0x90] sm:$0xff] }
 0x136   : > { %4814 = vmatprep.mubr.msk.bf16.mxu1 %vm429_vm0, %v5929_v12  ;;  %v841_v30 = vld [vmem:[#allocation2 + $0x207] sm:$0xff]  ;;  %v1541_v55 = vld [vmem:[#allocation2 + $0xb0] sm:$0xff] }
 0x137   : > { %4691 = vmatmul.mubr.msk.bf16.gmra.mrb[56].mxu0 %vm429_vm0, %v5935_v13  ;;  %v839_v15 = vld [vmem:[#allocation2 + $0x1e7] sm:$0xff]  ;;  %v1543_v1 = vld [vmem:[#allocation2 + $0xd0] sm:$0xff] }
 0x138   : > { %v1560_v16 = vld [vmem:[#allocation2 + $0x1e8] sm:$0xff]  ;;  %v1545_v2 = vld [vmem:[#allocation2 + $0xf0] sm:$0xff] }
 0x139   : > { %v840_v19 = vld [vmem:[#allocation2 + $0x1ef] sm:$0xff] }
 0x13a   : > { %v1561_v20 = vld [vmem:[#allocation2 + $0x1f0] sm:$0xff]  ;;  %v5941_v22 = vpack.c.bf16 %v840_v19, %v839_v15  ;;  %v5407_v50 = vld [vmem:[%s6630_s3 + $0xc8] sm:$0xff]  }
 0x13b   : > { %v842_v21 = vld [vmem:[#allocation2 + $0x20f] sm:$0xff]  ;;  %v5943_v24 = vpack.c.bf16 %v1561_v20, %v1560_v16 }
 0x13c   : > { %4694 = vmatprep.mubr.msk.bf16.mxu0 %vm429_vm0, %v5941_v22  ;;  %v5951_v39 = vpack.c.bf16 %v842_v21, %v841_v30  ;;  %v1538_v31 = vld [vmem:[#allocation2 + $0x88] sm:$0xff]  ;;  %v1563_v14 = vld [vmem:[#allocation2 + $0x210] sm:$0xff] }
 0x13d   : > { %4815 = vmatmul.mubr.msk.bf16.gmra.mrb[12].mxu1 %vm429_vm0, %v5943_v24  ;;  %v1540_v56 = vld [vmem:[#allocation2 + $0xa8] sm:$0xff]  ;;  %v5412_v17 = vld [vmem:[%s6630_s3 + $0x50] sm:$0xff]  }
 0x13e   : > { %4826 = vmatprep.mubr.msk.bf16.mxu1 %vm429_vm0, %v5945_v34  ;;  %v5988_v61 = vpack.c.bf16 %v1541_v55, %v1540_v56  ;;  %v1542_v3 = vld [vmem:[#allocation2 + $0xc8] sm:$0xff]  ;;  %v2325_v20 = vld [vmem:[#allocation2 + $0x91] sm:$0xff] }
 0x13f   : > { %4695 = vmatmul.mubr.msk.bf16.gmra.mrb[60].mxu0 %vm429_vm0, %v5951_v39  ;;  %v6004_v4 = vpack.c.bf16 %v1543_v1, %v1542_v3  ;;  %v1544_v9 = vld [vmem:[#allocation2 + $0xe8] sm:$0xff]  ;;  %v2343_v3 = vld [vmem:[#allocation2 + $0x1b1] sm:$0xff] }
 0x140   : > { %4706 = vmatprep.mubr.msk.bf16.mxu0 %vm429_vm0, %v845_v38  ;;  %v6006_v11 = vpack.c.bf16 %v1545_v2, %v1544_v9  ;;  %v1562_v29 = vld [vmem:[#allocation2 + $0x208] sm:$0xff]  ;;  %v2345_v9 = vld [vmem:[#allocation2 + $0x1d1] sm:$0xff] }
 0x141   : > { %v1582_v15 = vpack.c.bf16 %v1563_v14, %v1562_v29  ;;  %v5411_v16 = vld [vmem:[%s6630_s3 + $0x48] sm:$0xff]  }
 0x142   : > { %v2324_v19 = vld [vmem:[#allocation2 + $0x89] sm:$0xff] }
 0x143   : > { %v2326_v30 = vld [vmem:[#allocation2 + $0xa9] sm:$0xff] }
 0x144   : > { %v2328_v38 = vld [vmem:[#allocation2 + $0xc9] sm:$0xff] }
 0x145   : > { %4827 = vmatmul.mubr.msk.bf16.vlgmr.msra.gmra.mrb[16].mxu1 %vm429_vm0, %v5958_v45  ;;  %v2330_v44 = vld [vmem:[#allocation2 + $0xe9] sm:$0xff] }
 0x146   : > { %4859 = vmatpush3.bf16.msra.mxu1 %v5402_v54  ;;  %4830 = vmatprep.mubr.msk.bf16.mxu1 %vm429_vm0, %v5963_v49  ;;  %v5408_v54 = vld [vmem:[%s6630_s3 + $0xd0] sm:$0xff]  }
 0x147   : > { %4707 = vmatmul.mubr.msk.bf16.vlgmr.msra.gmra.mrb[32].mxu0 %vm429_vm0, %v5757_v6  ;;  %4860 = vmatprep.subr.bf16.mxu1 %v5403_v47  ;;  %v5983_v6 = vpack.c.bf16 %v1539_v53, %v1538_v31  ;;  %v2332_v46 = vld [vmem:[#allocation2 + $0x109] sm:$0xff]  ;;  %v2335_v53 = vld [vmem:[#allocation2 + $0x131] sm:$0xff] }
 0x148   : > { %4710 = vmatprep.mubr.msk.bf16.mxu0 %vm429_vm0, %v5760_v10  ;;  %4739 = vmatpush3.bf16.msra.mxu0 %v5804_v51  ;;  %v5409_v51 = vld [vmem:[%s6630_s3 + $0xd8] sm:$0xff]   ;;  %v2336_v55 = vld [vmem:[#allocation2 + $0x149] sm:$0xff] }
 0x149   : > { %4740 = vmatprep.subr.bf16.mxu0 %v5407_v50  ;;  %v2338_v56 = vld [vmem:[#allocation2 + $0x169] sm:$0xff] }
 0x14a   : > { %4861 = vmatpush3.bf16.msra.mxu1 %v5403_v47  ;;  %v2333_v47 = vld [vmem:[#allocation2 + $0x111] sm:$0xff]  ;;  %v2342_v2 = vld [vmem:[#allocation2 + $0x1a9] sm:$0xff] }
 0x14b   : > { %4862 = vmatprep.subr.bf16.mxu1 %v5404_v52  ;;  %v2346_v29 = vld [vmem:[#allocation2 + $0x1e9] sm:$0xff] }
 0x14c   : > { %4741 = vmatpush3.bf16.msra.mxu0 %v5407_v50  ;;  %v6184_v50 = vpack.c.bf16 %v2333_v47, %v2332_v46 }
 0x14d   : > { %4831 = vmatmul.mubr.msk.bf16.gmra.mrb[20].mxu1 %vm429_vm0, %v5983_v6  ;;  %4742 = vmatprep.subr.bf16.mxu0 %v5408_v54 }
 0x14e   : > { %4834 = vmatprep.mubr.msk.bf16.mxu1 %vm429_vm0, %v5988_v61  ;;  %4863 = vmatpush3.bf16.msra.mxu1 %v5404_v52  ;;  %v2334_v52 = vld [vmem:[#allocation2 + $0x129] sm:$0xff] }
 0x14f   : > { %4711 = vmatmul.mubr.msk.bf16.gmra.mrb[36].mxu0 %vm429_vm0, %v5784_v36  ;;  %4864 = vmatprep.subr.bf16.mxu1 %v5405_v59  ;;  %v6192_v31 = vpack.c.bf16 %v2335_v53, %v2334_v52 }
 0x150   : > { %4714 = vmatprep.mubr.msk.bf16.mxu0 %vm429_vm0, %v5787_v40  ;;  %4743 = vmatpush3.bf16.msra.mxu0 %v5408_v54  ;;  %v2337_v54 = vld [vmem:[#allocation2 + $0x151] sm:$0xff] }
 0x151   : > { %4744 = vmatprep.subr.bf16.mxu0 %v5409_v51 }
 0x152   : > { %4865 = vmatpush3.bf16.msra.mxu1 %v5405_v59  ;;  %v2339_v59 = vld [vmem:[#allocation2 + $0x171] sm:$0xff] }
 0x153   : > { %4898 = vmatprep.subr.bf16.mxu1 %v5410_v62 }
 0x154   : > { %4745 = vmatpush3.bf16.msra.mxu0 %v5409_v51  ;;  %v2341_v51 = vld [vmem:[#allocation2 + $0x191] sm:$0xff] }
 0x155   : > { %4835 = vmatmul.mubr.msk.bf16.gmra.mrb[24].mxu1 %vm429_vm0, %v6004_v4  ;;  %4778 = vmatprep.subr.bf16.mxu0 %v5690_v25 }
 0x156   : > { %4838 = vmatprep.mubr.msk.bf16.mxu1 %vm429_vm0, %v6006_v11 }
 0x157   : > { %4715 = vmatmul.mubr.msk.bf16.gmra.mrb[40].mxu0 %vm429_vm0, %v5812_v60 }
 0x158   : > { %4718 = vmatprep.mubr.msk.bf16.mxu0 %vm429_vm0, %v5815_v0 }
 0x15d   : > { %4839 = vmatmul.mubr.msk.bf16.gmra.mrb[28].mxu1 %vm429_vm0, %v5830_v18 }
 0x15e   : > { %4842 = vmatprep.mubr.msk.bf16.mxu1 %vm429_vm0, %v5859_v58 }
 0x15f   : > { %4719 = vmatmul.mubr.msk.bf16.gmra.mrb[44].mxu0 %vm429_vm0, %v5835_v23 }
 0x160   : > { %4722 = vmatprep.mubr.msk.bf16.mxu0 %vm429_vm0, %v5840_v33 }
 0x165   : > { %4843 = vmatmul.mubr.msk.bf16.gmra.mrb[0].mxu1 %vm429_vm0, %v5862_v63 }
 0x166   : > { %4846 = vmatprep.mubr.msk.bf16.mxu1 %vm429_vm0, %v5893_v37 }
 0x167   : > { %4723 = vmatmul.mubr.msk.bf16.gmra.mrb[48].mxu0 %vm429_vm0, %v5857_v57 }
 0x168   : > { %4726 = vmatprep.mubr.msk.bf16.mxu0 %vm429_vm0, %v5872_v7 }
 0x16d   : > { %4847 = vmatmul.mubr.msk.bf16.gmra.mrb[4].mxu1 %vm429_vm0, %v5897_v42 }
 0x16e   : > { %4850 = vmatprep.mubr.msk.bf16.mxu1 %vm429_vm0, %v5926_v8 }
 0x16f   : > { %4727 = vmatmul.mubr.msk.bf16.gmra.mrb[52].mxu0 %vm429_vm0, %v5891_v35 }
 0x170   : > { %4730 = vmatprep.mubr.msk.bf16.mxu0 %vm429_vm0, %v5907_v48 }
 0x175   : > { %4851 = vmatmul.mubr.msk.bf16.gmra.mrb[8].mxu1 %vm429_vm0, %v5929_v12 }
 0x176   : > { %4854 = vmatprep.mubr.msk.bf16.mxu1 %vm429_vm0, %v5943_v24 }
 0x177   : > { %4731 = vmatmul.mubr.msk.bf16.gmra.mrb[56].mxu0 %vm429_vm0, %v5924_v5 }
 0x178   : > { %4734 = vmatprep.mubr.msk.bf16.mxu0 %vm429_vm0, %v5935_v13 }
 0x17d   : > { %4855 = vmatmul.mubr.msk.bf16.gmra.mrb[12].mxu1 %vm429_vm0, %v1582_v15 }
 0x17e   : > { %4866 = vmatprep.mubr.msk.bf16.mxu1 %vm429_vm0, %v5958_v45 }
 0x17f   : > { %4735 = vmatmul.mubr.msk.bf16.gmra.mrb[60].mxu0 %vm429_vm0, %v5941_v22 }
 0x180   : > { %4746 = vmatprep.mubr.msk.bf16.mxu0 %vm429_vm0, %v5760_v10  ;;  %v5413_v10 = vld [vmem:[%s6630_s3 + $0x58] sm:$0xff]  }
 0x185   : > { %4867 = vmatmul.mubr.msk.bf16.vlgmr.msra.gmra.mrb[16].mxu1 %vm429_vm0, %v5963_v49 }
 0x186   : > { %4899 = vmatpush3.bf16.msra.mxu1 %v5410_v62  ;;  %4870 = vmatprep.mubr.msk.bf16.mxu1 %vm429_vm0, %v5983_v6  ;;  %v6200_v62 = vpack.c.bf16 %v2339_v59, %v2338_v56 }
 0x187   : > { %4747 = vmatmul.mubr.msk.bf16.vlgmr.msra.gmra.mrb[32].mxu0 %vm429_vm0, %v5784_v36  ;;  %4900 = vmatprep.subr.bf16.mxu1 %v5411_v16  ;;  %v2317_v36 = vld [vmem:[#allocation2 + $0x11] sm:$0xff] }
 0x188   : > { %4750 = vmatprep.mubr.msk.bf16.mxu0 %vm429_vm0, %v5787_v40  ;;  %4779 = vmatpush3.bf16.msra.mxu0 %v5690_v25  ;;  %v5414_v25 = vld [vmem:[%s6630_s3 + $0xa0] sm:$0xff]  }
 0x189   : > { %4780 = vmatprep.subr.bf16.mxu0 %v5697_v26  ;;  %v843_v40 = vld [vmem:[#allocation2 + $0x227] sm:$0xff] }
 0x18a   : > { %4901 = vmatpush3.bf16.msra.mxu1 %v5411_v16 }
 0x18b   : > { %4902 = vmatprep.subr.bf16.mxu1 %v5412_v17 }
 0x18c   : > { %4781 = vmatpush3.bf16.msra.mxu0 %v5697_v26  ;;  %v1564_v26 = vld [vmem:[#allocation2 + $0x228] sm:$0xff] }
 0x18d   : > { %4871 = vmatmul.mubr.msk.bf16.gmra.mrb[20].mxu1 %vm429_vm0, %v5988_v61  ;;  %4782 = vmatprep.subr.bf16.mxu0 %v5704_v27 }
 0x18e   : > { %4874 = vmatprep.mubr.msk.bf16.mxu1 %vm429_vm0, %v6004_v4  ;;  %4903 = vmatpush3.bf16.msra.mxu1 %v5412_v17  ;;  %v5419_v17 = vld [vmem:[%s6630_s3 + $0x108] sm:$0xff]  }
 0x18f   : > { %4751 = vmatmul.mubr.msk.bf16.gmra.mrb[36].mxu0 %vm429_vm0, %v5812_v60  ;;  %4904 = vmatprep.subr.bf16.mxu1 %v5413_v10  ;;  %v844_v60 = vld [vmem:[#allocation2 + $0x22f] sm:$0xff] }
 0x190   : > { %4754 = vmatprep.mubr.msk.bf16.mxu0 %vm429_vm0, %v5815_v0  ;;  %4783 = vmatpush3.bf16.msra.mxu0 %v5704_v27  ;;  %v1565_v27 = vld [vmem:[#allocation2 + $0x230] sm:$0xff] }
 0x191   : > { %4784 = vmatprep.subr.bf16.mxu0 %v5711_v28  ;;  %v1583_v0 = vpack.c.bf16 %v1565_v27, %v1564_v26  ;;  %v5422_v26 = vld [vmem:[%s6632_s5] sm:$0xff]   ;;  %v5423_v27 = vld [vmem:[%s6632_s5 + $0x8] sm:$0xff]  }
 0x192   : > { %4905 = vmatpush3.bf16.msra.mxu1 %v5413_v10  ;;  %v5420_v10 = vld [vmem:[%s6630_s3 + $0x110] sm:$0xff]  }
 0x193   : > { %4938 = vmatprep.subr.bf16.mxu1 %v5414_v25 }
 0x194   : > { %4785 = vmatpush3.bf16.msra.mxu0 %v5711_v28  ;;  %v2316_v28 = vld [vmem:[#allocation2 + $0x9] sm:$0xff] }
 0x195   : > { %4875 = vmatmul.mubr.msk.bf16.gmra.mrb[24].mxu1 %vm429_vm0, %v6006_v11  ;;  %5018 = vmatprep.subr.bf16.mxu0 %v5422_v26 }
 0x196   : > { %4878 = vmatprep.mubr.msk.bf16.mxu1 %vm429_vm0, %v5830_v18  ;;  %v1530_v18 = vld [vmem:[#allocation2 + $0x8] sm:$0xff] }
 0x197   : > { %4755 = vmatmul.mubr.msk.bf16.gmra.mrb[40].mxu0 %vm429_vm0, %v5835_v23  ;;  %v1531_v23 = vld [vmem:[#allocation2 + $0x10] sm:$0xff] }
 0x198   : > { %4758 = vmatprep.mubr.msk.bf16.mxu0 %vm429_vm0, %v5840_v33  ;;  %v2352_v33 = vpack.c.bf16 %v2317_v36, %v2316_v28  ;;  %v2348_v28 = vld [vmem:[#allocation2 + $0x209] sm:$0xff]  ;;  %v2349_v36 = vld [vmem:[#allocation2 + $0x211] sm:$0xff] }
 0x19d   : > { %4879 = vmatmul.mubr.msk.bf16.gmra.mrb[28].mxu1 %vm429_vm0, %v5859_v58  ;;  %v1566_v58 = vpack.c.bf16 %v1531_v23, %v1530_v18  ;;  %v2351_v18 = vld [vmem:[#allocation2 + $0x231] sm:$0xff] }
 0x19e   : > { %4882 = vmatprep.mubr.msk.bf16.mxu1 %vm429_vm0, %v5862_v63  ;;  %v2318_v63 = vld [vmem:[#allocation2 + $0x29] sm:$0xff] }
 0x19f   : > { %4759 = vmatmul.mubr.msk.bf16.gmra.mrb[44].mxu0 %vm429_vm0, %v5857_v57  ;;  %v862_v57 = vpack.c.bf16 %v844_v60, %v843_v40  ;;  %v5424_v40 = vld [vmem:[%s6632_s5 + $0x10] sm:$0xff]   ;;  %v2368_v60 = vpack.c.bf16 %v2349_v36, %v2348_v28 }
 0x1a0   : > { %4762 = vmatprep.mubr.msk.bf16.mxu0 %vm429_vm0, %v5872_v7  ;;  %v2319_v7 = vld [vmem:[#allocation2 + $0x31] sm:$0xff] }
 0x1a5   : > { %4883 = vmatmul.mubr.msk.bf16.gmra.mrb[0].mxu1 %vm429_vm0, %v5893_v37  ;;  %v2321_v37 = vld [vmem:[#allocation2 + $0x51] sm:$0xff] }
 0x1a6   : > { %4886 = vmatprep.mubr.msk.bf16.mxu1 %vm429_vm0, %v5897_v42  ;;  %v6134_v42 = vpack.c.bf16 %v2319_v7, %v2318_v63 }
 0x1a7   : > { %4763 = vmatmul.mubr.msk.bf16.gmra.mrb[48].mxu0 %vm429_vm0, %v5891_v35  ;;  %v2320_v35 = vld [vmem:[#allocation2 + $0x49] sm:$0xff] }
 0x1a8   : > { %4766 = vmatprep.mubr.msk.bf16.mxu0 %vm429_vm0, %v5907_v48  ;;  %v5415_v48 = vld [vmem:[%s6630_s3 + $0xa8] sm:$0xff]  }
 0x1ad   : > { %4887 = vmatmul.mubr.msk.bf16.gmra.mrb[4].mxu1 %vm429_vm0, %v5926_v8  ;;  %v5416_v8 = vld [vmem:[%s6630_s3 + $0xb0] sm:$0xff]  }
 0x1ae   : > { %4890 = vmatprep.mubr.msk.bf16.mxu1 %vm429_vm0, %v5929_v12  ;;  %v2322_v12 = vld [vmem:[#allocation2 + $0x69] sm:$0xff] }
 0x1af   : > { %4767 = vmatmul.mubr.msk.bf16.gmra.mrb[52].mxu0 %vm429_vm0, %v5924_v5  ;;  %v6139_v5 = vpack.c.bf16 %v2321_v37, %v2320_v35 }
 0x1b0   : > { %4770 = vmatprep.mubr.msk.bf16.mxu0 %vm429_vm0, %v5935_v13  ;;  %v2323_v13 = vld [vmem:[#allocation2 + $0x71] sm:$0xff] }
 0x1b1   : > { %v6152_v21 = vpack.c.bf16 %v2323_v13, %v2322_v12 }
 0x1b5   : > { %4891 = vmatmul.mubr.msk.bf16.gmra.mrb[8].mxu1 %vm429_vm0, %v5943_v24  ;;  %v6157_v24 = vpack.c.bf16 %v2325_v20, %v2324_v19 }
 0x1b6   : > { %4894 = vmatprep.mubr.msk.bf16.mxu1 %vm429_vm0, %v1582_v15  ;;  %v2347_v15 = vld [vmem:[#allocation2 + $0x1f1] sm:$0xff] }
 0x1b7   : > { %4771 = vmatmul.mubr.msk.bf16.gmra.mrb[56].mxu0 %vm429_vm0, %v5941_v22  ;;  %v5417_v22 = vld [vmem:[%s6630_s3 + $0xb8] sm:$0xff]   ;;  %v2367_v16 = vpack.c.bf16 %v2347_v15, %v2346_v29 }
 0x1b8   : > { %4774 = vmatprep.mubr.msk.bf16.mxu0 %vm429_vm0, %v5951_v39  ;;  %v2329_v39 = vld [vmem:[#allocation2 + $0xd1] sm:$0xff] }
 0x1b9   : > { %v6172_v43 = vpack.c.bf16 %v2329_v39, %v2328_v38  ;;  %v5425_v38 = vld [vmem:[%s6632_s5 + $0x18] sm:$0xff]  }
 0x1bd   : > { %4895 = vmatmul.mubr.msk.bf16.gmra.mrb[12].mxu1 %vm429_vm0, %v1583_v0  ;;  %v2350_v0 = vld [vmem:[#allocation2 + $0x229] sm:$0xff] }
 0x1be   : > { %4906 = vmatprep.mubr.msk.bf16.mxu1 %vm429_vm0, %v2352_v33  ;;  %v2369_v23 = vpack.c.bf16 %v2351_v18, %v2350_v0 }
 0x1bf   : > { %4775 = vmatmul.mubr.msk.bf16.gmra.mrb[60].mxu0 %vm429_vm0, %v862_v57 }
 0x1c0   : > { %4786 = vmatprep.mubr.msk.bf16.mxu0 %vm429_vm0, %v1566_v58 }
 0x1c5   : > { %4907 = vmatmul.mubr.msk.bf16.vlgmr.msra.gmra.mrb[16].mxu1 %vm429_vm0, %v6134_v42 }
 0x1c6   : > { %4939 = vmatpush3.bf16.msra.mxu1 %v5414_v25  ;;  %4910 = vmatprep.mubr.msk.bf16.mxu1 %vm429_vm0, %v6139_v5  ;;  %v5421_v25 = vld [vmem:[%s6630_s3 + $0x118] sm:$0xff]  }
 0x1c7   : > { %4787 = vmatmul.mubr.msk.bf16.vlgmr.msra.gmra.mrb[32].mxu0 %vm429_vm0, %v5945_v34  ;;  %4940 = vmatprep.subr.bf16.mxu1 %v5415_v48  ;;  %v2327_v34 = vld [vmem:[#allocation2 + $0xb1] sm:$0xff] }
 0x1c8   : > { %4790 = vmatprep.mubr.msk.bf16.mxu0 %vm429_vm0, %v5958_v45  ;;  %v6170_v41 = vpack.c.bf16 %v2327_v34, %v2326_v30  ;;  %v2331_v45 = vld [vmem:[#allocation2 + $0xf1] sm:$0xff]  ;;  %5019 = vmatpush3.bf16.msra.mxu0 %v5422_v26 }
 0x1c9   : > { %5020 = vmatprep.subr.bf16.mxu0 %v5423_v27 }
 0x1ca   : > { %4941 = vmatpush3.bf16.msra.mxu1 %v5415_v48 }
 0x1cb   : > { %4942 = vmatprep.subr.bf16.mxu1 %v5416_v8 }
 0x1cc   : > { %5021 = vmatpush3.bf16.msra.mxu0 %v5423_v27 }
 0x1cd   : > { %4911 = vmatmul.mubr.msk.bf16.gmra.mrb[20].mxu1 %vm429_vm0, %v6152_v21  ;;  %5022 = vmatprep.subr.bf16.mxu0 %v5424_v40 }
 0x1ce   : > { %4914 = vmatprep.mubr.msk.bf16.mxu1 %vm429_vm0, %v6157_v24  ;;  %4943 = vmatpush3.bf16.msra.mxu1 %v5416_v8 }
 0x1cf   : > { %4791 = vmatmul.mubr.msk.bf16.gmra.mrb[36].mxu0 %vm429_vm0, %v5963_v49  ;;  %4944 = vmatprep.subr.bf16.mxu1 %v5417_v22  ;;  %v6182_v49 = vpack.c.bf16 %v2331_v45, %v2330_v44 }
 0x1d0   : > { %4794 = vmatprep.mubr.msk.bf16.mxu0 %vm429_vm0, %v5983_v6  ;;  %v6194_v6 = vpack.c.bf16 %v2337_v54, %v2336_v55  ;;  %5023 = vmatpush3.bf16.msra.mxu0 %v5424_v40  ;;  %v6336_v54 = vld [vmem:[%s6631_s4] ss:$0 sm:$0xff] }
 0x1d1   : > { %5024 = vmatprep.subr.bf16.mxu0 %v5425_v38 }
 0x1d2   : > { %4945 = vmatpush3.bf16.msra.mxu1 %v5417_v22 }
 0x1d3   : > { %4978 = vmatprep.subr.bf16.mxu1 %v5418_v32 }
 0x1d4   : > { %5025 = vmatpush3.bf16.msra.mxu0 %v5425_v38 }
 0x1d5   : > { %4915 = vmatmul.mubr.msk.bf16.gmra.mrb[24].mxu1 %vm429_vm0, %v6170_v41 }
 0x1d6   : > { %4918 = vmatprep.mubr.msk.bf16.mxu1 %vm429_vm0, %v6172_v43 }
 0x1d7   : > { %4795 = vmatmul.mubr.msk.bf16.gmra.mrb[40].mxu0 %vm429_vm0, %v5988_v61  ;;  %v2340_v61 = vld [vmem:[#allocation2 + $0x189] sm:$0xff] }
 0x1d8   : > { %4798 = vmatprep.mubr.msk.bf16.mxu0 %vm429_vm0, %v6004_v4  ;;  %v6202_v1 = vpack.c.bf16 %v2341_v51, %v2340_v61  ;;  %v2344_v4 = vld [vmem:[#allocation2 + $0x1c9] sm:$0xff] }
 0x1d9   : > { %v2366_v14 = vpack.c.bf16 %v2345_v9, %v2344_v4 }
 0x1dd   : > { %4919 = vmatmul.mubr.msk.bf16.gmra.mrb[28].mxu1 %vm429_vm0, %v6182_v49 }
 0x1de   : > { %4922 = vmatprep.mubr.msk.bf16.mxu1 %vm429_vm0, %v6184_v50 }
 0x1df   : > { %4799 = vmatmul.mubr.msk.bf16.gmra.mrb[44].mxu0 %vm429_vm0, %v6006_v11  ;;  %v2365_v11 = vpack.c.bf16 %v2343_v3, %v2342_v2 }
 0x1e5   : > { %4923 = vmatmul.mubr.msk.bf16.gmra.mrb[0].mxu1 %vm429_vm0, %v6192_v31 }
 0x1e6   : > { %4926 = vmatprep.mubr.msk.bf16.mxu1 %vm429_vm0, %v6194_v6 }
 0x1ed   : > { %4927 = vmatmul.mubr.msk.bf16.gmra.mrb[4].mxu1 %vm429_vm0, %v6200_v62 }
 0x1ee   : > { %4930 = vmatprep.mubr.msk.bf16.mxu1 %vm429_vm0, %v6202_v1 }
 0x1f5   : > { %4931 = vmatmul.mubr.msk.bf16.gmra.mrb[8].mxu1 %vm429_vm0, %v2365_v11 }
 0x1f6   : > { %4934 = vmatprep.mubr.msk.bf16.mxu1 %vm429_vm0, %v2366_v14 }
 0x1fd   : > { %4935 = vmatmul.mubr.msk.bf16.gmra.mrb[12].mxu1 %vm429_vm0, %v2367_v16 }
 0x1fe   : > { %4946 = vmatprep.mubr.msk.bf16.mxu1 %vm429_vm0, %v6134_v42 }
 0x205   : > { %4947 = vmatmul.mubr.msk.bf16.vlgmr.msra.gmra.mrb[16].mxu1 %vm429_vm0, %v6139_v5 }
 0x206   : > { %4979 = vmatpush3.bf16.msra.mxu1 %v5418_v32  ;;  %4950 = vmatprep.mubr.msk.bf16.mxu1 %vm429_vm0, %v6152_v21 }
 0x207   : > { %4980 = vmatprep.subr.bf16.mxu1 %v5419_v17 }
 0x20a   : > { %4981 = vmatpush3.bf16.msra.mxu1 %v5419_v17 }
 0x20b   : > { %4982 = vmatprep.subr.bf16.mxu1 %v5420_v10 }
 0x20d   : > { %4951 = vmatmul.mubr.msk.bf16.gmra.mrb[20].mxu1 %vm429_vm0, %v6157_v24 }
 0x20e   : > { %4954 = vmatprep.mubr.msk.bf16.mxu1 %vm429_vm0, %v6170_v41  ;;  %4983 = vmatpush3.bf16.msra.mxu1 %v5420_v10 }
 0x20f   : > { %4984 = vmatprep.subr.bf16.mxu1 %v5421_v25 }
 0x212   : > { %4985 = vmatpush3.bf16.msra.mxu1 %v5421_v25 }
 0x215   : > { %4955 = vmatmul.mubr.msk.bf16.gmra.mrb[24].mxu1 %vm429_vm0, %v6172_v43 }
 0x216   : > { %4958 = vmatprep.mubr.msk.bf16.mxu1 %vm429_vm0, %v6182_v49 }
 0x21d   : > { %4959 = vmatmul.mubr.msk.bf16.gmra.mrb[28].mxu1 %vm429_vm0, %v6184_v50 }
 0x21e   : > { %4962 = vmatprep.mubr.msk.bf16.mxu1 %vm429_vm0, %v6192_v31 }
 0x225   : > { %4963 = vmatmul.mubr.msk.bf16.gmra.mrb[0].mxu1 %vm429_vm0, %v6194_v6 }
 0x226   : > { %4966 = vmatprep.mubr.msk.bf16.mxu1 %vm429_vm0, %v6200_v62 }
 0x22d   : > { %4967 = vmatmul.mubr.msk.bf16.gmra.mrb[4].mxu1 %vm429_vm0, %v6202_v1 }
 0x22e   : > { %4970 = vmatprep.mubr.msk.bf16.mxu1 %vm429_vm0, %v2365_v11 }
 0x235   : > { %4971 = vmatmul.mubr.msk.bf16.gmra.mrb[8].mxu1 %vm429_vm0, %v2366_v14 }
 0x236   : > { %4974 = vmatprep.mubr.msk.bf16.mxu1 %vm429_vm0, %v2367_v16 }
 0x23d   : > { %4975 = vmatmul.mubr.msk.bf16.gmra.mrb[12].mxu1 %vm429_vm0, %v2368_v60 }
 0x23e   : > { %4986 = vmatprep.mubr.msk.bf16.mxu1 %vm429_vm0, %v6139_v5 }
 0x245   : > { %4987 = vmatmul.mubr.msk.bf16.vlgmr.msra.gmra.mrb[16].mxu1 %vm429_vm0, %v6152_v21 }
 0x246   : > { %4990 = vmatprep.mubr.msk.bf16.mxu1 %vm429_vm0, %v6157_v24 }
 0x24d   : > { %4991 = vmatmul.mubr.msk.bf16.gmra.mrb[20].mxu1 %vm429_vm0, %v6170_v41 }
 0x24e   : > { %4994 = vmatprep.mubr.msk.bf16.mxu1 %vm429_vm0, %v6172_v43 }
 0x255   : > { %4995 = vmatmul.mubr.msk.bf16.gmra.mrb[24].mxu1 %vm429_vm0, %v6182_v49 }
 0x256   : > { %4998 = vmatprep.mubr.msk.bf16.mxu1 %vm429_vm0, %v6184_v50 }
 0x25d   : > { %4999 = vmatmul.mubr.msk.bf16.gmra.mrb[28].mxu1 %vm429_vm0, %v6192_v31 }
 0x25e   : > { %5002 = vmatprep.mubr.msk.bf16.mxu1 %vm429_vm0, %v6194_v6 }
 0x265   : > { %5003 = vmatmul.mubr.msk.bf16.gmra.mrb[0].mxu1 %vm429_vm0, %v6200_v62 }
 0x266   : > { %5006 = vmatprep.mubr.msk.bf16.mxu1 %vm429_vm0, %v6202_v1 }
 0x26d   : > { %5007 = vmatmul.mubr.msk.bf16.gmra.mrb[4].mxu1 %vm429_vm0, %v2365_v11 }
 0x26e   : > { %5010 = vmatprep.mubr.msk.bf16.mxu1 %vm429_vm0, %v2366_v14 }
 0x275   : > { %5011 = vmatmul.mubr.msk.bf16.gmra.mrb[8].mxu1 %vm429_vm0, %v2367_v16 }
 0x276   : > { %5014 = vmatprep.mubr.msk.bf16.mxu1 %vm429_vm0, %v2368_v60 }
 0x27a   : > { %v6283_v33 = vpop.f32.mrb[48].mxu0 }
 0x27b   : > { %v6285_v57 = vpop.f32.mrb[49].mxu0 }
 0x27c   : > { %v6287_v58 = vpop.f32.mrb[50].mxu0 }
 0x27d   : > { %v6289_v63 = vpop.f32.mrb[51].mxu0  ;;  %5015 = vmatmul.mubr.msk.bf16.gmra.mrb[12].mxu1 %vm429_vm0, %v2369_v23 }
 0x282   : > { %v6292_v7 = vpop.f32.mrb[52].mxu0 }
 0x283   : > { %v6294_v35 = vpop.f32.mrb[53].mxu0 }
 0x284   : > { %v6296_v37 = vpop.f32.mrb[54].mxu0 }
 0x285   : > { %v6298_v42 = vpop.f32.mrb[55].mxu0 }
 0x28a   : > { %v6300_v48 = vpop.f32.mrb[56].mxu0 }
 0x28b   : > { %v6302_v5 = vpop.f32.mrb[57].mxu0 }
 0x28c   : > { %v6304_v8 = vpop.f32.mrb[58].mxu0 }
 0x28d   : > { %v6306_v12 = vpop.f32.mrb[59].mxu0 }
 0x292   : > { %v6308_v13 = vpop.f32.mrb[60].mxu0 }
 0x293   : > { %v6310_v19 = vpop.f32.mrb[61].mxu0 }
 0x294   : > { %v6312_v20 = vpop.f32.mrb[62].mxu0 }
 0x295   : > { %v6314_v21 = vpop.f32.mrb[63].mxu0 }
 0x29a   : > { %v4788_v22 = vpop.f32.mrb[32].mxu0 }
 0x29b   : > { %v1699_v24 = vpop.f32.mrb[33].mxu0 }
 0x29c   : > { %v4789_v32 = vpop.f32.mrb[34].mxu0 }
 0x29d   : > { %v1702_v30 = vpop.f32.mrb[35].mxu0 }
 0x2a2   : > { %v4792_v34 = vpop.f32.mrb[36].mxu0 }
 0x2a3   : > { %v1715_v39 = vpop.f32.mrb[37].mxu0 }
 0x2a4   : > { %v4793_v41 = vpop.f32.mrb[38].mxu0 }
 0x2a5   : > { %v1718_v43 = vpop.f32.mrb[39].mxu0 }
 0x2aa   : > { %v4796_v44 = vpop.f32.mrb[40].mxu0 }
 0x2ab   : > { %v6319_v45 = vpop.f32.mrb[41].mxu0 }
 0x2ac   : > { %v6321_v46 = vpop.f32.mrb[42].mxu0 }
 0x2ad   : > { %v6323_v47 = vpop.f32.mrb[43].mxu0 }
 0x2b2   : > { %v6325_v49 = vpop.f32.mrb[44].mxu0 }
 0x2b3   : > { %v6327_v50 = vpop.f32.mrb[45].mxu0 }
 0x2b4   : > { %v6329_v52 = vpop.f32.mrb[46].mxu0 }
 0x2b5   : > { %v6331_v53 = vpop.f32.mrb[47].mxu0 }
 0x318   : > { %v4988_v55 = vpop.f32.mrb[16].mxu1 }
 0x319   : > { %v5066_v31 = vadd.f32 %v4988_v55, %v4788_v22  ;;  %v2943_v6 = vpop.f32.mrb[17].mxu1 }
 0x31a   : > { %v5067_v56 = vadd.f32 %v2943_v6, %v1699_v24  ;;  %v4989_v59 = vpop.f32.mrb[18].mxu1 }
 0x31b   : > { %v3111_v61 = vadd.f32 %v5066_v31, %v6336_v54  ;;  %v5068_v51 = vadd.f32 %v4989_v59, %v4789_v32  ;;  %v2946_v62 = vpop.f32.mrb[19].mxu1 }
 0x31c   : > { %v3109_v1 = vadd.f32 %v5067_v56, %v6336_v54  ;;  %v5069_v2 = vadd.f32 %v2946_v62, %v1702_v30 }
 0x31d   : > { %v3175_v3 = vmul.f32 0.2, %v3111_v61  ;;  %v3112_v4 = vadd.f32 %v5068_v51, %v6336_v54  ;;  %vm3143_vm3 = vcmp.gt.f32.partialorder %v3111_v61, 0.0 }
 0x31e   : > { %v3173_v9 = vmul.f32 0.2, %v3109_v1  ;;  %v3110_v11 = vadd.f32 %v5069_v2, %v6336_v54  ;;  %vm3141_vm4 = vcmp.gt.f32.partialorder %v3109_v1, 0.0 }
 0x31f   : > { %vm3144_vm5 = vcmp.gt.f32.partialorder %v3112_v4, 0.0  ;;  %v3176_v14 = vmul.f32 0.2, %v3112_v4  ;;  %v3207_v16 = vsel %vm3143_vm3, %v3111_v61, %v3175_v3 }
 0x320   : > { %vm3142_vm6 = vcmp.gt.f32.partialorder %v3110_v11, 0.0  ;;  %v3174_v29 = vmul.f32 0.2, %v3110_v11  ;;  %v4992_v15 = vpop.f32.mrb[20].mxu1  ;;  %v3205_v26 = vsel %vm3141_vm4, %v3109_v1, %v3173_v9 }
 0x321   : > { %v3208_v17 = vsel %vm3144_vm5, %v3112_v4, %v3176_v14  ;;  %v5070_v10 = vadd.f32 %v4992_v15, %v4792_v34  ;;  %v2959_v25 = vpop.f32.mrb[21].mxu1 }
 0x322   : > { %v3238_v27 = vpack.c.bf16 %v3208_v17, %v3207_v16  ;;  %v3206_v28 = vsel %vm3142_vm6, %v3110_v11, %v3174_v29  ;;  %v5071_v36 = vadd.f32 %v2959_v25, %v1715_v39  ;;  %v4993_v40 = vpop.f32.mrb[22].mxu1 }
 0x323   : > { %v3115_v60 = vadd.f32 %v5070_v10, %v6336_v54  ;;  %v5072_v0 = vadd.f32 %v4993_v40, %v4793_v41  ;;  %v2962_v18 = vpop.f32.mrb[23].mxu1  ;;  %v3237_v23 = vpack.c.bf16 %v3206_v28, %v3205_v26 }
 0x324   : > { %v3113_v22 = vadd.f32 %v5071_v36, %v6336_v54  ;;  %v5073_v24 = vadd.f32 %v2962_v18, %v1718_v43 }
 0x325   : > { %v3179_v32 = vmul.f32 0.2, %v3115_v60  ;;  %v3116_v30 = vadd.f32 %v5072_v0, %v6336_v54  ;;  %5026 = vmatprep.mubr.msk.bf16.mxu0 %vm429_vm0, %v3237_v23  ;;  %vm3147_vm7 = vcmp.gt.f32.partialorder %v3115_v60, 0.0 }
 0x326   : > { %v3177_v34 = vmul.f32 0.2, %v3113_v22  ;;  %v3114_v38 = vadd.f32 %v5073_v24, %v6336_v54  ;;  %5027 = vmatmul.mubr.msk.bf16.vlgmr.msra.gmra.mrb[64].mxu0 %vm429_vm0, %v3238_v27  ;;  %vm3145_vm8 = vcmp.gt.f32.partialorder %v3113_v22, 0.0 }
 0x327   : > { %vm3148_vm9 = vcmp.gt.f32.partialorder %v3116_v30, 0.0  ;;  %v3180_v39 = vmul.f32 0.2, %v3116_v30  ;;  %v3211_v31 = vsel %vm3147_vm7, %v3115_v60, %v3179_v32 }
 0x328   : > { %vm3146_vm10 = vcmp.gt.f32.partialorder %v3114_v38, 0.0  ;;  %v3178_v41 = vmul.f32 0.2, %v3114_v38  ;;  %v4996_v55 = vpop.f32.mrb[24].mxu1  ;;  %v3209_v59 = vsel %vm3145_vm8, %v3113_v22, %v3177_v34 }
 0x329   : > { %v3212_v6 = vsel %vm3148_vm9, %v3116_v30, %v3180_v39  ;;  %v5074_v43 = vadd.f32 %v4996_v55, %v4796_v44  ;;  %v2975_v56 = vpop.f32.mrb[25].mxu1 }
 0x32a   : > { %v3210_v61 = vsel %vm3146_vm10, %v3114_v38, %v3178_v41  ;;  %v5075_v51 = vadd.f32 %v2975_v56, %v6319_v45  ;;  %v4997_v62 = vpop.f32.mrb[26].mxu1  ;;  %v3240_v1 = vpack.c.bf16 %v3212_v6, %v3211_v31 }
 0x32b   : > { %v3119_v2 = vadd.f32 %v5074_v43, %v6336_v54  ;;  %v5076_v3 = vadd.f32 %v4997_v62, %v6321_v46  ;;  %v2978_v4 = vpop.f32.mrb[27].mxu1  ;;  %v3239_v9 = vpack.c.bf16 %v3210_v61, %v3209_v59 }
 0x32c   : > { %v3117_v11 = vadd.f32 %v5075_v51, %v6336_v54  ;;  %v5077_v14 = vadd.f32 %v2978_v4, %v6323_v47 }
 0x32d   : > { %v3183_v29 = vmul.f32 0.2, %v3119_v2  ;;  %v3120_v44 = vadd.f32 %v5076_v3, %v6336_v54  ;;  %5030 = vmatprep.mubr.msk.bf16.mxu0 %vm429_vm0, %v3239_v9  ;;  %vm3151_vm11 = vcmp.gt.f32.partialorder %v3119_v2, 0.0 }
 0x32e   : > { %v3181_v15 = vmul.f32 0.2, %v3117_v11  ;;  %v3118_v45 = vadd.f32 %v5077_v14, %v6336_v54  ;;  %5031 = vmatmul.mubr.msk.bf16.gmra.mrb[68].mxu0 %vm429_vm0, %v3240_v1  ;;  %vm3149_vm12 = vcmp.gt.f32.partialorder %v3117_v11, 0.0 }
 0x32f   : > { %vm3152_vm13 = vcmp.gt.f32.partialorder %v3120_v44, 0.0  ;;  %v3184_v46 = vmul.f32 0.2, %v3120_v44  ;;  %v3215_v10 = vsel %vm3151_vm11, %v3119_v2, %v3183_v29 }
 0x330   : > { %vm3150_vm14 = vcmp.gt.f32.partialorder %v3118_v45, 0.0  ;;  %v3182_v16 = vmul.f32 0.2, %v3118_v45  ;;  %v5000_v17 = vpop.f32.mrb[28].mxu1  ;;  %v3213_v27 = vsel %vm3149_vm12, %v3117_v11, %v3181_v15 }
 0x331   : > { %v3216_v25 = vsel %vm3152_vm13, %v3120_v44, %v3184_v46  ;;  %v5078_v47 = vadd.f32 %v5000_v17, %v6325_v49  ;;  %v2991_v26 = vpop.f32.mrb[29].mxu1 }
 0x332   : > { %v3214_v28 = vsel %vm3150_vm14, %v3118_v45, %v3182_v16  ;;  %v5079_v36 = vadd.f32 %v2991_v26, %v6327_v50  ;;  %v5001_v40 = vpop.f32.mrb[30].mxu1  ;;  %v3242_v60 = vpack.c.bf16 %v3216_v25, %v3215_v10 }
 0x333   : > { %v3123_v0 = vadd.f32 %v5078_v47, %v6336_v54  ;;  %v5080_v18 = vadd.f32 %v5001_v40, %v6329_v52  ;;  %v2994_v23 = vpop.f32.mrb[31].mxu1  ;;  %v3241_v22 = vpack.c.bf16 %v3214_v28, %v3213_v27 }
 0x334   : > { %v3121_v24 = vadd.f32 %v5079_v36, %v6336_v54  ;;  %v5081_v32 = vadd.f32 %v2994_v23, %v6331_v53 }
 0x335   : > { %v3187_v30 = vmul.f32 0.2, %v3123_v0  ;;  %v3124_v49 = vadd.f32 %v5080_v18, %v6336_v54  ;;  %5034 = vmatprep.mubr.msk.bf16.mxu0 %vm429_vm0, %v3241_v22  ;;  %vm3155_vm15 = vcmp.gt.f32.partialorder %v3123_v0, 0.0 }
 0x336   : > { %v3185_v34 = vmul.f32 0.2, %v3121_v24  ;;  %v3122_v50 = vadd.f32 %v5081_v32, %v6336_v54  ;;  %5035 = vmatmul.mubr.msk.bf16.gmra.mrb[72].mxu0 %vm429_vm0, %v3242_v60  ;;  %vm3153_vm1 = vcmp.gt.f32.partialorder %v3121_v24, 0.0 }
 0x337   : > { %vm3156_vm2 = vcmp.gt.f32.partialorder %v3124_v49, 0.0  ;;  %v3188_v52 = vmul.f32 0.2, %v3124_v49  ;;  %v3219_v41 = vsel %vm3155_vm15, %v3123_v0, %v3187_v30 }
 0x338   : > { %vm3154_vm3 = vcmp.gt.f32.partialorder %v3122_v50, 0.0  ;;  %v3186_v38 = vmul.f32 0.2, %v3122_v50  ;;  %v5004_v39 = vpop.f32.mrb[0].mxu1  ;;  %v3217_v6 = vsel %vm3153_vm1, %v3121_v24, %v3185_v34 }
 0x339   : > { %v3220_v55 = vsel %vm3156_vm2, %v3124_v49, %v3188_v52  ;;  %v5082_v53 = vadd.f32 %v5004_v39, %v6283_v33  ;;  %v3007_v31 = vpop.f32.mrb[1].mxu1 }
 0x33a   : > { %v3218_v43 = vsel %vm3154_vm3, %v3122_v50, %v3186_v38  ;;  %v5083_v56 = vadd.f32 %v3007_v31, %v6285_v57  ;;  %v5005_v59 = vpop.f32.mrb[2].mxu1  ;;  %v3244_v61 = vpack.c.bf16 %v3220_v55, %v3219_v41 }
 0x33b   : > { %v3127_v51 = vadd.f32 %v5082_v53, %v6336_v54  ;;  %v5084_v62 = vadd.f32 %v5005_v59, %v6287_v58  ;;  %v3010_v1 = vpop.f32.mrb[3].mxu1  ;;  %v3243_v2 = vpack.c.bf16 %v3218_v43, %v3217_v6 }
 0x33c   : > { %v3125_v3 = vadd.f32 %v5083_v56, %v6336_v54  ;;  %v5085_v4 = vadd.f32 %v3010_v1, %v6289_v63 }
 0x33d   : > { %v3191_v9 = vmul.f32 0.2, %v3127_v51  ;;  %v3128_v33 = vadd.f32 %v5084_v62, %v6336_v54  ;;  %5038 = vmatprep.mubr.msk.bf16.mxu0 %vm429_vm0, %v3243_v2  ;;  %vm3159_vm4 = vcmp.gt.f32.partialorder %v3127_v51, 0.0 }
 0x33e   : > { %v3189_v11 = vmul.f32 0.2, %v3125_v3  ;;  %v3126_v57 = vadd.f32 %v5085_v4, %v6336_v54  ;;  %5039 = vmatmul.mubr.msk.bf16.gmra.mrb[76].mxu0 %vm429_vm0, %v3244_v61  ;;  %vm3157_vm5 = vcmp.gt.f32.partialorder %v3125_v3, 0.0 }
 0x33f   : > { %vm3160_vm6 = vcmp.gt.f32.partialorder %v3128_v33, 0.0  ;;  %v3192_v58 = vmul.f32 0.2, %v3128_v33  ;;  %v3223_v44 = vsel %vm3159_vm4, %v3127_v51, %v3191_v9 }
 0x340   : > { %vm3158_vm7 = vcmp.gt.f32.partialorder %v3126_v57, 0.0  ;;  %v3190_v14 = vmul.f32 0.2, %v3126_v57  ;;  %v5008_v29 = vpop.f32.mrb[4].mxu1  ;;  %v3221_v46 = vsel %vm3157_vm5, %v3125_v3, %v3189_v11 }
 0x341   : > { %v3224_v15 = vsel %vm3160_vm6, %v3128_v33, %v3192_v58  ;;  %v5086_v63 = vadd.f32 %v5008_v29, %v6292_v7  ;;  %v3023_v45 = vpop.f32.mrb[5].mxu1 }
 0x342   : > { %v3222_v16 = vsel %vm3158_vm7, %v3126_v57, %v3190_v14  ;;  %v5087_v17 = vadd.f32 %v3023_v45, %v6294_v35  ;;  %v5009_v10 = vpop.f32.mrb[6].mxu1  ;;  %v3246_v25 = vpack.c.bf16 %v3224_v15, %v3223_v44 }
 0x343   : > { %v3131_v47 = vadd.f32 %v5086_v63, %v6336_v54  ;;  %v5088_v26 = vadd.f32 %v5009_v10, %v6296_v37  ;;  %v3026_v27 = vpop.f32.mrb[7].mxu1  ;;  %v3245_v28 = vpack.c.bf16 %v3222_v16, %v3221_v46 }
 0x344   : > { %v3129_v36 = vadd.f32 %v5087_v17, %v6336_v54  ;;  %v5089_v40 = vadd.f32 %v3026_v27, %v6298_v42 }
 0x345   : > { %v3195_v60 = vmul.f32 0.2, %v3131_v47  ;;  %v3132_v7 = vadd.f32 %v5088_v26, %v6336_v54  ;;  %5042 = vmatprep.mubr.msk.bf16.mxu0 %vm429_vm0, %v3245_v28  ;;  %vm3163_vm8 = vcmp.gt.f32.partialorder %v3131_v47, 0.0 }
 0x346   : > { %v3193_v0 = vmul.f32 0.2, %v3129_v36  ;;  %v3130_v35 = vadd.f32 %v5089_v40, %v6336_v54  ;;  %5043 = vmatmul.mubr.msk.bf16.gmra.mrb[80].mxu0 %vm429_vm0, %v3246_v25  ;;  %vm3161_vm9 = vcmp.gt.f32.partialorder %v3129_v36, 0.0  ;;  %v5492_v25 = vmov -inf  }
 0x347   : > { %vm3164_vm10 = vcmp.gt.f32.partialorder %v3132_v7, 0.0  ;;  %v3196_v37 = vmul.f32 0.2, %v3132_v7  ;;  %v3227_v22 = vsel %vm3163_vm8, %v3131_v47, %v3195_v60  ;;  %3768 = vst.msk [vmem:[#allocation3 + $0x40] sm:$0xff] %vm429_vm0, %v5492_v25  ;;  %3757 = vst.msk [vmem:[#allocation3] sm:$0xff] %vm429_vm0, %v5492_v25  ;;  %v3538_v47 = vpop.permute.xlu1 %3537 }
 0x348   : > { %vm3162_vm11 = vcmp.gt.f32.partialorder %v3130_v35, 0.0  ;;  %v3194_v18 = vmul.f32 0.2, %v3130_v35  ;;  %v5012_v23 = vpop.f32.mrb[8].mxu1  ;;  %v3225_v30 = vsel %vm3161_vm9, %v3129_v36, %v3193_v0  ;;  %3758 = vst.msk [vmem:[#allocation3 + $0x8] sm:$0xff] %vm429_vm0, %v5492_v25  ;;  %3759 = vst.msk [vmem:[#allocation3 + $0x10] sm:$0xff] %vm429_vm0, %v5492_v25 }
 0x349   : > { %v3228_v24 = vsel %vm3164_vm10, %v3132_v7, %v3196_v37  ;;  %v5090_v42 = vadd.f32 %v5012_v23, %v6300_v48  ;;  %v3039_v32 = vpop.f32.mrb[9].mxu1  ;;  %3767 = vst.msk [vmem:[#allocation3 + $0x20] sm:$0xff] %vm429_vm0, %v5492_v25  ;;  %3769 = vst.msk [vmem:[#allocation3 + $0x60] sm:$0xff] %vm429_vm0, %v5492_v25  ;;  %v6437_v37 = vld [vmem:[%s6633_s6] ss:$0 sm:$0xff] }
 0x34a   : > { %v3226_v49 = vsel %vm3162_vm11, %v3130_v35, %v3194_v18  ;;  %v5091_v34 = vadd.f32 %v3039_v32, %v6302_v5  ;;  %v5013_v50 = vpop.f32.mrb[10].mxu1  ;;  %v3248_v52 = vpack.c.bf16 %v3228_v24, %v3227_v22  ;;  %3770 = vst.msk [vmem:[#allocation3 + $0x80] sm:$0xff] %vm429_vm0, %v5492_v25  ;;  %3771 = vst.msk [vmem:[#allocation3 + $0xa0] sm:$0xff] %vm429_vm0, %v5492_v25 }
 0x34b   : > { %v3135_v38 = vadd.f32 %v5090_v42, %v6336_v54  ;;  %v5092_v39 = vadd.f32 %v5013_v50, %v6304_v8  ;;  %v3042_v41 = vpop.f32.mrb[11].mxu1  ;;  %v3247_v55 = vpack.c.bf16 %v3226_v49, %v3225_v30  ;;  %3772 = vst.msk [vmem:[#allocation3 + $0xc0] sm:$0xff] %vm429_vm0, %v5492_v25  ;;  %3773 = vst.msk [vmem:[#allocation3 + $0xe0] sm:$0xff] %vm429_vm0, %v5492_v25  ;;  %v3540_v27 = vpop.permute.xlu1 %3539 }
 0x34c   : > { %v3133_v53 = vadd.f32 %v5091_v34, %v6336_v54  ;;  %v5093_v31 = vadd.f32 %v3042_v41, %v6306_v12  ;;  %3774 = vst.msk [vmem:[#allocation3 + $0x100] sm:$0xff] %vm429_vm0, %v5492_v25  ;;  %3775 = vst.msk [vmem:[#allocation3 + $0x120] sm:$0xff] %vm429_vm0, %v5492_v25 }
 0x34d   : > { %v3199_v6 = vmul.f32 0.2, %v3135_v38  ;;  %v3136_v48 = vadd.f32 %v5092_v39, %v6336_v54  ;;  %5046 = vmatprep.mubr.msk.bf16.mxu0 %vm429_vm0, %v3247_v55  ;;  %vm3167_vm12 = vcmp.gt.f32.partialorder %v3135_v38, 0.0  ;;  %3776 = vst.msk [vmem:[#allocation3 + $0x140] sm:$0xff] %vm429_vm0, %v5492_v25  ;;  %3777 = vst.msk [vmem:[#allocation3 + $0x160] sm:$0xff] %vm429_vm0, %v5492_v25 }
 0x34e   : > { %v3197_v43 = vmul.f32 0.2, %v3133_v53  ;;  %v3134_v5 = vadd.f32 %v5093_v31, %v6336_v54  ;;  %5047 = vmatmul.mubr.msk.bf16.gmra.mrb[84].mxu0 %vm429_vm0, %v3248_v52  ;;  %vm3165_vm13 = vcmp.gt.f32.partialorder %v3133_v53, 0.0  ;;  %3778 = vst.msk [vmem:[#allocation3 + $0x180] sm:$0xff] %vm429_vm0, %v5492_v25  ;;  %3779 = vst.msk [vmem:[#allocation3 + $0x1a0] sm:$0xff] %vm429_vm0, %v5492_v25 }
 0x34f   : > { %vm3168_vm14 = vcmp.gt.f32.partialorder %v3136_v48, 0.0  ;;  %v3200_v8 = vmul.f32 0.2, %v3136_v48  ;;  %v3231_v61 = vsel %vm3167_vm12, %v3135_v38, %v3199_v6  ;;  %3780 = vst.msk [vmem:[#allocation3 + $0x1c0] sm:$0xff] %vm429_vm0, %v5492_v25  ;;  %3781 = vst.msk [vmem:[#allocation3 + $0x1e0] sm:$0xff] %vm429_vm0, %v5492_v25  ;;  %v3548_v36 = vpop.permute.xlu1 %3547 }
 0x350   : > { %vm3166_vm15 = vcmp.gt.f32.partialorder %v3134_v5, 0.0  ;;  %v3198_v56 = vmul.f32 0.2, %v3134_v5  ;;  %v5016_v59 = vpop.f32.mrb[12].mxu1  ;;  %v3229_v1 = vsel %vm3165_vm13, %v3133_v53, %v3197_v43  ;;  %3782 = vst.msk [vmem:[#allocation3 + $0x200] sm:$0xff] %vm429_vm0, %v5492_v25 }
 0x351   : > { %v3232_v51 = vsel %vm3168_vm14, %v3136_v48, %v3200_v8  ;;  %v5094_v12 = vadd.f32 %v5016_v59, %v6308_v13  ;;  %v3055_v62 = vpop.f32.mrb[13].mxu1 }
 0x352   : > { %v3230_v2 = vsel %vm3166_vm15, %v3134_v5, %v3198_v56  ;;  %v5095_v3 = vadd.f32 %v3055_v62, %v6310_v19  ;;  %v5017_v4 = vpop.f32.mrb[14].mxu1  ;;  %v3250_v9 = vpack.c.bf16 %v3232_v51, %v3231_v61 }
 0x353   : > { %v3139_v33 = vadd.f32 %v5094_v12, %v6336_v54  ;;  %v5096_v11 = vadd.f32 %v5017_v4, %v6312_v20  ;;  %v3058_v57 = vpop.f32.mrb[15].mxu1  ;;  %v3249_v58 = vpack.c.bf16 %v3230_v2, %v3229_v1  ;;  %v3544_v60 = vpop.permute.xlu1 %3543 }
 0x354   : > { %v3137_v14 = vadd.f32 %v5095_v3, %v6336_v54  ;;  %v5097_v29 = vadd.f32 %v3058_v57, %v6314_v21 }
 0x355   : > { %v3203_v44 = vmul.f32 0.2, %v3139_v33  ;;  %v3140_v13 = vadd.f32 %v5096_v11, %v6336_v54  ;;  %5050 = vmatprep.mubr.msk.bf16.mxu0 %vm429_vm0, %v3249_v58  ;;  %vm3171_vm1 = vcmp.gt.f32.partialorder %v3139_v33, 0.0 }
 0x356   : > { %v3201_v15 = vmul.f32 0.2, %v3137_v14  ;;  %v3138_v19 = vadd.f32 %v5097_v29, %v6336_v54  ;;  %5051 = vmatmul.mubr.msk.bf16.gmra.mrb[88].mxu0 %vm429_vm0, %v3250_v9  ;;  %vm3169_vm2 = vcmp.gt.f32.partialorder %v3137_v14, 0.0  ;;  %v3534_v54 = vpop.permute.xlu0 %3533  ;;  %v3832_v9 = vld [vmem:[#allocation3 + $0x7] ss:$2 sm:$0xff] }
 0x357   : > { %vm3172_vm3 = vcmp.gt.f32.partialorder %v3140_v13, 0.0  ;;  %v3204_v20 = vmul.f32 0.2, %v3140_v13  ;;  %v3235_v45 = vsel %vm3171_vm1, %v3139_v33, %v3203_v44  ;;  %v6430_v0 = vpop.permute.xlu1 %3555  ;;  %v3866_v33 = vld [vmem:[#allocation3 + $0x8] ss:$2 sm:$0xff] }
 0x358   : > { %vm3170_vm4 = vcmp.gt.f32.partialorder %v3138_v19, 0.0  ;;  %v3202_v63 = vmul.f32 0.2, %v3138_v19  ;;  %v3233_v16 = vsel %vm3169_vm2, %v3137_v14, %v3201_v15  ;;  %v3899_v15 = vmax.f32 %v3832_v9, %v3866_v33 }
 0x359   : > { %v3236_v46 = vsel %vm3172_vm3, %v3140_v13, %v3204_v20 }
 0x35a   : > { %v3234_v21 = vsel %vm3170_vm4, %v3138_v19, %v3202_v63  ;;  %v3252_v17 = vpack.c.bf16 %v3236_v46, %v3235_v45  ;;  %v3536_v26 = vpop.permute.xlu0 %3535  ;;  %v3917_v45 = vld [vmem:[#allocation3 + $0x9] ss:$2 sm:$0xff] }
 0x35b   : > { %v3251_v10 = vpack.c.bf16 %v3234_v21, %v3233_v16  ;;  %v6439_v23 = vpop.permute.xlu1 %3551 }
 0x35d   : > { %5054 = vmatprep.mubr.msk.bf16.mxu0 %vm429_vm0, %v3251_v10 }
 0x35e   : > { %5055 = vmatmul.mubr.msk.bf16.gmra.mrb[92].mxu0 %vm429_vm0, %v3252_v17  ;;  %v3546_v28 = vpop.permute.xlu0 %3545 }
 0x35f   : > { %v6447_v31 = vpop.permute.xlu1 %3563 }
 0x362   : > { %v3542_v40 = vpop.permute.xlu0 %3541 }
 0x363   : > { %v6459_v58 = vpop.permute.xlu1 %3559 }
 0x366   : > { %v6428_v7 = vpop.permute.xlu0 %3553 }
 0x36a   : > { %v6432_v35 = vpop.permute.xlu0 %3549 }
 0x36e   : > { %v6444_v50 = vpop.permute.xlu0 %3561 }
 0x372   : > { %v6452_v51 = vpop.permute.xlu0 %3557 }
 0x376   : > { %v6461_v63 = vpop.permute.xlu0 %3569 }
 0x3f9   : > { %v5028_v18 = vpop.f32.mrb[64].mxu0 }
 0x3fa   : > { %v3383_v22 = vadd.f32 %v5028_v18, %v6437_v37  ;;  %v3374_v24 = vpop.f32.mrb[65].mxu0 }
 0x3fb   : > { %v3375_v42 = vadd.f32 %v6437_v37, %v3374_v24  ;;  %v5029_v32 = vpop.f32.mrb[66].mxu0 }
 0x3fc   : > { %v3631_v30 = vadd.f32 %v3538_v47, %v3383_v22  ;;  %v3386_v49 = vadd.f32 %v5029_v32, %v6437_v37  ;;  %v3377_v34 = vpop.f32.mrb[67].mxu0 }
 0x3fd   : > { %v3629_v52 = vadd.f32 %v3534_v54, %v3375_v42  ;;  %v3378_v38 = vadd.f32 %v6437_v37, %v3377_v34 }
 0x3fe   : > { %vm3663_vm5 = vcmp.gt.f32.partialorder %v3631_v30, 0.0  ;;  %v3695_v39 = vmul.f32 0.2, %v3631_v30  ;;  %v3632_v41 = vadd.f32 %v3540_v27, %v3386_v49 }
 0x3ff   : > { %vm3661_vm6 = vcmp.gt.f32.partialorder %v3629_v52, 0.0  ;;  %v3693_v55 = vmul.f32 0.2, %v3629_v52  ;;  %v3630_v53 = vadd.f32 %v3536_v26, %v3378_v38  ;;  %v6476_v38 = vpop.permute.xlu0 %3565 }
 0x400   : > { %v3727_v6 = vsel %vm3663_vm5, %v3631_v30, %v3695_v39  ;;  %vm3664_vm7 = vcmp.gt.f32.partialorder %v3632_v41, 0.0  ;;  %v3696_v48 = vmul.f32 0.2, %v3632_v41 }
 0x401   : > { %3801 = vst.msk [vmem:[#allocation3 + $0x48] sm:$0xff] %vm429_vm0, %v3727_v6  ;;  %v3725_v43 = vsel %vm3661_vm6, %v3629_v52, %v3693_v55  ;;  %vm3662_vm8 = vcmp.gt.f32.partialorder %v3630_v53, 0.0  ;;  %v3694_v5 = vmul.f32 0.2, %v3630_v53  ;;  %v5032_v8 = vpop.f32.mrb[68].mxu0 }
 0x402   : > { %3799 = vst.msk [vmem:[#allocation3 + $0x28] sm:$0xff] %vm429_vm0, %v3725_v43  ;;  %v3728_v56 = vsel %vm3664_vm7, %v3632_v41, %v3696_v48  ;;  %v3399_v59 = vadd.f32 %v5032_v8, %v6437_v37  ;;  %v3390_v61 = vpop.f32.mrb[69].mxu0 }
 0x403   : > { %3802 = vst.msk [vmem:[#allocation3 + $0x50] sm:$0xff] %vm429_vm0, %v3728_v56  ;;  %v3726_v12 = vsel %vm3662_vm8, %v3630_v53, %v3694_v5  ;;  %v3391_v62 = vadd.f32 %v6437_v37, %v3390_v61  ;;  %v5033_v1 = vpop.f32.mrb[70].mxu0 }
 0x404   : > { %3800 = vst.msk [vmem:[#allocation3 + $0x30] sm:$0xff] %vm429_vm0, %v3726_v12  ;;  %v3635_v2 = vadd.f32 %v3546_v28, %v3399_v59  ;;  %v3402_v3 = vadd.f32 %v5033_v1, %v6437_v37  ;;  %v3393_v4 = vpop.f32.mrb[71].mxu0  ;;  %v6468_v28 = vpop.permute.xlu1 %3571 }
 0x405   : > { %v3633_v11 = vadd.f32 %v3542_v40, %v3391_v62  ;;  %v3394_v57 = vadd.f32 %v6437_v37, %v3393_v4 }
 0x406   : > { %vm3667_vm9 = vcmp.gt.f32.partialorder %v3635_v2, 0.0  ;;  %v3699_v14 = vmul.f32 0.2, %v3635_v2  ;;  %v3636_v29 = vadd.f32 %v3548_v36, %v3402_v3 }
 0x407   : > { %vm3665_vm10 = vcmp.gt.f32.partialorder %v3633_v11, 0.0  ;;  %v3697_v44 = vmul.f32 0.2, %v3633_v11  ;;  %v3634_v13 = vadd.f32 %v3544_v60, %v3394_v57  ;;  %v3950_v60 = vmax.f32 %v3899_v15, %v3917_v45 }
 0x408   : > { %v3731_v19 = vsel %vm3667_vm9, %v3635_v2, %v3699_v14  ;;  %vm3668_vm11 = vcmp.gt.f32.partialorder %v3636_v29, 0.0  ;;  %v3700_v20 = vmul.f32 0.2, %v3636_v29  ;;  %v6483_v56 = vpop.permute.xlu1 %3567 }
 0x409   : > { %3805 = vst.msk [vmem:[#allocation3 + $0x88] sm:$0xff] %vm429_vm0, %v3731_v19  ;;  %v3729_v46 = vsel %vm3665_vm10, %v3633_v11, %v3697_v44  ;;  %vm3666_vm12 = vcmp.gt.f32.partialorder %v3634_v13, 0.0  ;;  %v3698_v16 = vmul.f32 0.2, %v3634_v13  ;;  %v5036_v21 = vpop.f32.mrb[72].mxu0 }
 0x40a   : > { %v3836_v17 = vld [vmem:[#allocation3 + $0x47] ss:$2 sm:$0xff]  ;;  %v3870_v10 = vld [vmem:[#allocation3 + $0x48] ss:$2 sm:$0xff]  ;;  %3803 = vst.msk [vmem:[#allocation3 + $0x68] sm:$0xff] %vm429_vm0, %v3729_v46  ;;  %v3732_v25 = vsel %vm3668_vm11, %v3636_v29, %v3700_v20  ;;  %v3415_v54 = vadd.f32 %v5036_v21, %v6437_v37  ;;  %v3406_v22 = vpop.f32.mrb[73].mxu0 }
 0x40b   : > { %v3834_v47 = vld [vmem:[#allocation3 + $0x27] ss:$2 sm:$0xff]  ;;  %v3868_v26 = vld [vmem:[#allocation3 + $0x28] ss:$2 sm:$0xff]  ;;  %3806 = vst.msk [vmem:[#allocation3 + $0x90] sm:$0xff] %vm429_vm0, %v3732_v25  ;;  %v3730_v27 = vsel %vm3666_vm12, %v3634_v13, %v3698_v16  ;;  %v3901_v36 = vmax.f32 %v3836_v17, %v3870_v10  ;;  %v3407_v42 = vadd.f32 %v6437_v37, %v3406_v22  ;;  %v5037_v32 = vpop.f32.mrb[74].mxu0 }
 0x40c   : > { %v3900_v40 = vmax.f32 %v3834_v47, %v3868_v26  ;;  %3804 = vst.msk [vmem:[#allocation3 + $0x70] sm:$0xff] %vm429_vm0, %v3730_v27  ;;  %v3639_v18 = vadd.f32 %v6428_v7, %v3415_v54  ;;  %v3919_v24 = vld [vmem:[#allocation3 + $0x29] ss:$2 sm:$0xff]  ;;  %v3418_v34 = vadd.f32 %v5037_v32, %v6437_v37  ;;  %v3409_v52 = vpop.f32.mrb[75].mxu0  ;;  %v6499_v21 = vpop.permute.xlu1 %3579 }
 0x40d   : > { %v3921_v39 = vld [vmem:[#allocation3 + $0x49] ss:$2 sm:$0xff]  ;;  %v3637_v41 = vadd.f32 %v6432_v35, %v3407_v42  ;;  %v3410_v7 = vadd.f32 %v6437_v37, %v3409_v52 }
 0x40e   : > { %v3951_v30 = vmax.f32 %v3900_v40, %v3919_v24  ;;  %vm3671_vm13 = vcmp.gt.f32.partialorder %v3639_v18, 0.0  ;;  %v3703_v49 = vmul.f32 0.2, %v3639_v18  ;;  %v3952_v55 = vmax.f32 %v3901_v36, %v3921_v39 }
 0x40f   : > { %v3640_v48 = vadd.f32 %v6430_v0, %v3418_v34  ;;  %vm3669_vm14 = vcmp.gt.f32.partialorder %v3637_v41, 0.0  ;;  %v3701_v43 = vmul.f32 0.2, %v3637_v41  ;;  %v3638_v5 = vadd.f32 %v6439_v23, %v3410_v7  ;;  %v6491_v23 = vpop.permute.xlu0 %3577 }
 0x410   : > { %v3967_v53 = vmax.f32 %v3950_v60, %v3951_v30  ;;  %v3735_v6 = vsel %vm3671_vm13, %v3639_v18, %v3703_v49  ;;  %v6519_v39 = vpop.permute.xlu1 %3575 }
 0x411   : > { %3809 = vst.msk [vmem:[#allocation3 + $0xc8] sm:$0xff] %vm429_vm0, %v3735_v6  ;;  %v5040_v8 = vpop.f32.mrb[76].mxu0  ;;  %v3733_v3 = vsel %vm3669_vm14, %v3637_v41, %v3701_v43  ;;  %vm3672_vm15 = vcmp.gt.f32.partialorder %v3640_v48, 0.0  ;;  %v3704_v0 = vmul.f32 0.2, %v3640_v48  ;;  %vm3670_vm1 = vcmp.gt.f32.partialorder %v3638_v5, 0.0 }
 0x412   : > { %v3968_v59 = vmax.f32 %v3967_v53, %v3952_v55  ;;  %v3840_v61 = vld [vmem:[#allocation3 + $0x87] ss:$2 sm:$0xff]  ;;  %v3874_v12 = vld [vmem:[#allocation3 + $0x88] ss:$2 sm:$0xff]  ;;  %v3431_v35 = vadd.f32 %v5040_v8, %v6437_v37  ;;  %3807 = vst.msk [vmem:[#allocation3 + $0xa8] sm:$0xff] %vm429_vm0, %v3733_v3  ;;  %v3422_v9 = vpop.f32.mrb[77].mxu0 }
 0x413   : > { %v3903_v62 = vmax.f32 %v3840_v61, %v3874_v12  ;;  %v3838_v1 = vld [vmem:[#allocation3 + $0x67] ss:$2 sm:$0xff]  ;;  %v3872_v2 = vld [vmem:[#allocation3 + $0x68] ss:$2 sm:$0xff]  ;;  %v3702_v11 = vmul.f32 0.2, %v3638_v5  ;;  %v3423_v14 = vadd.f32 %v6437_v37, %v3422_v9  ;;  %v3736_v13 = vsel %vm3672_vm15, %v3640_v48, %v3704_v0  ;;  %v3574_v60 = vpop.permute.xlu0 %3573 }
 0x414   : > { %v3902_v4 = vmax.f32 %v3838_v1, %v3872_v2  ;;  %3969 = vst.msk [vmem:[%s6487_s17] sm:$0xff] %vm429_vm0, %v3968_v59  ;;  %v3923_v33 = vld [vmem:[#allocation3 + $0x69] ss:$2 sm:$0xff]  ;;  %v3643_v57 = vadd.f32 %v6444_v50, %v3431_v35  ;;  %v5041_v29 = vpop.f32.mrb[78].mxu0  ;;  %3810 = vst.msk [vmem:[#allocation3 + $0xd0] sm:$0xff] %vm429_vm0, %v3736_v13 }
 0x415   : > { %v3434_v15 = vadd.f32 %v5041_v29, %v6437_v37  ;;  %v3425_v19 = vpop.f32.mrb[79].mxu0  ;;  %v3925_v20 = vld [vmem:[#allocation3 + $0x89] ss:$2 sm:$0xff]  ;;  %v3734_v45 = vsel %vm3670_vm1, %v3638_v5, %v3702_v11  ;;  %v3641_v16 = vadd.f32 %v6452_v51, %v3423_v14  ;;  %v6529_v11 = vpop.permute.xlu1 %3587 }
 0x416   : > { %v3953_v44 = vmax.f32 %v3902_v4, %v3923_v33  ;;  %vm3675_vm2 = vcmp.gt.f32.partialorder %v3643_v57, 0.0  ;;  %v3707_v46 = vmul.f32 0.2, %v3643_v57  ;;  %v6501_v50 = vmax.f32 %v3903_v62, %v3925_v20  ;;  %3808 = vst.msk [vmem:[#allocation3 + $0xb0] sm:$0xff] %vm429_vm0, %v3734_v45 }
 0x417   : > { %v3644_v10 = vadd.f32 %v6447_v31, %v3434_v15  ;;  %v3426_v25 = vadd.f32 %v6437_v37, %v3425_v19  ;;  %vm3673_vm3 = vcmp.gt.f32.partialorder %v3641_v16, 0.0  ;;  %v3705_v47 = vmul.f32 0.2, %v3641_v16  ;;  %v6524_v59 = vpop.permute.xlu0 %3585 }
 0x418   : > { %v3970_v17 = vmax.f32 %v3952_v55, %v3953_v44  ;;  %v3739_v54 = vsel %vm3675_vm2, %v3643_v57, %v3707_v46 }
 0x419   : > { %v5044_v26 = vpop.f32.mrb[80].mxu0  ;;  %3813 = vst.msk [vmem:[#allocation3 + $0x108] sm:$0xff] %vm429_vm0, %v3739_v54  ;;  %vm3676_vm4 = vcmp.gt.f32.partialorder %v3644_v10, 0.0  ;;  %v3708_v51 = vmul.f32 0.2, %v3644_v10  ;;  %v3642_v36 = vadd.f32 %v6459_v58, %v3426_v25  ;;  %v3737_v18 = vsel %vm3673_vm3, %v3641_v16, %v3705_v47 }
 0x41a   : > { %v3971_v27 = vmax.f32 %v3970_v17, %v6501_v50  ;;  %v3438_v40 = vpop.f32.mrb[81].mxu0  ;;  %v3447_v31 = vadd.f32 %v5044_v26, %v6437_v37  ;;  %3811 = vst.msk [vmem:[#allocation3 + $0xe8] sm:$0xff] %vm429_vm0, %v3737_v18 }
 0x41b   : > { %v3439_v22 = vadd.f32 %v6437_v37, %v3438_v40  ;;  %v5045_v24 = vpop.f32.mrb[82].mxu0  ;;  %v3740_v42 = vsel %vm3676_vm4, %v3644_v10, %v3708_v51  ;;  %vm3674_vm5 = vcmp.gt.f32.partialorder %v3642_v36, 0.0  ;;  %v3706_v32 = vmul.f32 0.2, %v3642_v36  ;;  %v3844_v41 = vld [vmem:[#allocation3 + $0xc7] ss:$2 sm:$0xff]  ;;  %v3582_v25 = vpop.permute.xlu0 %3581 }
 0x41c   : > { %v3450_v30 = vadd.f32 %v5045_v24, %v6437_v37  ;;  %v3441_v49 = vpop.f32.mrb[83].mxu0  ;;  %4384 = vst.msk [vmem:[%s6487_s17 + $0x8] sm:$0xff] %vm429_vm0, %v3971_v27  ;;  %3814 = vst.msk [vmem:[#allocation3 + $0x110] sm:$0xff] %vm429_vm0, %v3740_v42  ;;  %v3647_v58 = vadd.f32 %v6461_v63, %v3447_v31  ;;  %v3878_v7 = vld [vmem:[#allocation3 + $0xc8] ss:$2 sm:$0xff] }
 0x41d   : > { %v3645_v34 = vadd.f32 %v6476_v38, %v3439_v22  ;;  %v3442_v52 = vadd.f32 %v6437_v37, %v3441_v49  ;;  %v3738_v55 = vsel %vm3674_vm5, %v3642_v36, %v3706_v32  ;;  %v3905_v6 = vmax.f32 %v3844_v41, %v3878_v7  ;;  %v3842_v48 = vld [vmem:[#allocation3 + $0xa7] ss:$2 sm:$0xff]  ;;  %v3876_v43 = vld [vmem:[#allocation3 + $0xa8] ss:$2 sm:$0xff] }
 0x41e   : > { %v3648_v53 = vadd.f32 %v6468_v28, %v3450_v30  ;;  %3812 = vst.msk [vmem:[#allocation3 + $0xf0] sm:$0xff] %vm429_vm0, %v3738_v55  ;;  %v3904_v8 = vmax.f32 %v3842_v48, %v3876_v43  ;;  %v3927_v63 = vld [vmem:[#allocation3 + $0xa9] ss:$2 sm:$0xff]  ;;  %vm3679_vm6 = vcmp.gt.f32.partialorder %v3647_v58, 0.0  ;;  %v3711_v38 = vmul.f32 0.2, %v3647_v58 }
 0x41f   : > { %v3646_v5 = vadd.f32 %v6483_v56, %v3442_v52  ;;  %vm3677_vm7 = vcmp.gt.f32.partialorder %v3645_v34, 0.0  ;;  %v3709_v61 = vmul.f32 0.2, %v3645_v34  ;;  %v3929_v3 = vld [vmem:[#allocation3 + $0xc9] ss:$2 sm:$0xff] }
 0x420   : > { %vm3680_vm8 = vcmp.gt.f32.partialorder %v3648_v53, 0.0  ;;  %v3712_v12 = vmul.f32 0.2, %v3648_v53  ;;  %v3955_v62 = vmax.f32 %v3904_v8, %v3927_v63  ;;  %v3743_v28 = vsel %vm3679_vm6, %v3647_v58, %v3711_v38 }
 0x421   : > { %v5048_v35 = vpop.f32.mrb[84].mxu0  ;;  %vm3678_vm9 = vcmp.gt.f32.partialorder %v3646_v5, 0.0  ;;  %v3710_v1 = vmul.f32 0.2, %v3646_v5  ;;  %3817 = vst.msk [vmem:[#allocation3 + $0x148] sm:$0xff] %vm429_vm0, %v3743_v28  ;;  %v3741_v56 = vsel %vm3677_vm7, %v3645_v34, %v3709_v61  ;;  %v3956_v57 = vmax.f32 %v3905_v6, %v3929_v3 }
 0x422   : > { %v3454_v2 = vpop.f32.mrb[85].mxu0  ;;  %v3744_v4 = vsel %vm3680_vm8, %v3648_v53, %v3712_v12  ;;  %v3463_v0 = vadd.f32 %v5048_v35, %v6437_v37  ;;  %v3974_v14 = vmax.f32 %v6501_v50, %v3955_v62  ;;  %3815 = vst.msk [vmem:[#allocation3 + $0x128] sm:$0xff] %vm429_vm0, %v3741_v56  ;;  %v3590_v53 = vpop.permute.xlu0 %3589 }
 0x423   : > { %v3455_v9 = vadd.f32 %v6437_v37, %v3454_v2  ;;  %v5049_v33 = vpop.f32.mrb[86].mxu0  ;;  %v3848_v29 = vld [vmem:[#allocation3 + $0x107] ss:$2 sm:$0xff]  ;;  %v3882_v44 = vld [vmem:[#allocation3 + $0x108] ss:$2 sm:$0xff]  ;;  %3818 = vst.msk [vmem:[#allocation3 + $0x150] sm:$0xff] %vm429_vm0, %v3744_v4  ;;  %v3742_v13 = vsel %vm3678_vm9, %v3646_v5, %v3710_v1 }
 0x424   : > { %v3466_v15 = vadd.f32 %v5049_v33, %v6437_v37  ;;  %3816 = vst.msk [vmem:[#allocation3 + $0x130] sm:$0xff] %vm429_vm0, %v3742_v13  ;;  %v3651_v19 = vadd.f32 %v6491_v23, %v3463_v0  ;;  %v3457_v45 = vpop.f32.mrb[87].mxu0  ;;  %v3975_v46 = vmax.f32 %v3974_v14, %v3956_v57  ;;  %v3907_v54 = vmax.f32 %v3848_v29, %v3882_v44  ;;  %v3933_v31 = vld [vmem:[#allocation3 + $0x109] ss:$2 sm:$0xff] }
 0x425   : > { %v3649_v20 = vadd.f32 %v3574_v60, %v3455_v9  ;;  %v3846_v16 = vld [vmem:[#allocation3 + $0xe7] ss:$2 sm:$0xff]  ;;  %v3880_v50 = vld [vmem:[#allocation3 + $0xe8] ss:$2 sm:$0xff]  ;;  %v3458_v10 = vadd.f32 %v6437_v37, %v3457_v45 }
 0x426   : > { %v3652_v17 = vadd.f32 %v6499_v21, %v3466_v15  ;;  %v3906_v47 = vmax.f32 %v3846_v16, %v3880_v50  ;;  %v3931_v26 = vld [vmem:[#allocation3 + $0xe9] ss:$2 sm:$0xff]  ;;  %vm3683_vm10 = vcmp.gt.f32.partialorder %v3651_v19, 0.0  ;;  %v3715_v27 = vmul.f32 0.2, %v3651_v19  ;;  %4385 = vst.msk [vmem:[%s6487_s17 + $0x10] sm:$0xff] %vm429_vm0, %v3975_v46  ;;  %v3584_v21 = vpop.permute.xlu1 %3583  ;;  %v3594_v29 = vpop.permute.xlu0 %3593 }
 0x427   : > { %vm3681_vm11 = vcmp.gt.f32.partialorder %v3649_v20, 0.0  ;;  %v3713_v51 = vmul.f32 0.2, %v3649_v20  ;;  %v3650_v60 = vadd.f32 %v6519_v39, %v3458_v10  ;;  %v3958_v30 = vmax.f32 %v3907_v54, %v3933_v31 }
 0x428   : > { %vm3684_vm12 = vcmp.gt.f32.partialorder %v3652_v17, 0.0  ;;  %v3716_v23 = vmul.f32 0.2, %v3652_v17  ;;  %v3957_v36 = vmax.f32 %v3906_v47, %v3931_v26  ;;  %v3747_v40 = vsel %vm3683_vm10, %v3651_v19, %v3715_v27 }
 0x429   : > { %v5052_v18 = vpop.f32.mrb[88].mxu0  ;;  %3821 = vst.msk [vmem:[#allocation3 + $0x188] sm:$0xff] %vm429_vm0, %v3747_v40  ;;  %v3745_v22 = vsel %vm3681_vm11, %v3649_v20, %v3713_v51  ;;  %vm3682_vm13 = vcmp.gt.f32.partialorder %v3650_v60, 0.0  ;;  %v3714_v43 = vmul.f32 0.2, %v3650_v60 }
 0x42a   : > { %v3748_v24 = vsel %vm3684_vm12, %v3652_v17, %v3716_v23  ;;  %v3479_v42 = vadd.f32 %v5052_v18, %v6437_v37  ;;  %v3470_v32 = vpop.f32.mrb[89].mxu0  ;;  %v3978_v49 = vmax.f32 %v3956_v57, %v3957_v36  ;;  %v3852_v58 = vld [vmem:[#allocation3 + $0x147] ss:$2 sm:$0xff]  ;;  %v3886_v34 = vld [vmem:[#allocation3 + $0x148] ss:$2 sm:$0xff]  ;;  %3819 = vst.msk [vmem:[#allocation3 + $0x168] sm:$0xff] %vm429_vm0, %v3745_v22 }
 0x42b   : > { %3822 = vst.msk [vmem:[#allocation3 + $0x190] sm:$0xff] %vm429_vm0, %v3748_v24  ;;  %v3471_v52 = vadd.f32 %v6437_v37, %v3470_v32  ;;  %v3909_v39 = vmax.f32 %v3852_v58, %v3886_v34  ;;  %v3850_v41 = vld [vmem:[#allocation3 + $0x127] ss:$2 sm:$0xff]  ;;  %v3884_v7 = vld [vmem:[#allocation3 + $0x128] ss:$2 sm:$0xff]  ;;  %v5053_v5 = vpop.f32.mrb[90].mxu0  ;;  %v3746_v35 = vsel %vm3682_vm13, %v3650_v60, %v3714_v43 }
 0x42c   : > { %v3655_v55 = vadd.f32 %v6524_v59, %v3479_v42  ;;  %v3979_v6 = vmax.f32 %v3978_v49, %v3958_v30  ;;  %v3908_v48 = vmax.f32 %v3850_v41, %v3884_v7  ;;  %v3935_v8 = vld [vmem:[#allocation3 + $0x129] ss:$2 sm:$0xff]  ;;  %v3473_v61 = vpop.f32.mrb[91].mxu0  ;;  %v3482_v62 = vadd.f32 %v5053_v5, %v6437_v37  ;;  %v3592_v59 = vpop.permute.xlu1 %3591  ;;  %3820 = vst.msk [vmem:[#allocation3 + $0x170] sm:$0xff] %vm429_vm0, %v3746_v35 }
 0x42d   : > { %v3653_v38 = vadd.f32 %v3582_v25, %v3471_v52  ;;  %v3474_v28 = vadd.f32 %v6437_v37, %v3473_v61  ;;  %v3937_v1 = vld [vmem:[#allocation3 + $0x149] ss:$2 sm:$0xff] }
 0x42e   : > { %vm3687_vm14 = vcmp.gt.f32.partialorder %v3655_v55, 0.0  ;;  %v3719_v63 = vmul.f32 0.2, %v3655_v55  ;;  %v3959_v12 = vmax.f32 %v3908_v48, %v3935_v8  ;;  %4386 = vst.msk [vmem:[%s6487_s17 + $0x18] sm:$0xff] %vm429_vm0, %v3979_v6  ;;  %v3960_v56 = vmax.f32 %v3909_v39, %v3937_v1 }
 0x42f   : > { %vm3685_vm15 = vcmp.gt.f32.partialorder %v3653_v38, 0.0  ;;  %v3717_v3 = vmul.f32 0.2, %v3653_v38  ;;  %v3656_v0 = vadd.f32 %v6529_v11, %v3482_v62  ;;  %v3654_v9 = vadd.f32 %v3584_v21, %v3474_v28 }
 0x430   : > { %v3751_v2 = vsel %vm3687_vm14, %v3655_v55, %v3719_v63  ;;  %v3982_v4 = vmax.f32 %v3958_v30, %v3959_v12  ;;  %v3596_v25 = vpop.permute.xlu1 %3595 }
 0x431   : > { %3825 = vst.msk [vmem:[#allocation3 + $0x1c8] sm:$0xff] %vm429_vm0, %v3751_v2  ;;  %v5056_v33 = vpop.f32.mrb[92].mxu0  ;;  %v3749_v57 = vsel %vm3685_vm15, %v3653_v38, %v3717_v3  ;;  %vm3688_vm1 = vcmp.gt.f32.partialorder %v3656_v0, 0.0  ;;  %v3720_v15 = vmul.f32 0.2, %v3656_v0  ;;  %vm3686_vm2 = vcmp.gt.f32.partialorder %v3654_v9, 0.0 }
 0x432   : > { %v3495_v14 = vadd.f32 %v5056_v33, %v6437_v37  ;;  %v3983_v44 = vmax.f32 %v3982_v4, %v3960_v56  ;;  %v3856_v13 = vld [vmem:[#allocation3 + $0x187] ss:$2 sm:$0xff]  ;;  %3823 = vst.msk [vmem:[#allocation3 + $0x1a8] sm:$0xff] %vm429_vm0, %v3749_v57  ;;  %v3486_v19 = vpop.f32.mrb[93].mxu0  ;;  %v3890_v20 = vld [vmem:[#allocation3 + $0x188] ss:$2 sm:$0xff] }
 0x433   : > { %v3718_v45 = vmul.f32 0.2, %v3654_v9  ;;  %v3487_v11 = vadd.f32 %v6437_v37, %v3486_v19  ;;  %v5057_v16 = vpop.f32.mrb[94].mxu0  ;;  %v3752_v50 = vsel %vm3688_vm1, %v3656_v0, %v3720_v15  ;;  %v3911_v27 = vmax.f32 %v3856_v13, %v3890_v20  ;;  %v3854_v51 = vld [vmem:[#allocation3 + $0x167] ss:$2 sm:$0xff] }
 0x434   : > { %v3659_v46 = vadd.f32 %v3594_v29, %v3495_v14  ;;  %v3498_v17 = vadd.f32 %v5057_v16, %v6437_v37  ;;  %v3489_v10 = vpop.f32.mrb[95].mxu0  ;;  %4387 = vst.msk [vmem:[%s6487_s17 + $0x20] sm:$0xff] %vm429_vm0, %v3983_v44  ;;  %3826 = vst.msk [vmem:[#allocation3 + $0x1d0] sm:$0xff] %vm429_vm0, %v3752_v50  ;;  %v3888_v23 = vld [vmem:[#allocation3 + $0x168] ss:$2 sm:$0xff] }
 0x435   : > { %v3750_v54 = vsel %vm3686_vm2, %v3654_v9, %v3718_v45  ;;  %v3657_v26 = vadd.f32 %v3590_v53, %v3487_v11  ;;  %v3490_v40 = vadd.f32 %v6437_v37, %v3489_v10  ;;  %v3910_v60 = vmax.f32 %v3854_v51, %v3888_v23  ;;  %v3939_v31 = vld [vmem:[#allocation3 + $0x169] ss:$2 sm:$0xff] }
 0x436   : > { %vm3691_vm3 = vcmp.gt.f32.partialorder %v3659_v46, 0.0  ;;  %v3723_v47 = vmul.f32 0.2, %v3659_v46  ;;  %3824 = vst.msk [vmem:[#allocation3 + $0x1b0] sm:$0xff] %vm429_vm0, %v3750_v54  ;;  %v3660_v36 = vadd.f32 %v3596_v25, %v3498_v17  ;;  %v3941_v30 = vld [vmem:[#allocation3 + $0x189] ss:$2 sm:$0xff] }
 0x437   : > { %vm3689_vm4 = vcmp.gt.f32.partialorder %v3657_v26, 0.0  ;;  %v3721_v21 = vmul.f32 0.2, %v3657_v26  ;;  %v3658_v24 = vadd.f32 %v3592_v59, %v3490_v40  ;;  %v3961_v42 = vmax.f32 %v3910_v60, %v3939_v31 }
 0x438   : > { %v3755_v18 = vsel %vm3691_vm3, %v3659_v46, %v3723_v47  ;;  %vm3692_vm5 = vcmp.gt.f32.partialorder %v3660_v36, 0.0  ;;  %v3724_v22 = vmul.f32 0.2, %v3660_v36  ;;  %v3962_v37 = vmax.f32 %v3911_v27, %v3941_v30 }
 0x439   : > { %3829 = vst.msk [vmem:[#allocation3 + $0x208] sm:$0xff] %vm429_vm0, %v3755_v18  ;;  %v3753_v32 = vsel %vm3689_vm4, %v3657_v26, %v3721_v21  ;;  %vm3690_vm6 = vcmp.gt.f32.partialorder %v3658_v24, 0.0  ;;  %v3722_v58 = vmul.f32 0.2, %v3658_v24  ;;  %v3986_v34 = vmax.f32 %v3960_v56, %v3961_v42 }
 0x43a   : > { %3827 = vst.msk [vmem:[#allocation3 + $0x1e8] sm:$0xff] %vm429_vm0, %v3753_v32  ;;  %v3756_v49 = vsel %vm3692_vm5, %v3660_v36, %v3724_v22 }
 0x43b   : > { %3830 = vst.msk [vmem:[#allocation3 + $0x210] sm:$0xff] %vm429_vm0, %v3756_v49  ;;  %v3860_v52 = vld [vmem:[#allocation3 + $0x1c7] ss:$2 sm:$0xff]  ;;  %v3894_v39 = vld [vmem:[#allocation3 + $0x1c8] ss:$2 sm:$0xff]  ;;  %v3754_v41 = vsel %vm3690_vm6, %v3658_v24, %v3722_v58  ;;  %v3987_v7 = vmax.f32 %v3986_v34, %v3962_v37 }
 0x43c   : > { %3828 = vst.msk [vmem:[#allocation3 + $0x1f0] sm:$0xff] %vm429_vm0, %v3754_v41  ;;  %v3913_v6 = vmax.f32 %v3860_v52, %v3894_v39  ;;  %v3945_v8 = vld [vmem:[#allocation3 + $0x1c9] ss:$2 sm:$0xff] }
 0x43d   : > { %v3858_v55 = vld [vmem:[#allocation3 + $0x1a7] ss:$2 sm:$0xff]  ;;  %v3892_v53 = vld [vmem:[#allocation3 + $0x1a8] ss:$2 sm:$0xff]  ;;  %4388 = vst.msk [vmem:[%s6487_s17 + $0x28] sm:$0xff] %vm429_vm0, %v3987_v7 }
 0x43e   : > { %v3912_v48 = vmax.f32 %v3858_v55, %v3892_v53  ;;  %v3943_v43 = vld [vmem:[#allocation3 + $0x1a9] ss:$2 sm:$0xff]  ;;  %v3964_v63 = vmax.f32 %v3913_v6, %v3945_v8 }
 0x440   : > { %v3963_v5 = vmax.f32 %v3912_v48, %v3943_v43 }
 0x442   : > { %v3990_v38 = vmax.f32 %v3962_v37, %v3963_v5  ;;  %v3864_v61 = vld [vmem:[#allocation3 + $0x207] ss:$2 sm:$0xff]  ;;  %v3898_v12 = vld [vmem:[#allocation3 + $0x208] ss:$2 sm:$0xff] }
 0x443   : > { %v3862_v62 = vld [vmem:[#allocation3 + $0x1e7] ss:$2 sm:$0xff]  ;;  %v3896_v28 = vld [vmem:[#allocation3 + $0x1e8] ss:$2 sm:$0xff]  ;;  %v3915_v59 = vmax.f32 %v3864_v61, %v3898_v12 }
 0x444   : > { %v3991_v35 = vmax.f32 %v3990_v38, %v3964_v63  ;;  %v3914_v1 = vmax.f32 %v3862_v62, %v3896_v28  ;;  %v3947_v2 = vld [vmem:[#allocation3 + $0x1e9] ss:$2 sm:$0xff] }
 0x445   : > { %v3949_v56 = vld [vmem:[#allocation3 + $0x209] ss:$2 sm:$0xff] }
 0x446   : > { %4389 = vst.msk [vmem:[%s6487_s17 + $0x30] sm:$0xff] %vm429_vm0, %v3991_v35  ;;  %v3965_v3 = vmax.f32 %v3914_v1, %v3947_v2  ;;  %v3966_v4 = vmax.f32 %v3915_v59, %v3949_v56 }
 0x448   : > { %v3994_v0 = vmax.f32 %v3964_v63, %v3965_v3 }
 0x44a   : > { %v3995_v9 = vmax.f32 %v3994_v0, %v3966_v4 }
 0x44c   : > { %4390 = vst.msk [vmem:[%s6487_s17 + $0x38] sm:$0xff] %vm429_vm0, %v3995_v9 }
 0x44d   : > { %5439 = shalt.err (!%p5436_p3)
}
 0x44e   : > { %s5440_s13 = scalar_lea.hbm %s6578_s23, 1024  ;;  %s5444_s16 = scalar_lea.hbm %s6634_s7, 2048 }
 0x44f   : > { %p5441_p4 = scmp.ne.s32.totalorder %s6578_s23, %s5440_s13  ;;  %p5445_p9 = scmp.lt.u32.totalorder %s6578_s23, %s6634_s7 }
 0x450   : > { %p5446_p10 = scmp.lt.u32.totalorder %s5444_s16, %s5440_s13  ;;  %p5448_p12 = scmp.lt.u32.totalorder %s5440_s13, %s6578_s23 }
 0x451   : > { %p5442_p7 = pnand %p5441_p4, %p5574_p5 }
 0x452   : > { %p5447_p11 = por %p5446_p10, %p5445_p9 }
 0x453   : > { %p5443_p8 = pneg %p5442_p7 }
 0x454   : > { %p5449_p13 = por %p5448_p12, %p5447_p11 }
 0x456   : > { %p5450_p0 = pnand %p5449_p13, %p5443_p8 }
 0x458   : > { %5453 = shalt.err (!%p5450_p0)
}
 0x459   : > { %s5494_s21 = smov 128   ;;  %s5495_s22 = smov 8  }
 0x45a   : > { %5322 = dma.vmem_to_hbm [thread:$0]  (%p5574_p5), %s6580_s19, 1024, %s6578_s23, %s6586_s20, %s5494_s21, %s5494_s21, %s5495_s22  }
 0x45b PF: > { %p5328_p1 = scmp.ge.s32.totalorder %s5488_s27, 2  ;;  %s4027_s28 = sand.u32 1, %s5476_s24  }
 0x45c   : > { %s4028_s29 = scalar_lea.sflag [#allocation5], %s4027_s28 }
 0x45d   : > { %p5325_p2 = pnand %p5328_p1, %p5578_p6 }
 0x45f   : > { %5471 = dma.done.wait (!%p5325_p2), %s4028_s29, 1024  }
 0x460   : > { %5473 = vsyncadd (!%p5325_p2), %s4028_s29, 4294966272  ;;  %p17_p3 = scmp.ge.s32.totalorder %s5561_s30, 4   ;;  %s6637_s24 = smov %s5480_s25 }
 0x461   : > { %s6638_s25 = smov %s5484_s26  ;;  %s6639_s26 = smov %s5572_s10 }
 0x462   : > { %s6640_s27 = smov %s5561_s30  ;;  %19 = sbr.rel (!%p17_p3) target bundleno = 3 (0x3), region = 153 }
 0x469   :  { %4033 = vsyncpa [#allocation5], 1 }
 0x46a   :  { %4035 = vsyncpa [#allocation5 + $0x1], 1 }

</bundles_post_ra>
